<compile_context>
chip_gen: v7x
topology: tpu7x:2x2x1
jax: 0.10.0
libtpu: 0.0.40
codegen_flags: <defaults>
</compile_context>

<pallas_src>
import functools

import jax
import jax.numpy as jnp
from jax.experimental import pallas as pl
from jax.experimental.pallas import tpu as pltpu


# ---------------------------------------------------------------------------
# Pass 1: per-image 3x3 conv (im2col matmul) + per-channel sum / sum-of-squares
# ---------------------------------------------------------------------------
def _conv_stats_kernel(xp_ref, w_ref, y_ref, stat_ref, *, th):
    """xp_ref: (1, H+2, W+2, Cin) zero-padded input tile
       w_ref : (9*Cin, Cpad)      im2col weights, channels zero-padded to 128 lanes
       y_ref : (1, H, W, Cpad)    conv output tile
       stat_ref: (2, Cpad)        [sum; sum-of-squares], accumulated over the grid
    """
    _, Hp, Wp, Cin = xp_ref.shape
    H, W = Hp - 2, Wp - 2
    Cpad = y_ref.shape[-1]

    @pl.when(pl.program_id(0) == 0)
    def _init():
        stat_ref[...] = jnp.zeros_like(stat_ref)

    w = w_ref[...]                                             # (9*Cin, Cpad)
    s_acc = jnp.zeros((1, Cpad), jnp.float32)
    ss_acc = jnp.zeros((1, Cpad), jnp.float32)

    # Chunk the H axis so each matmul LHS stays ~128 rows (bounds vreg pressure).
    for c in range(H // th):
        h0 = c * th
        xc = xp_ref[0, h0:h0 + th + 2]                         # (th+2, W+2, Cin)
        patches = jnp.concatenate(
            [xc[kh:kh + th, kw:kw + W, :].reshape(th * W, Cin)
             for kh in range(3) for kw in range(3)],
            axis=-1)                                           # (th*W, 9*Cin) im2col
        yc = jnp.dot(patches, w,
                     preferred_element_type=jnp.float32)       # (th*W, Cpad) one MXU matmul
        y_ref[0, h0:h0 + th] = yc.reshape(th, W, Cpad)         # lane-dense, unmasked store
        s_acc = s_acc + jnp.sum(yc, axis=0, keepdims=True)
        ss_acc = ss_acc + jnp.sum(yc * yc, axis=0, keepdims=True)

    stat_ref[...] += jnp.concatenate([s_acc, ss_acc], axis=0)  # (2, Cpad)


# ---------------------------------------------------------------------------
# Pass 2: BatchNorm (batch stats) + ReLU + MaxPool2d(3, 2, 1), one image / step
# ---------------------------------------------------------------------------
def _bn_relu_pool_kernel(y_ref, stat_ref, g_ref, b_ref, o_ref, buf_ref, *, count):
    """y_ref  : (1, H, W, Cpad)   conv output
       stat_ref: (2, Cpad)        [sum; sum-of-squares] over (N, H, W)
       g_ref/b_ref: (1, Cpad)     BN gamma / beta (zero-padded channels)
       o_ref  : (1, Ho, Wo, Cpad) pooled output
       buf_ref: (Hp2, Wp2, Cpad)  VMEM scratch — zero-padded pooling buffer
    """
    eps = 1e-5
    _, H, W, Cpad = y_ref.shape
    _, Ho, Wo, _ = o_ref.shape
    Hp2, Wp2, _ = buf_ref.shape

    inv = 1.0 / count
    mean = stat_ref[0:1, :] * inv                              # (1, Cpad)
    var = jnp.maximum(stat_ref[1:2, :] * inv - mean * mean, 0.0)
    scale = (g_ref[...] * jax.lax.rsqrt(var + eps)).reshape(1, 1, Cpad)
    shift = b_ref[...].reshape(1, 1, Cpad) - mean.reshape(1, 1, Cpad) * scale

    # ReLU output >= 0, so zero padding is equivalent to -inf padding for the pool.
    buf_ref[...] = jnp.zeros_like(buf_ref)
    buf_ref[1:H + 1, 1:W + 1, :] = jnp.maximum(y_ref[0] * scale + shift, 0.0)

    # 3-tap shifted max + stride-2 subsample (reshape trick): rows, then cols.
    rmax = jnp.maximum(jnp.maximum(buf_ref[0:2 * Ho], buf_ref[1:2 * Ho + 1]),
                       buf_ref[2:2 * Ho + 2])                  # (2*Ho, Wp2, Cpad)
    rmax = rmax.reshape(Ho, 2, Wp2, Cpad)[:, 0]                # (Ho, Wp2, Cpad)
    cmax = jnp.maximum(jnp.maximum(rmax[:, 0:2 * Wo], rmax[:, 1:2 * Wo + 1]),
                       rmax[:, 2:2 * Wo + 2])                  # (Ho, 2*Wo, Cpad)
    cmax = cmax.reshape(Ho, Wo, 2, Cpad)[:, :, 0]              # (Ho, Wo, Cpad)
    o_ref[0] = cmax.astype(o_ref.dtype)                        # lane-dense store


def _pick_row_chunk(H, W, target_rows=128):
    """Largest divisor of H with chunk_rows * W <= target_rows (matmul LHS rows)."""
    th = 1
    for t in range(1, H + 1):
        if H % t == 0 and t * W <= target_rows:
            th = t
    return th


@jax.jit
def basic_block(x_nchw, w_oihw, gamma, beta):
    """Basic_block.forward: x (N, Cin, H, W) f32 -> (N, Cout, Ho, Wo) f32."""
    N, Cin, H, W = x_nchw.shape
    Cout = w_oihw.shape[0]
    Ho = (H - 1) // 2 + 1
    Wo = (W - 1) // 2 + 1
    Cpad = ((Cout + 127) // 128) * 128            # lane-dense channel padding
    Hp2, Wp2 = 2 * Ho + 2, 2 * Wo + 2             # zero-padded pool-buffer dims
    th = _pick_row_chunk(H, W)

    # ---- layout glue (plain XLA): NCHW -> NHWC, conv zero-pad, im2col weights ----
    x_nhwc = jnp.transpose(x_nchw, (0, 2, 3, 1)).astype(jnp.float32)
    xp = jnp.pad(x_nhwc, ((0, 0), (1, 1), (1, 1), (0, 0)))            # (N, H+2, W+2, Cin)
    w_hwio = jnp.transpose(w_oihw, (2, 3, 1, 0)).astype(jnp.float32)  # (3, 3, Cin, Cout)
    w2d = jnp.pad(w_hwio.reshape(9 * Cin, Cout), ((0, 0), (0, Cpad - Cout)))
    g = jnp.pad(gamma.astype(jnp.float32), (0, Cpad - Cout)).reshape(1, Cpad)
    b = jnp.pad(beta.astype(jnp.float32), (0, Cpad - Cout)).reshape(1, Cpad)

    # ---- pass 1: conv + fused per-channel sum / sum-of-squares ----
    conv_out, stats = pl.pallas_call(
        functools.partial(_conv_stats_kernel, th=th),
        out_shape=(jax.ShapeDtypeStruct((N, H, W, Cpad), jnp.float32),
                   jax.ShapeDtypeStruct((2, Cpad), jnp.float32)),
        grid_spec=pltpu.PrefetchScalarGridSpec(
            num_scalar_prefetch=0,
            grid=(N,),
            in_specs=[pl.BlockSpec((1, H + 2, W + 2, Cin), lambda n: (n, 0, 0, 0)),
                      pl.BlockSpec((9 * Cin, Cpad), lambda n: (0, 0))],
            out_specs=[pl.BlockSpec((1, H, W, Cpad), lambda n: (n, 0, 0, 0)),
                       pl.BlockSpec((2, Cpad), lambda n: (0, 0))]),
        compiler_params=pltpu.CompilerParams(
            dimension_semantics=("arbitrary",),           # stats accumulate over N
            vmem_limit_bytes=32 * 1024 * 1024),
        cost_estimate=pl.CostEstimate(
            flops=2 * N * H * W * 9 * Cin * Cpad,
            transcendentals=0,
            bytes_accessed=(xp.size + w2d.size + N * H * W * Cpad + 2 * Cpad) * 4),
    )(xp, w2d)

    # ---- pass 2: BN (batch stats) + ReLU + MaxPool 3x3/s2/p1 ----
    out_nhwc = pl.pallas_call(
        functools.partial(_bn_relu_pool_kernel, count=float(N * H * W)),
        out_shape=jax.ShapeDtypeStruct((N, Ho, Wo, Cpad), jnp.float32),
        grid_spec=pltpu.PrefetchScalarGridSpec(
            num_scalar_prefetch=0,
            grid=(N,),
            in_specs=[pl.BlockSpec((1, H, W, Cpad), lambda n: (n, 0, 0, 0)),
                      pl.BlockSpec((2, Cpad), lambda n: (0, 0)),
                      pl.BlockSpec((1, Cpad), lambda n: (0, 0)),
                      pl.BlockSpec((1, Cpad), lambda n: (0, 0))],
            out_specs=pl.BlockSpec((1, Ho, Wo, Cpad), lambda n: (n, 0, 0, 0)),
            scratch_shapes=[pltpu.VMEM((Hp2, Wp2, Cpad), jnp.float32)]),
        compiler_params=pltpu.CompilerParams(
            dimension_semantics=("parallel",),            # both TCs on v7x
            vmem_limit_bytes=32 * 1024 * 1024),
        cost_estimate=pl.CostEstimate(
            flops=10 * N * H * W * Cpad,
            transcendentals=N * Cpad,
            bytes_accessed=(N * H * W * Cpad + N * Ho * Wo * Cpad + 4 * Cpad) * 4),
    )(conv_out, stats, g, b)

    return jnp.transpose(out_nhwc[:, :, :, :Cout], (0, 3, 1, 2))   # back to NCHW


def _reference(x_nchw, w_oihw, gamma, beta):
    """Pure-JAX reference of the PyTorch forward (train-mode BN)."""
    eps = 1e-5
    y = jax.lax.conv_general_dilated(
        x_nchw.astype(jnp.float32), w_oihw.astype(jnp.float32),
        window_strides=(1, 1), padding=((1, 1), (1, 1)),
        dimension_numbers=("NCHW", "OIHW", "NCHW"))
    mean = jnp.mean(y, axis=(0, 2, 3), keepdims=True)
    var = jnp.mean((y - mean) ** 2, axis=(0, 2, 3), keepdims=True)
    y = (y - mean) * jax.lax.rsqrt(var + eps) * gamma.reshape(1, -1, 1, 1) \
        + beta.reshape(1, -1, 1, 1)
    y = jnp.maximum(y, 0.0)
    return jax.lax.reduce_window(
        y, -jnp.inf, jax.lax.max,
        window_dimensions=(1, 1, 3, 3), window_strides=(1, 1, 2, 2),
        padding=((0, 0), (0, 0), (1, 1), (1, 1)))


if __name__ == "__main__":
    # deterministic params / inputs (matches nn.Conv2d(Cin, Cout, 3) / BatchNorm2d(Cout))
    N, Cin, Cout, H, W = 2, 4, 8, 16, 16
    key = jax.random.PRNGKey(0)
    kx, kw, kg, kb = jax.random.split(key, 4)

    x = jax.random.normal(kx, (N, Cin, H, W), jnp.float32)
    w = jax.random.normal(kw, (Cout, Cin, 3, 3), jnp.float32) * 0.1   # conv weight, OIHW
    gamma = 1.0 + 0.1 * jax.random.normal(kg, (Cout,), jnp.float32)   # BN weight
    beta = 0.1 * jax.random.normal(kb, (Cout,), jnp.float32)          # BN bias

    out = basic_block(x, w, gamma, beta)
    out = jax.block_until_ready(out)

    ref = _reference(x, w, gamma, beta)
    assert out.shape == (N, Cout, 8, 8), out.shape
    err = float(jnp.max(jnp.abs(out - ref)))
    assert err < 1e-2, f"max abs err too large: {err}"

    print("KERNEL_OK")
</pallas_src>

<mosaic_0001>
module attributes {stable_mosaic.version = 11 : i64} {
  func.func @_bn_relu_pool_kernel(%arg0: i32, %arg1: memref<1x16x16x128xf32, #tpu.memory_space<vmem>>, %arg2: memref<2x128xf32, #tpu.memory_space<vmem>>, %arg3: memref<1x128xf32, #tpu.memory_space<vmem>>, %arg4: memref<1x128xf32, #tpu.memory_space<vmem>>, %arg5: memref<1x8x8x128xf32, #tpu.memory_space<vmem>>, %arg6: memref<18x18x128xf32, #tpu.memory_space<vmem>>) attributes {dimension_semantics = [#tpu.dimension_semantics<parallel>], iteration_bounds = array<i64: 2>, scalar_prefetch = 0 : i64, scratch_operands = 1 : i64, tpu.core_type = #tpu.core_type<tc>, window_params = [{transform_indices = @transform_0, window_bounds = array<i64: 1, 16, 16, 128>}, {pipeline_mode = #tpu.pipeline_mode<synchronous>, transform_indices = @transform_1, window_bounds = array<i64: 2, 128>}, {pipeline_mode = #tpu.pipeline_mode<synchronous>, transform_indices = @transform_2, window_bounds = array<i64: 1, 128>}, {pipeline_mode = #tpu.pipeline_mode<synchronous>, transform_indices = @transform_3, window_bounds = array<i64: 1, 128>}, {transform_indices = @transform_4, window_bounds = array<i64: 1, 8, 8, 128>}]} {
    %c0 = arith.constant 0 : index
    %c0_0 = arith.constant 0 : index
    %0 = vector.load %arg2[%c0, %c0_0] : memref<2x128xf32, #tpu.memory_space<vmem>>, vector<1x128xf32>
    %cst = arith.constant 0.001953125 : f32
    %1 = vector.broadcast %cst : f32 to vector<1x128xf32>
    %2 = arith.mulf %0, %1 : vector<1x128xf32>
    %c1 = arith.constant 1 : index
    %c0_1 = arith.constant 0 : index
    %3 = vector.load %arg2[%c1, %c0_1] : memref<2x128xf32, #tpu.memory_space<vmem>>, vector<1x128xf32>
    %cst_2 = arith.constant 0.001953125 : f32
    %4 = vector.broadcast %cst_2 : f32 to vector<1x128xf32>
    %5 = arith.mulf %3, %4 : vector<1x128xf32>
    %6 = arith.mulf %2, %2 : vector<1x128xf32>
    %7 = arith.subf %5, %6 : vector<1x128xf32>
    %cst_3 = arith.constant 0.000000e+00 : f32
    %8 = vector.broadcast %cst_3 : f32 to vector<1x128xf32>
    %9 = arith.maximumf %7, %8 : vector<1x128xf32>
    %c0_4 = arith.constant 0 : index
    %c0_5 = arith.constant 0 : index
    %10 = vector.load %arg3[%c0_4, %c0_5] : memref<1x128xf32, #tpu.memory_space<vmem>>, vector<1x128xf32>
    %cst_6 = arith.constant 9.99999974E-6 : f32
    %11 = vector.broadcast %cst_6 : f32 to vector<1x128xf32>
    %12 = arith.addf %9, %11 : vector<1x128xf32>
    %13 = math.rsqrt %12 : vector<1x128xf32>
    %14 = arith.mulf %10, %13 : vector<1x128xf32>
    %15 = vector.shape_cast %14 : vector<1x128xf32> to vector<1x1x128xf32>
    %c0_7 = arith.constant 0 : index
    %c0_8 = arith.constant 0 : index
    %16 = vector.load %arg4[%c0_7, %c0_8] : memref<1x128xf32, #tpu.memory_space<vmem>>, vector<1x128xf32>
    %17 = vector.shape_cast %16 : vector<1x128xf32> to vector<1x1x128xf32>
    %18 = vector.shape_cast %2 : vector<1x128xf32> to vector<1x1x128xf32>
    %19 = arith.mulf %18, %15 : vector<1x1x128xf32>
    %20 = arith.subf %17, %19 : vector<1x1x128xf32>
    %cst_9 = arith.constant 0.000000e+00 : f32
    %21 = vector.broadcast %cst_9 : f32 to vector<18x18x128xf32>
    %c0_10 = arith.constant 0 : index
    %c0_11 = arith.constant 0 : index
    %c0_12 = arith.constant 0 : index
    %22 = vector.load %arg6[%c0_10, %c0_11, %c0_12] : memref<18x18x128xf32, #tpu.memory_space<vmem>>, vector<18x18x128xf32>
    tpu.vector_store %arg6[%c0_10, %c0_11, %c0_12], %21 {strides = array<i32>} : memref<18x18x128xf32, #tpu.memory_space<vmem>>, vector<18x18x128xf32>,
    %c0_13 = arith.constant 0 : index
    %c0_14 = arith.constant 0 : index
    %c0_15 = arith.constant 0 : index
    %c0_16 = arith.constant 0 : index
    %23 = vector.load %arg1[%c0_13, %c0_14, %c0_15, %c0_16] : memref<1x16x16x128xf32, #tpu.memory_space<vmem>>, vector<1x16x16x128xf32>
    %24 = vector.shape_cast %23 : vector<1x16x16x128xf32> to vector<16x16x128xf32>
    %25 = vector.broadcast %15 : vector<1x1x128xf32> to vector<16x16x128xf32>
    %26 = arith.mulf %24, %25 : vector<16x16x128xf32>
    %27 = vector.broadcast %20 : vector<1x1x128xf32> to vector<16x16x128xf32>
    %28 = arith.addf %26, %27 : vector<16x16x128xf32>
    %cst_17 = arith.constant 0.000000e+00 : f32
    %29 = vector.broadcast %cst_17 : f32 to vector<16x16x128xf32>
    %30 = arith.maximumf %28, %29 : vector<16x16x128xf32>
    %c1_18 = arith.constant 1 : index
    %c1_19 = arith.constant 1 : index
    %c0_20 = arith.constant 0 : index
    %31 = vector.load %arg6[%c1_18, %c1_19, %c0_20] : memref<18x18x128xf32, #tpu.memory_space<vmem>>, vector<16x16x128xf32>
    tpu.vector_store %arg6[%c1_18, %c1_19, %c0_20], %30 {strides = array<i32>} : memref<18x18x128xf32, #tpu.memory_space<vmem>>, vector<16x16x128xf32>,
    %c0_21 = arith.constant 0 : index
    %c0_22 = arith.constant 0 : index
    %c0_23 = arith.constant 0 : index
    %32 = vector.load %arg6[%c0_21, %c0_22, %c0_23] : memref<18x18x128xf32, #tpu.memory_space<vmem>>, vector<16x18x128xf32>
    %c1_24 = arith.constant 1 : index
    %c0_25 = arith.constant 0 : index
    %c0_26 = arith.constant 0 : index
    %33 = vector.load %arg6[%c1_24, %c0_25, %c0_26] : memref<18x18x128xf32, #tpu.memory_space<vmem>>, vector<16x18x128xf32>
    %34 = arith.maximumf %32, %33 : vector<16x18x128xf32>
    %c2 = arith.constant 2 : index
    %c0_27 = arith.constant 0 : index
    %c0_28 = arith.constant 0 : index
    %35 = vector.load %arg6[%c2, %c0_27, %c0_28] : memref<18x18x128xf32, #tpu.memory_space<vmem>>, vector<16x18x128xf32>
    %36 = arith.maximumf %34, %35 : vector<16x18x128xf32>
    %37 = vector.shape_cast %36 : vector<16x18x128xf32> to vector<8x2x18x128xf32>
    %38 = vector.extract_strided_slice %37 {offsets = [0, 0, 0, 0], sizes = [8, 1, 18, 128], strides = [1, 1, 1, 1]} : vector<8x2x18x128xf32> to vector<8x1x18x128xf32>
    %39 = vector.shape_cast %38 : vector<8x1x18x128xf32> to vector<8x18x128xf32>
    %40 = vector.extract_strided_slice %39 {offsets = [0, 0, 0], sizes = [8, 16, 128], strides = [1, 1, 1]} : vector<8x18x128xf32> to vector<8x16x128xf32>
    %41 = vector.extract_strided_slice %39 {offsets = [0, 1, 0], sizes = [8, 16, 128], strides = [1, 1, 1]} : vector<8x18x128xf32> to vector<8x16x128xf32>
    %42 = arith.maximumf %40, %41 : vector<8x16x128xf32>
    %43 = vector.extract_strided_slice %39 {offsets = [0, 2, 0], sizes = [8, 16, 128], strides = [1, 1, 1]} : vector<8x18x128xf32> to vector<8x16x128xf32>
    %44 = arith.maximumf %42, %43 : vector<8x16x128xf32>
    %45 = vector.shape_cast %44 : vector<8x16x128xf32> to vector<8x8x2x128xf32>
    %46 = vector.extract_strided_slice %45 {offsets = [0, 0, 0, 0], sizes = [8, 8, 1, 128], strides = [1, 1, 1, 1]} : vector<8x8x2x128xf32> to vector<8x8x1x128xf32>
    %47 = vector.shape_cast %46 : vector<8x8x1x128xf32> to vector<8x8x128xf32>
    %c0_29 = arith.constant 0 : index
    %c0_30 = arith.constant 0 : index
    %c0_31 = arith.constant 0 : index
    %c0_32 = arith.constant 0 : index
    %48 = vector.load %arg5[%c0_29, %c0_30, %c0_31, %c0_32] : memref<1x8x8x128xf32, #tpu.memory_space<vmem>>, vector<1x8x8x128xf32>
    %49 = vector.shape_cast %48 : vector<1x8x8x128xf32> to vector<8x8x128xf32>
    %50 = vector.shape_cast %47 : vector<8x8x128xf32> to vector<1x8x8x128xf32>
    tpu.vector_store %arg5[%c0_29, %c0_30, %c0_31, %c0_32], %50 {strides = array<i32>} : memref<1x8x8x128xf32, #tpu.memory_space<vmem>>, vector<1x8x8x128xf32>,
    return
  }
  func.func @transform_0(%arg0: i32) -> (i32, i32, i32, i32) {
    %c0_i32 = arith.constant 0 : i32
    %c0_i32_0 = arith.constant 0 : i32
    %c0_i32_1 = arith.constant 0 : i32
    %c0_i32_2 = arith.constant 0 : i32
    return %arg0, %c0_i32, %c0_i32_0, %c0_i32_1 : i32, i32, i32, i32
  }
  func.func @transform_1(%arg0: i32) -> (i32, i32) {
    %c0_i32 = arith.constant 0 : i32
    %c0_i32_0 = arith.constant 0 : i32
    %c0_i32_1 = arith.constant 0 : i32
    return %c0_i32, %c0_i32_0 : i32, i32
  }
  func.func @transform_2(%arg0: i32) -> (i32, i32) {
    %c0_i32 = arith.constant 0 : i32
    %c0_i32_0 = arith.constant 0 : i32
    %c0_i32_1 = arith.constant 0 : i32
    return %c0_i32, %c0_i32_0 : i32, i32
  }
  func.func @transform_3(%arg0: i32) -> (i32, i32) {
    %c0_i32 = arith.constant 0 : i32
    %c0_i32_0 = arith.constant 0 : i32
    %c0_i32_1 = arith.constant 0 : i32
    return %c0_i32, %c0_i32_0 : i32, i32
  }
  func.func @transform_4(%arg0: i32) -> (i32, i32, i32, i32) {
    %c0_i32 = arith.constant 0 : i32
    %c0_i32_0 = arith.constant 0 : i32
    %c0_i32_1 = arith.constant 0 : i32
    %c0_i32_2 = arith.constant 0 : i32
    return %arg0, %c0_i32, %c0_i32_0, %c0_i32_1 : i32, i32, i32, i32
  }
}

module attributes {stable_mosaic.version = 11 : i64} {
  func.func @_conv_stats_kernel(%arg0: i32, %arg1: memref<1x18x18x4xf32, #tpu.memory_space<vmem>>, %arg2: memref<36x128xf32, #tpu.memory_space<vmem>>, %arg3: memref<1x16x16x128xf32, #tpu.memory_space<vmem>>, %arg4: memref<2x128xf32, #tpu.memory_space<vmem>>) attributes {dimension_semantics = [#tpu.dimension_semantics<arbitrary>], iteration_bounds = array<i64: 2>, scalar_prefetch = 0 : i64, scratch_operands = 0 : i64, tpu.core_type = #tpu.core_type<tc>, window_params = [{transform_indices = @transform_0, window_bounds = array<i64: 1, 18, 18, 4>}, {pipeline_mode = #tpu.pipeline_mode<synchronous>, transform_indices = @transform_1, window_bounds = array<i64: 36, 128>}, {transform_indices = @transform_2, window_bounds = array<i64: 1, 16, 16, 128>}, {pipeline_mode = #tpu.pipeline_mode<synchronous>, transform_indices = @transform_3, window_bounds = array<i64: 2, 128>}]} {
    %c0_i32 = arith.constant 0 : i32
    %0 = arith.cmpi eq, %arg0, %c0_i32 : i32
    %1 = arith.extui %0 : i1 to i32
    %c0_i32_0 = arith.constant 0 : i32
    %2 = arith.cmpi ne, %1, %c0_i32_0 : i32
    scf.if %2 {
      %cst_28 = arith.constant 0.000000e+00 : f32
      %76 = vector.broadcast %cst_28 : f32 to vector<2x128xf32>
      %c0_29 = arith.constant 0 : index
      %c0_30 = arith.constant 0 : index
      %77 = vector.load %arg4[%c0_29, %c0_30] : memref<2x128xf32, #tpu.memory_space<vmem>>, vector<2x128xf32>
      tpu.vector_store %arg4[%c0_29, %c0_30], %76 {strides = array<i32>} : memref<2x128xf32, #tpu.memory_space<vmem>>, vector<2x128xf32>,
    } else {
    }
    %c0 = arith.constant 0 : index
    %c0_1 = arith.constant 0 : index
    %3 = vector.load %arg2[%c0, %c0_1] : memref<36x128xf32, #tpu.memory_space<vmem>>, vector<36x128xf32>
    %cst = arith.constant 0.000000e+00 : f32
    %4 = vector.broadcast %cst : f32 to vector<1x128xf32>
    %cst_2 = arith.constant 0.000000e+00 : f32
    %5 = vector.broadcast %cst_2 : f32 to vector<1x128xf32>
    %c0_3 = arith.constant 0 : index
    %c0_4 = arith.constant 0 : index
    %c0_5 = arith.constant 0 : index
    %c0_6 = arith.constant 0 : index
    %6 = vector.load %arg1[%c0_3, %c0_4, %c0_5, %c0_6] : memref<1x18x18x4xf32, #tpu.memory_space<vmem>>, vector<1x10x18x4xf32>
    %7 = vector.shape_cast %6 : vector<1x10x18x4xf32> to vector<10x18x4xf32>
    %8 = vector.extract_strided_slice %7 {offsets = [0, 0, 0], sizes = [8, 16, 4], strides = [1, 1, 1]} : vector<10x18x4xf32> to vector<8x16x4xf32>
    %9 = vector.shape_cast %8 : vector<8x16x4xf32> to vector<128x4xf32>
    %10 = vector.extract_strided_slice %7 {offsets = [0, 1, 0], sizes = [8, 16, 4], strides = [1, 1, 1]} : vector<10x18x4xf32> to vector<8x16x4xf32>
    %11 = vector.shape_cast %10 : vector<8x16x4xf32> to vector<128x4xf32>
    %12 = vector.extract_strided_slice %7 {offsets = [0, 2, 0], sizes = [8, 16, 4], strides = [1, 1, 1]} : vector<10x18x4xf32> to vector<8x16x4xf32>
    %13 = vector.shape_cast %12 : vector<8x16x4xf32> to vector<128x4xf32>
    %14 = vector.extract_strided_slice %7 {offsets = [1, 0, 0], sizes = [8, 16, 4], strides = [1, 1, 1]} : vector<10x18x4xf32> to vector<8x16x4xf32>
    %15 = vector.shape_cast %14 : vector<8x16x4xf32> to vector<128x4xf32>
    %16 = vector.extract_strided_slice %7 {offsets = [1, 1, 0], sizes = [8, 16, 4], strides = [1, 1, 1]} : vector<10x18x4xf32> to vector<8x16x4xf32>
    %17 = vector.shape_cast %16 : vector<8x16x4xf32> to vector<128x4xf32>
    %18 = vector.extract_strided_slice %7 {offsets = [1, 2, 0], sizes = [8, 16, 4], strides = [1, 1, 1]} : vector<10x18x4xf32> to vector<8x16x4xf32>
    %19 = vector.shape_cast %18 : vector<8x16x4xf32> to vector<128x4xf32>
    %20 = vector.extract_strided_slice %7 {offsets = [2, 0, 0], sizes = [8, 16, 4], strides = [1, 1, 1]} : vector<10x18x4xf32> to vector<8x16x4xf32>
    %21 = vector.shape_cast %20 : vector<8x16x4xf32> to vector<128x4xf32>
    %22 = vector.extract_strided_slice %7 {offsets = [2, 1, 0], sizes = [8, 16, 4], strides = [1, 1, 1]} : vector<10x18x4xf32> to vector<8x16x4xf32>
    %23 = vector.shape_cast %22 : vector<8x16x4xf32> to vector<128x4xf32>
    %24 = vector.extract_strided_slice %7 {offsets = [2, 2, 0], sizes = [8, 16, 4], strides = [1, 1, 1]} : vector<10x18x4xf32> to vector<8x16x4xf32>
    %25 = vector.shape_cast %24 : vector<8x16x4xf32> to vector<128x4xf32>
    %26 = tpu.concatenate %9, %11, %13, %15, %17, %19, %21, %23, %25 in 1 : vector<128x4xf32>, vector<128x4xf32>, vector<128x4xf32>, vector<128x4xf32>, vector<128x4xf32>, vector<128x4xf32>, vector<128x4xf32>, vector<128x4xf32>, vector<128x4xf32> -> vector<128x36xf32>
    %cst_7 = arith.constant dense<0.000000e+00> : vector<128x128xf32>
    %27 = tpu.matmul %26, %3, %cst_7 {dimension_numbers = #tpu.dot_dimension_numbers<[1], [0], [0], [1], [0, 0, 1, 1], [], []>} : vector<128x36xf32>, vector<36x128xf32>, vector<128x128xf32> -> vector<128x128xf32>
    %28 = vector.shape_cast %27 : vector<128x128xf32> to vector<8x16x128xf32>
    %c0_8 = arith.constant 0 : index
    %c0_9 = arith.constant 0 : index
    %c0_10 = arith.constant 0 : index
    %c0_11 = arith.constant 0 : index
    %29 = vector.load %arg3[%c0_8, %c0_9, %c0_10, %c0_11] : memref<1x16x16x128xf32, #tpu.memory_space<vmem>>, vector<1x8x16x128xf32>
    %30 = vector.shape_cast %29 : vector<1x8x16x128xf32> to vector<8x16x128xf32>
    %31 = vector.shape_cast %28 : vector<8x16x128xf32> to vector<1x8x16x128xf32>
    tpu.vector_store %arg3[%c0_8, %c0_9, %c0_10, %c0_11], %31 {strides = array<i32>} : memref<1x16x16x128xf32, #tpu.memory_space<vmem>>, vector<1x8x16x128xf32>,
    %cst_12 = arith.constant dense<0.000000e+00> : vector<128xf32>
    %32 = vector.multi_reduction <add>, %27, %cst_12 [0] : vector<128x128xf32> to vector<128xf32>
    %33 = vector.shape_cast %32 : vector<128xf32> to vector<1x128xf32>
    %34 = arith.addf %4, %33 : vector<1x128xf32>
    %35 = arith.mulf %27, %27 : vector<128x128xf32>
    %cst_13 = arith.constant dense<0.000000e+00> : vector<128xf32>
    %36 = vector.multi_reduction <add>, %35, %cst_13 [0] : vector<128x128xf32> to vector<128xf32>
    %37 = vector.shape_cast %36 : vector<128xf32> to vector<1x128xf32>
    %38 = arith.addf %5, %37 : vector<1x128xf32>
    %c0_14 = arith.constant 0 : index
    %c8 = arith.constant 8 : index
    %c0_15 = arith.constant 0 : index
    %c0_16 = arith.constant 0 : index
    %39 = vector.load %arg1[%c0_14, %c8, %c0_15, %c0_16] : memref<1x18x18x4xf32, #tpu.memory_space<vmem>>, vector<1x10x18x4xf32>
    %40 = vector.shape_cast %39 : vector<1x10x18x4xf32> to vector<10x18x4xf32>
    %41 = vector.extract_strided_slice %40 {offsets = [0, 0, 0], sizes = [8, 16, 4], strides = [1, 1, 1]} : vector<10x18x4xf32> to vector<8x16x4xf32>
    %42 = vector.shape_cast %41 : vector<8x16x4xf32> to vector<128x4xf32>
    %43 = vector.extract_strided_slice %40 {offsets = [0, 1, 0], sizes = [8, 16, 4], strides = [1, 1, 1]} : vector<10x18x4xf32> to vector<8x16x4xf32>
    %44 = vector.shape_cast %43 : vector<8x16x4xf32> to vector<128x4xf32>
    %45 = vector.extract_strided_slice %40 {offsets = [0, 2, 0], sizes = [8, 16, 4], strides = [1, 1, 1]} : vector<10x18x4xf32> to vector<8x16x4xf32>
    %46 = vector.shape_cast %45 : vector<8x16x4xf32> to vector<128x4xf32>
    %47 = vector.extract_strided_slice %40 {offsets = [1, 0, 0], sizes = [8, 16, 4], strides = [1, 1, 1]} : vector<10x18x4xf32> to vector<8x16x4xf32>
    %48 = vector.shape_cast %47 : vector<8x16x4xf32> to vector<128x4xf32>
    %49 = vector.extract_strided_slice %40 {offsets = [1, 1, 0], sizes = [8, 16, 4], strides = [1, 1, 1]} : vector<10x18x4xf32> to vector<8x16x4xf32>
    %50 = vector.shape_cast %49 : vector<8x16x4xf32> to vector<128x4xf32>
    %51 = vector.extract_strided_slice %40 {offsets = [1, 2, 0], sizes = [8, 16, 4], strides = [1, 1, 1]} : vector<10x18x4xf32> to vector<8x16x4xf32>
    %52 = vector.shape_cast %51 : vector<8x16x4xf32> to vector<128x4xf32>
    %53 = vector.extract_strided_slice %40 {offsets = [2, 0, 0], sizes = [8, 16, 4], strides = [1, 1, 1]} : vector<10x18x4xf32> to vector<8x16x4xf32>
    %54 = vector.shape_cast %53 : vector<8x16x4xf32> to vector<128x4xf32>
    %55 = vector.extract_strided_slice %40 {offsets = [2, 1, 0], sizes = [8, 16, 4], strides = [1, 1, 1]} : vector<10x18x4xf32> to vector<8x16x4xf32>
    %56 = vector.shape_cast %55 : vector<8x16x4xf32> to vector<128x4xf32>
    %57 = vector.extract_strided_slice %40 {offsets = [2, 2, 0], sizes = [8, 16, 4], strides = [1, 1, 1]} : vector<10x18x4xf32> to vector<8x16x4xf32>
    %58 = vector.shape_cast %57 : vector<8x16x4xf32> to vector<128x4xf32>
    %59 = tpu.concatenate %42, %44, %46, %48, %50, %52, %54, %56, %58 in 1 : vector<128x4xf32>, vector<128x4xf32>, vector<128x4xf32>, vector<128x4xf32>, vector<128x4xf32>, vector<128x4xf32>, vector<128x4xf32>, vector<128x4xf32>, vector<128x4xf32> -> vector<128x36xf32>
    %cst_17 = arith.constant dense<0.000000e+00> : vector<128x128xf32>
    %60 = tpu.matmul %59, %3, %cst_17 {dimension_numbers = #tpu.dot_dimension_numbers<[1], [0], [0], [1], [0, 0, 1, 1], [], []>} : vector<128x36xf32>, vector<36x128xf32>, vector<128x128xf32> -> vector<128x128xf32>
    %61 = vector.shape_cast %60 : vector<128x128xf32> to vector<8x16x128xf32>
    %c0_18 = arith.constant 0 : index
    %c8_19 = arith.constant 8 : index
    %c0_20 = arith.constant 0 : index
    %c0_21 = arith.constant 0 : index
    %62 = vector.load %arg3[%c0_18, %c8_19, %c0_20, %c0_21] : memref<1x16x16x128xf32, #tpu.memory_space<vmem>>, vector<1x8x16x128xf32>
    %63 = vector.shape_cast %62 : vector<1x8x16x128xf32> to vector<8x16x128xf32>
    %64 = vector.shape_cast %61 : vector<8x16x128xf32> to vector<1x8x16x128xf32>
    tpu.vector_store %arg3[%c0_18, %c8_19, %c0_20, %c0_21], %64 {strides = array<i32>} : memref<1x16x16x128xf32, #tpu.memory_space<vmem>>, vector<1x8x16x128xf32>,
    %cst_22 = arith.constant dense<0.000000e+00> : vector<128xf32>
    %65 = vector.multi_reduction <add>, %60, %cst_22 [0] : vector<128x128xf32> to vector<128xf32>
    %66 = vector.shape_cast %65 : vector<128xf32> to vector<1x128xf32>
    %67 = arith.addf %34, %66 : vector<1x128xf32>
    %68 = arith.mulf %60, %60 : vector<128x128xf32>
    %cst_23 = arith.constant dense<0.000000e+00> : vector<128xf32>
    %69 = vector.multi_reduction <add>, %68, %cst_23 [0] : vector<128x128xf32> to vector<128xf32>
    %70 = vector.shape_cast %69 : vector<128xf32> to vector<1x128xf32>
    %71 = arith.addf %38, %70 : vector<1x128xf32>
    %c0_24 = arith.constant 0 : index
    %c0_25 = arith.constant 0 : index
    %72 = vector.load %arg4[%c0_24, %c0_25] : memref<2x128xf32, #tpu.memory_space<vmem>>, vector<2x128xf32>
    %73 = tpu.concatenate %67, %71 in 0 : vector<1x128xf32>, vector<1x128xf32> -> vector<2x128xf32>
    %74 = arith.addf %72, %73 : vector<2x128xf32>
    %c0_26 = arith.constant 0 : index
    %c0_27 = arith.constant 0 : index
    %75 = vector.load %arg4[%c0_26, %c0_27] : memref<2x128xf32, #tpu.memory_space<vmem>>, vector<2x128xf32>
    tpu.vector_store %arg4[%c0_26, %c0_27], %74 {strides = array<i32>} : memref<2x128xf32, #tpu.memory_space<vmem>>, vector<2x128xf32>,
    return
  }
  func.func @transform_0(%arg0: i32) -> (i32, i32, i32, i32) {
    %c0_i32 = arith.constant 0 : i32
    %c0_i32_0 = arith.constant 0 : i32
    %c0_i32_1 = arith.constant 0 : i32
    %c0_i32_2 = arith.constant 0 : i32
    return %arg0, %c0_i32, %c0_i32_0, %c0_i32_1 : i32, i32, i32, i32
  }
  func.func @transform_1(%arg0: i32) -> (i32, i32) {
    %c0_i32 = arith.constant 0 : i32
    %c0_i32_0 = arith.constant 0 : i32
    %c0_i32_1 = arith.constant 0 : i32
    return %c0_i32, %c0_i32_0 : i32, i32
  }
  func.func @transform_2(%arg0: i32) -> (i32, i32, i32, i32) {
    %c0_i32 = arith.constant 0 : i32
    %c0_i32_0 = arith.constant 0 : i32
    %c0_i32_1 = arith.constant 0 : i32
    %c0_i32_2 = arith.constant 0 : i32
    return %arg0, %c0_i32, %c0_i32_0, %c0_i32_1 : i32, i32, i32, i32
  }
  func.func @transform_3(%arg0: i32) -> (i32, i32) {
    %c0_i32 = arith.constant 0 : i32
    %c0_i32_0 = arith.constant 0 : i32
    %c0_i32_1 = arith.constant 0 : i32
    return %c0_i32, %c0_i32_0 : i32, i32
  }
}

</mosaic_0001>

<bundles_post_ra>
// kernel: basic_block.3
= control target key start
LH: loop header
LB: loop body
LE: loop exit
PB: predicated region body
PF: predicated region fallthrough
CT: control target
= control target key end

     0   :  { %s1468_s15 = smov 0   ;;  %s1852_s0 = inlined_call_operand.vmem [shape: f32[2,16,16,128], index: 0, kind: input, shape index: {}]   ;;  %s1853_s1 = inlined_call_operand.vmem [shape: f32[2,128], index: 1, kind: input, shape index: {}]   ;;  %s1854_s2 = inlined_call_operand.vmem [shape: f32[1,128], index: 2, kind: input, shape index: {}]   ;;  %s1855_s3 = inlined_call_operand.vmem [shape: f32[1,128], index: 3, kind: input, shape index: {}]   ;;  %s1856_s4 = inlined_call_operand.vmem [shape: f32[2,8,8,128], index: 4, kind: output, shape index: {}]  }
   0x1 LB: > { %s1408_s16 = sadd.s32 4294967295, %s1439_s15   ;;  %p1412_p0 = scmp.ge.s32.totalorder %s1439_s15, 1  ;;  %s1439_s15 = sphi %s1468_s15, %s14_s15  }
   0x2   : > { %p162_p1 = scmp.lt.s32.totalorder %s1439_s15, 3 }
   0x4   : > { %p163_p2 = pnand %p1412_p0, %p162_p1 }
   0x5   : > { %v198_v0 = vld [vmem:[%s1853_s1] sm:$0x1] (!%p163_p2)  ;;  %v200_v1 = vld [vmem:[%s1853_s1 + $0x1] sm:$0x1] (!%p163_p2)  ;;  %v1441_v2 = vmov (!%p163_p2), 0.0   ;;  %p188_p3 = scmp.lt.s32.totalorder (!%p163_p2), %s1408_s16, 1  ;;  %v299_v9 = vlaneseq (!%p163_p2) }
   0x6   : > { %166 = sbr.rel (%p163_p2) target bundleno = 155 (0x9b), region = 36  ;;  %215 = vst [vmem:[#allocation2 + $0x18] sm:$0xff] (!%p163_p2), %v1441_v2  ;;  %214 = vst [vmem:[#allocation2 + $0x10] sm:$0x3] (!%p163_p2), %v1441_v2  ;;  %v199_v3 = vmul.f32 (!%p163_p2), 0.001953125, %v198_v0  ;;  %v201_v4 = vmul.f32 (!%p163_p2), 0.001953125, %v200_v1 }
   0x7   : > { %216 = vst [vmem:[#allocation2 + $0x20] sm:$0xff] (!%p163_p2), %v1441_v2  ;;  %217 = vst [vmem:[#allocation2 + $0x28] sm:$0x3] (!%p163_p2), %v1441_v2  ;;  %v300_v10 = vshrl.u32 (!%p163_p2), %v299_v9, 7  ;;  %v1442_v11 = vmov (!%p163_p2), 1983009808  }
   0x8   : > { %218 = vst [vmem:[#allocation2 + $0x30] sm:$0xff] (!%p163_p2), %v1441_v2  ;;  %219 = vst [vmem:[#allocation2 + $0x38] sm:$0xff] (!%p163_p2), %v1441_v2  ;;  %v202_v5 = vmul.f32 (!%p163_p2), %v199_v3, %v199_v3  ;;  %v748_v12 = vunpack.c.l.s4 (!%p163_p2), %v1442_v11  ;;  %v205_v13 = vld [vmem:[%s1854_s2] sm:$0x1] (!%p163_p2)  ;;  %vm584_vm0 = vcmask (!%p163_p2), 1046528   ;;  %vm657_vm1 = vcmask (!%p163_p2), 1045504  }
   0x9   : > { %220 = vst [vmem:[#allocation2 + $0x40] sm:$0x3] (!%p163_p2), %v1441_v2  ;;  %221 = vst [vmem:[#allocation2 + $0x48] sm:$0xff] (!%p163_p2), %v1441_v2  ;;  %v1497_v14 = vsub.s32 (!%p163_p2), 0, %v300_v10  ;;  %v209_v18 = vld [vmem:[%s1855_s3] sm:$0x1] (!%p163_p2) }
   0xa   : > { %222 = vst [vmem:[#allocation2 + $0x50] sm:$0xff] (!%p163_p2), %v1441_v2  ;;  %223 = vst [vmem:[#allocation2 + $0x58] sm:$0x3] (!%p163_p2), %v1441_v2  ;;  %v203_v6 = vsub.f32 (!%p163_p2), %v201_v4, %v202_v5  ;;  %v749_v16 = vunpack.c.0.s8 (!%p163_p2), %v748_v12  ;;  %vm1274_vm2 = vcmask (!%p163_p2), 1041409   ;;  %vm1276_vm3 = vcmask (!%p163_p2), 1042434  }
   0xb   : > { %224 = vst [vmem:[#allocation2 + $0x60] sm:$0xff] (!%p163_p2), %v1441_v2  ;;  %225 = vst [vmem:[#allocation2 + $0x68] sm:$0xff] (!%p163_p2), %v1441_v2  ;;  %vm1278_vm4 = vcmask (!%p163_p2), 1043459   ;;  %vm1280_vm5 = vcmask (!%p163_p2), 1044484   ;;  %vm1282_vm6 = vcmask (!%p163_p2), 1045509   ;;  %vm1284_vm7 = vcmask (!%p163_p2), 1046534  }
   0xc   : > { %226 = vst [vmem:[#allocation2 + $0x70] sm:$0x3] (!%p163_p2), %v1441_v2  ;;  %227 = vst [vmem:[#allocation2 + $0x78] sm:$0xff] (!%p163_p2), %v1441_v2  ;;  %v204_v7 = vmax.f32 (!%p163_p2), %v203_v6, 0.0  ;;  %v1516_v32 = vsub.s32 (!%p163_p2), %v749_v16, %v300_v10  ;;  %vm1286_vm8 = vcmask (!%p163_p2), 1047559  }
   0xd   : > { %228 = vst [vmem:[#allocation2 + $0x80] sm:$0xff] %v1441_v2  ;;  %229 = vst [vmem:[#allocation2 + $0x88] sm:$0x3] %v1441_v2  ;;  %s1858_s16 = smov (!%p188_p3, %s1408_s16), 1 }
   0xe   : > { %230 = vst [vmem:[#allocation2 + $0x90] sm:$0xff] %v1441_v2  ;;  %231 = vst [vmem:[#allocation2 + $0x98] sm:$0xff] %v1441_v2  ;;  %v206_v8 = vadd.f32 1e-05, %v204_v7  ;;  %s1419_s21 = sshll.u32 %s1858_s16, 8  ;;  %s1420_s29 = sshll.u32 %s1858_s16, 6 }
   0xf   : > { %232 = vst [vmem:[#allocation2 + $0xa0] sm:$0x3] %v1441_v2  ;;  %233 = vst [vmem:[#allocation2 + $0xa8] sm:$0xff] %v1441_v2  ;;  %s1492_s24 = scalar_lea.vmem %s1852_s0, %s1419_s21  ;;  %s1666_s6 = scalar_lea.vmem %s1856_s4, %s1420_s29 }
  0x10   : > { %234 = vst [vmem:[#allocation2 + $0xb0] sm:$0xff] %v1441_v2  ;;  %235 = vst [vmem:[#allocation2 + $0xb8] sm:$0x3] %v1441_v2  ;;  %1431 = vrsqrt.f32 %v206_v8  ;;  %v266_v19 = vld [vmem:[%s1492_s24] sm:$0xff]  ;;  %v267_v20 = vld [vmem:[%s1492_s24 + $0x8] sm:$0xff] }
  0x11   : > { %236 = vst [vmem:[#allocation2 + $0xc0] sm:$0xff] %v1441_v2  ;;  %237 = vst [vmem:[#allocation2 + $0xc8] sm:$0xff] %v1441_v2  ;;  %v268_v21 = vld [vmem:[%s1492_s24 + $0x10] sm:$0xff]  ;;  %v269_v22 = vld [vmem:[%s1492_s24 + $0x18] sm:$0xff] }
  0x12   : > { %238 = vst [vmem:[#allocation2 + $0xd0] sm:$0x3] %v1441_v2  ;;  %239 = vst [vmem:[#allocation2 + $0xd8] sm:$0xff] %v1441_v2  ;;  %v270_v23 = vld [vmem:[%s1492_s24 + $0x20] sm:$0xff]  ;;  %v271_v26 = vld [vmem:[%s1492_s24 + $0x28] sm:$0xff] }
  0x13   : > { %240 = vst [vmem:[#allocation2 + $0xe0] sm:$0xff] %v1441_v2  ;;  %241 = vst [vmem:[#allocation2 + $0xe8] sm:$0x3] %v1441_v2  ;;  %v272_v27 = vld [vmem:[%s1492_s24 + $0x30] sm:$0xff]  ;;  %v273_v28 = vld [vmem:[%s1492_s24 + $0x38] sm:$0xff] }
  0x14   : > { %242 = vst [vmem:[#allocation2 + $0xf0] sm:$0xff] %v1441_v2  ;;  %243 = vst [vmem:[#allocation2 + $0xf8] sm:$0xff] %v1441_v2  ;;  %v274_v29 = vld [vmem:[%s1492_s24 + $0x40] sm:$0xff]  ;;  %v275_v30 = vld [vmem:[%s1492_s24 + $0x48] sm:$0xff] }
  0x15   : > { %244 = vst [vmem:[#allocation2 + $0x100] sm:$0x3] %v1441_v2  ;;  %245 = vst [vmem:[#allocation2 + $0x108] sm:$0xff] %v1441_v2  ;;  %v276_v31 = vld [vmem:[%s1492_s24 + $0x50] sm:$0xff]  ;;  %v277_v37 = vld [vmem:[%s1492_s24 + $0x58] sm:$0xff] }
  0x16   : > { %246 = vst [vmem:[#allocation2 + $0x110] sm:$0xff] %v1441_v2  ;;  %247 = vst [vmem:[#allocation2 + $0x118] sm:$0x3] %v1441_v2  ;;  %v278_v38 = vld [vmem:[%s1492_s24 + $0x60] sm:$0xff]  ;;  %v279_v39 = vld [vmem:[%s1492_s24 + $0x68] sm:$0xff] }
  0x17   : > { %248 = vst [vmem:[#allocation2 + $0x120] sm:$0xff] %v1441_v2  ;;  %249 = vst [vmem:[#allocation2 + $0x128] sm:$0xff] %v1441_v2  ;;  %v280_v0 = vld [vmem:[%s1492_s24 + $0x70] sm:$0xff]  ;;  %v281_v1 = vld [vmem:[%s1492_s24 + $0x78] sm:$0xff] }
  0x18   : > { %250 = vst [vmem:[#allocation2 + $0x130] sm:$0x3] %v1441_v2  ;;  %251 = vst [vmem:[#allocation2 + $0x138] sm:$0xff] %v1441_v2  ;;  %v282_v10 = vld [vmem:[%s1492_s24 + $0x80] sm:$0xff]  ;;  %v283_v16 = vld [vmem:[%s1492_s24 + $0x88] sm:$0xff] }
  0x19   : > { %252 = vst [vmem:[#allocation2 + $0x140] sm:$0xff] %v1441_v2  ;;  %253 = vst [vmem:[#allocation2 + $0x148] sm:$0x3] %v1441_v2 }
  0x1a   : > { %254 = vst [vmem:[#allocation2 + $0x150] sm:$0xff] %v1441_v2  ;;  %255 = vst [vmem:[#allocation2 + $0x158] sm:$0xff] %v1441_v2  ;;  %v1432_v15 = vpop.eup %1431 }
  0x1b   : > { %256 = vst [vmem:[#allocation2 + $0x160] sm:$0x3] %v1441_v2  ;;  %257 = vst [vmem:[#allocation2 + $0x168] sm:$0xff] %v1441_v2  ;;  %v208_v17 = vmul.f32 %v1432_v15, %v205_v13 }
  0x1c   : > { %258 = vst [vmem:[#allocation2 + $0x170] sm:$0xff] %v1441_v2  ;;  %259 = vst [vmem:[#allocation2 + $0x178] sm:$0x3] %v1441_v2 }
  0x1d   : > { %260 = vst [vmem:[#allocation2 + $0x180] sm:$0xff] %v1441_v2  ;;  %261 = vst [vmem:[#allocation2 + $0x188] sm:$0xff] %v1441_v2  ;;  %v210_v24 = vmul.f32 %v208_v17, %v199_v3  ;;  %v1508_v25 = vrot.slane %v208_v17, %v1497_v14  ;;  %v284_v17 = vld [vmem:[%s1492_s24 + $0x90] sm:$0xff] }
  0x1e   : > { %262 = vst [vmem:[#allocation2 + $0x190] sm:$0x3] %v1441_v2 }
  0x1f   : > { %v211_v33 = vsub.f32 %v209_v18, %v210_v24  ;;  %v304_v34 = vmul.f32 %v1508_v25, %v266_v19  ;;  %v305_v35 = vmul.f32 %v1508_v25, %v267_v20  ;;  %v306_v36 = vmul.f32 %v1508_v25, %v268_v21  ;;  %v285_v18 = vld [vmem:[%s1492_s24 + $0x98] sm:$0xff]  ;;  %v287_v24 = vld [vmem:[%s1492_s24 + $0xa8] sm:$0xff] }
  0x20   : > { %v307_v40 = vmul.f32 %v1508_v25, %v269_v22  ;;  %v308_v41 = vmul.f32 %v1508_v25, %v270_v23  ;;  %v309_v42 = vmul.f32 %v1508_v25, %v271_v26  ;;  %v310_v43 = vmul.f32 %v1508_v25, %v272_v27  ;;  %v286_v23 = vld [vmem:[%s1492_s24 + $0xa0] sm:$0xff] }
  0x21   : > { %v1529_v44 = vrot.slane %v211_v33, %v1497_v14  ;;  %v311_v45 = vmul.f32 %v1508_v25, %v273_v28  ;;  %v312_v46 = vmul.f32 %v1508_v25, %v274_v29  ;;  %v313_v47 = vmul.f32 %v1508_v25, %v275_v30 }
  0x22   : > { %v314_v48 = vmul.f32 %v1508_v25, %v276_v31  ;;  %v315_v49 = vmul.f32 %v1508_v25, %v277_v37  ;;  %v316_v50 = vmul.f32 %v1508_v25, %v278_v38  ;;  %v317_v51 = vmul.f32 %v1508_v25, %v279_v39 }
  0x23   : > { %v342_v52 = vadd.f32 %v1529_v44, %v304_v34  ;;  %v343_v53 = vadd.f32 %v1529_v44, %v305_v35  ;;  %v344_v54 = vadd.f32 %v1529_v44, %v306_v36  ;;  %v345_v55 = vadd.f32 %v1529_v44, %v307_v40  ;;  %v288_v35 = vld [vmem:[%s1492_s24 + $0xb0] sm:$0xff]  ;;  %v289_v36 = vld [vmem:[%s1492_s24 + $0xb8] sm:$0xff] }
  0x24   : > { %v346_v56 = vadd.f32 %v1529_v44, %v308_v41  ;;  %v347_v57 = vadd.f32 %v1529_v44, %v309_v42  ;;  %v348_v58 = vadd.f32 %v1529_v44, %v310_v43  ;;  %v349_v59 = vadd.f32 %v1529_v44, %v311_v45 }
  0x25   : > { %v374_v60 = vmax.f32 %v342_v52, 0.0  ;;  %v375_v61 = vmax.f32 %v343_v53, 0.0  ;;  %v376_v62 = vmax.f32 %v344_v54, 0.0  ;;  %v377_v63 = vmax.f32 %v345_v55, 0.0  ;;  %v292_v52 = vld [vmem:[%s1492_s24 + $0xd0] sm:$0xff]  ;;  %v293_v53 = vld [vmem:[%s1492_s24 + $0xd8] sm:$0xff] }
  0x26   : > { %v378_v2 = vmax.f32 %v346_v56, 0.0  ;;  %v379_v3 = vmax.f32 %v347_v57, 0.0  ;;  %v380_v4 = vmax.f32 %v348_v58, 0.0  ;;  %v381_v5 = vmax.f32 %v349_v59, 0.0  ;;  %v294_v58 = vld [vmem:[%s1492_s24 + $0xe0] sm:$0xff]  ;;  %v295_v59 = vld [vmem:[%s1492_s24 + $0xe8] sm:$0xff] }
  0x27   : > { %407 = vst [vmem:[#allocation2 + $0x19] sm:$0xff] %v374_v60  ;;  %408 = vst [vmem:[#allocation2 + $0x21] sm:$0xff] %v375_v61  ;;  %v350_v6 = vadd.f32 %v1529_v44, %v312_v46  ;;  %v351_v7 = vadd.f32 %v1529_v44, %v313_v47  ;;  %v352_v8 = vadd.f32 %v1529_v44, %v314_v48  ;;  %v290_v46 = vld [vmem:[%s1492_s24 + $0xc0] sm:$0xff] }
  0x28   : > { %409 = vst [vmem:[#allocation2 + $0x31] sm:$0xff] %v376_v62  ;;  %410 = vst [vmem:[#allocation2 + $0x39] sm:$0xff] %v377_v63  ;;  %v353_v9 = vadd.f32 %v1529_v44, %v315_v49  ;;  %v354_v11 = vadd.f32 %v1529_v44, %v316_v50  ;;  %v355_v12 = vadd.f32 %v1529_v44, %v317_v51  ;;  %v291_v51 = vld [vmem:[%s1492_s24 + $0xc8] sm:$0xff] }
  0x29   : > { %411 = vst [vmem:[#allocation2 + $0x49] sm:$0xff] %v378_v2  ;;  %412 = vst [vmem:[#allocation2 + $0x51] sm:$0xff] %v379_v3  ;;  %v318_v13 = vmul.f32 %v1508_v25, %v280_v0  ;;  %v319_v15 = vmul.f32 %v1508_v25, %v281_v1  ;;  %v382_v19 = vmax.f32 %v350_v6, 0.0  ;;  %v383_v20 = vmax.f32 %v351_v7, 0.0 }
  0x2a   : > { %413 = vst [vmem:[#allocation2 + $0x61] sm:$0xff] %v380_v4  ;;  %414 = vst [vmem:[#allocation2 + $0x69] sm:$0xff] %v381_v5  ;;  %v384_v21 = vmax.f32 %v352_v8, 0.0  ;;  %v385_v22 = vmax.f32 %v353_v9, 0.0  ;;  %v386_v26 = vmax.f32 %v354_v11, 0.0  ;;  %v387_v27 = vmax.f32 %v355_v12, 0.0 }
  0x2b   : > { %v356_v28 = vadd.f32 %v1529_v44, %v318_v13  ;;  %v357_v29 = vadd.f32 %v1529_v44, %v319_v15  ;;  %415 = vst [vmem:[#allocation2 + $0x79] sm:$0xff] %v382_v19  ;;  %416 = vst [vmem:[#allocation2 + $0x81] sm:$0xff] %v383_v20  ;;  %v320_v30 = vmul.f32 %v1508_v25, %v282_v10  ;;  %v296_v4 = vld [vmem:[%s1492_s24 + $0xf0] sm:$0xff]  ;;  %v297_v5 = vld [vmem:[%s1492_s24 + $0xf8] sm:$0xff] }
  0x2c   : > { %417 = vst [vmem:[#allocation2 + $0x91] sm:$0xff] %v384_v21  ;;  %418 = vst [vmem:[#allocation2 + $0x99] sm:$0xff] %v385_v22  ;;  %v321_v31 = vmul.f32 %v1508_v25, %v283_v16  ;;  %v322_v33 = vmul.f32 %v1508_v25, %v284_v17  ;;  %v323_v34 = vmul.f32 %v1508_v25, %v285_v18  ;;  %v441_v10 = vld [vmem:[#allocation2 + $0x10] sm:$0x3] }
  0x2d   : > { %419 = vst [vmem:[#allocation2 + $0xa9] sm:$0xff] %v386_v26  ;;  %420 = vst [vmem:[#allocation2 + $0xb1] sm:$0xff] %v387_v27  ;;  %v388_v37 = vmax.f32 %v356_v28, 0.0  ;;  %v389_v38 = vmax.f32 %v357_v29, 0.0  ;;  %v324_v39 = vmul.f32 %v1508_v25, %v286_v23  ;;  %v325_v40 = vmul.f32 %v1508_v25, %v287_v24 }
  0x2e   : > { %v358_v41 = vadd.f32 %v1529_v44, %v320_v30  ;;  %v359_v42 = vadd.f32 %v1529_v44, %v321_v31  ;;  %v360_v43 = vadd.f32 %v1529_v44, %v322_v33  ;;  %v361_v45 = vadd.f32 %v1529_v44, %v323_v34  ;;  %v463_v11 = vld [vmem:[#allocation2 + $0x18] sm:$0xff]  ;;  %v464_v12 = vld [vmem:[#allocation2 + $0x20] sm:$0xff]  ;;  %v465_v18 = vld [vmem:[#allocation2 + $0x28] sm:$0x3] }
  0x2f   : > { %421 = vst [vmem:[#allocation2 + $0xc1] sm:$0xff] %v388_v37  ;;  %422 = vst [vmem:[#allocation2 + $0xc9] sm:$0xff] %v389_v38  ;;  %v362_v47 = vadd.f32 %v1529_v44, %v324_v39  ;;  %v363_v48 = vadd.f32 %v1529_v44, %v325_v40  ;;  %v326_v49 = vmul.f32 %v1508_v25, %v288_v35  ;;  %v512_v19 = vld [vmem:[#allocation2 + $0x30] sm:$0xff]  ;;  %v513_v20 = vld [vmem:[#allocation2 + $0x38] sm:$0xff]  ;;  %v488_v40 = vmax.f32 %v464_v12, 0.0 }
  0x30   : > { %v327_v50 = vmul.f32 %v1508_v25, %v289_v36  ;;  %v390_v54 = vmax.f32 %v358_v41, 0.0  ;;  %v391_v55 = vmax.f32 %v359_v42, 0.0  ;;  %v392_v56 = vmax.f32 %v360_v43, 0.0  ;;  %v444_v26 = vld [vmem:[#allocation2 + $0x40] sm:$0x3]  ;;  %v466_v27 = vld [vmem:[#allocation2 + $0x48] sm:$0xff] }
  0x31   : > { %v393_v57 = vmax.f32 %v361_v45, 0.0  ;;  %v394_v60 = vmax.f32 %v362_v47, 0.0  ;;  %v395_v61 = vmax.f32 %v363_v48, 0.0  ;;  %v364_v62 = vadd.f32 %v1529_v44, %v326_v49  ;;  %v467_v28 = vld [vmem:[#allocation2 + $0x50] sm:$0xff]  ;;  %v468_v34 = vld [vmem:[#allocation2 + $0x58] sm:$0x3] }
  0x32   : > { %v365_v63 = vadd.f32 %v1529_v44, %v327_v50  ;;  %423 = vst [vmem:[#allocation2 + $0xd9] sm:$0xff] %v390_v54  ;;  %424 = vst [vmem:[#allocation2 + $0xe1] sm:$0xff] %v391_v55  ;;  %v328_v0 = vmul.f32 %v1508_v25, %v290_v46  ;;  %v329_v1 = vmul.f32 %v1508_v25, %v291_v51  ;;  %v1606_v39 = vld [vmem:[#allocation2 + $0x60] sm:$0xff]  ;;  %v1608_v43 = vld [vmem:[#allocation2 + $0x68] sm:$0xff] }
  0x33   : > { %425 = vst [vmem:[#allocation2 + $0xf1] sm:$0xff] %v392_v56  ;;  %426 = vst [vmem:[#allocation2 + $0xf9] sm:$0xff] %v393_v57  ;;  %v330_v2 = vmul.f32 %v1508_v25, %v292_v52  ;;  %v331_v3 = vmul.f32 %v1508_v25, %v293_v53  ;;  %v396_v6 = vmax.f32 %v364_v62, 0.0  ;;  %v332_v8 = vmul.f32 %v1508_v25, %v294_v58  ;;  %v469_v45 = vld [vmem:[#allocation2 + $0x78] sm:$0xff]  ;;  %v1610_v46 = vld [vmem:[#allocation2 + $0x80] sm:$0xff] }
  0x34   : > { %427 = vst [vmem:[#allocation2 + $0x109] sm:$0xff] %v394_v60  ;;  %428 = vst [vmem:[#allocation2 + $0x111] sm:$0xff] %v395_v61  ;;  %v397_v7 = vmax.f32 %v365_v63, 0.0  ;;  %v333_v9 = vmul.f32 %v1508_v25, %v295_v59  ;;  %v366_v13 = vadd.f32 %v1529_v44, %v328_v0  ;;  %v367_v15 = vadd.f32 %v1529_v44, %v329_v1  ;;  %v517_v54 = vld [vmem:[#allocation2 + $0x70] sm:$0x3] }
  0x35   : > { %v368_v16 = vadd.f32 %v1529_v44, %v330_v2  ;;  %v369_v17 = vadd.f32 %v1529_v44, %v331_v3  ;;  %429 = vst [vmem:[#allocation2 + $0x121] sm:$0xff] %v396_v6  ;;  %v370_v21 = vadd.f32 %v1529_v44, %v332_v8  ;;  %v334_v23 = vmul.f32 %v1508_v25, %v296_v4  ;;  %v447_v12 = vld [vmem:[#allocation2 + $0x70] sm:$0x3] }
  0x36   : > { %430 = vst [vmem:[#allocation2 + $0x129] sm:$0xff] %v397_v7  ;;  %v371_v22 = vadd.f32 %v1529_v44, %v333_v9  ;;  %v335_v24 = vmul.f32 %v1508_v25, %v297_v5  ;;  %v398_v29 = vmax.f32 %v366_v13, 0.0  ;;  %v399_v30 = vmax.f32 %v367_v15, 0.0  ;;  %v471_v13 = vld [vmem:[#allocation2 + $0x88] sm:$0x3] }
  0x37   : > { %v400_v31 = vmax.f32 %v368_v16, 0.0  ;;  %v401_v33 = vmax.f32 %v369_v17, 0.0  ;;  %v402_v35 = vmax.f32 %v370_v21, 0.0  ;;  %v372_v37 = vadd.f32 %v1529_v44, %v334_v23  ;;  %v1623_v23 = vld [vmem:[#allocation2 + $0x90] sm:$0xff] }
  0x38   : > { %v403_v36 = vmax.f32 %v371_v22, 0.0  ;;  %v373_v38 = vadd.f32 %v1529_v44, %v335_v24  ;;  %431 = vst [vmem:[#allocation2 + $0x139] sm:$0xff] %v398_v29  ;;  %432 = vst [vmem:[#allocation2 + $0x141] sm:$0xff] %v399_v30  ;;  %v487_v25 = vmax.f32 %v463_v11, 0.0  ;;  %v489_v41 = vmax.f32 %v441_v10, %v465_v18  ;;  %v514_v44 = vld [vmem:[#allocation2 + $0x40] sm:$0x3] }
  0x39   : > { %433 = vst [vmem:[#allocation2 + $0x151] sm:$0xff] %v400_v31  ;;  %434 = vst [vmem:[#allocation2 + $0x159] sm:$0xff] %v401_v33  ;;  %v490_v42 = vmax.f32 %v512_v19, %v466_v27  ;;  %v404_v47 = vmax.f32 %v372_v37, 0.0  ;;  %v491_v49 = vmax.f32 %v513_v20, %v467_v28  ;;  %v492_v50 = vmax.f32 %v444_v26, %v468_v34  ;;  %v1632_v34 = vld [vmem:[#allocation2 + $0x98] sm:$0xff] }
  0x3a   : > { %435 = vst [vmem:[#allocation2 + $0x169] sm:$0xff] %v402_v35  ;;  %436 = vst [vmem:[#allocation2 + $0x171] sm:$0xff] %v403_v36  ;;  %v405_v48 = vmax.f32 %v373_v38, 0.0  ;;  %v536_v51 = vmax.f32 %v487_v25, %v512_v19  ;;  %v537_v52 = vmax.f32 %v488_v40, %v513_v20  ;;  %v538_v53 = vmax.f32 %v489_v41, %v514_v44  ;;  %v520_v35 = vld [vmem:[#allocation2 + $0xa0] sm:$0x3] }
  0x3b   : > { %v539_v55 = vmax.f32 %v490_v42, %v1606_v39  ;;  %437 = vst [vmem:[#allocation2 + $0x181] sm:$0xff] %v404_v47  ;;  %v540_v56 = vmax.f32 %v491_v49, %v1608_v43  ;;  %v541_v57 = vmax.f32 %v492_v50, %v517_v54  ;;  %v493_v58 = vmax.f32 %v1606_v39, %v469_v45 }
  0x3c   : > { %438 = vst [vmem:[#allocation2 + $0x189] sm:$0xff] %v405_v48  ;;  %v494_v59 = vmax.f32 %v1608_v43, %v1610_v46  ;;  %v585_v60 = vrot.slane %v536_v51, 1  ;;  %v586_v61 = vrot.slane %v537_v52, 1  ;;  %v588_v62 = vrot.slane %v538_v53, 1 }
  0x3d   : > { %v658_v63 = vrot.slane %v536_v51, 2  ;;  %v659_v0 = vrot.slane %v537_v52, 2  ;;  %v661_v1 = vrot.slane %v538_v53, 2  ;;  %v590_v2 = vrot.slane %v539_v55, 1 }
  0x3e   : > { %v591_v3 = vrot.slane %v540_v56, 1  ;;  %v587_v4 = vsel %vm584_vm0, %v585_v60, %v586_v61  ;;  %v589_v5 = vsel %vm584_vm0, %v586_v61, %v588_v62  ;;  %v593_v6 = vrot.slane %v541_v57, 1 }
  0x3f   : > { %v663_v7 = vrot.slane %v539_v55, 2  ;;  %v641_v8 = vmax.f32 %v536_v51, %v587_v4  ;;  %v642_v9 = vmax.f32 %v537_v52, %v589_v5  ;;  %v660_v10 = vsel %vm657_vm1, %v658_v63, %v659_v0 }
  0x40   : > { %v662_v11 = vsel %vm657_vm1, %v659_v0, %v661_v1  ;;  %v592_v15 = vsel %vm584_vm0, %v590_v2, %v591_v3  ;;  %v594_v16 = vsel %vm584_vm0, %v591_v3, %v593_v6  ;;  %v664_v17 = vrot.slane %v540_v56, 2 }
  0x41   : > { %v666_v18 = vrot.slane %v541_v57, 2  ;;  %v714_v19 = vmax.f32 %v641_v8, %v660_v10  ;;  %v715_v20 = vmax.f32 %v642_v9, %v662_v11  ;;  %v643_v21 = vmax.f32 %v539_v55, %v592_v15 }
  0x42   : > { %v644_v22 = vmax.f32 %v540_v56, %v594_v16  ;;  %v665_v24 = vsel %vm657_vm1, %v663_v7, %v664_v17  ;;  %v495_v27 = vmax.f32 %v447_v12, %v471_v13  ;;  %v1628_v28 = vmax.f32 %v493_v58, %v1623_v23  ;;  %v472_v16 = vld [vmem:[#allocation2 + $0xa8] sm:$0xff] }
  0x43   : > { %v667_v26 = vsel %vm657_vm1, %v664_v17, %v666_v18  ;;  %v746_v29 = vcombine.high %v714_v19, %v714_v19  ;;  %v753_v30 = vrot.slane %v714_v19, %v1516_v32  ;;  %v763_v31 = vcombine.high %v715_v20, %v715_v20 }
  0x44   : > { %v770_v33 = vrot.slane %v715_v20, %v1516_v32  ;;  %v716_v36 = vmax.f32 %v643_v21, %v665_v24  ;;  %v717_v37 = vmax.f32 %v644_v22, %v667_v26  ;;  %v1635_v38 = vmax.f32 %v494_v59, %v1632_v34  ;;  %v450_v21 = vld [vmem:[#allocation2 + $0xa0] sm:$0x3] }
  0x45   : > { %v1637_v39 = vmax.f32 %v495_v27, %v520_v35  ;;  %v760_v25 = vrot.slane %v746_v29, %v1516_v32  ;;  %v761_v40 = vcombine.high %v753_v30, %v753_v30  ;;  %v777_v41 = vrot.slane %v763_v31, %v1516_v32  ;;  %v473_v29 = vld [vmem:[#allocation2 + $0xb0] sm:$0xff] }
  0x46   : > { %v778_v42 = vcombine.high %v770_v33, %v770_v33  ;;  %v1021_v43 = vrot.slane %v753_v30, %v1497_v14  ;;  %v1037_v45 = vrot.slane %v770_v33, %v1497_v14  ;;  %v780_v46 = vcombine.high %v716_v36, %v716_v36  ;;  %v474_v30 = vld [vmem:[#allocation2 + $0xb8] sm:$0x3] }
  0x47   : > { %v787_v47 = vrot.slane %v716_v36, %v1516_v32  ;;  %v762_v48 = vcombine.high %v760_v25, %v760_v25  ;;  %v779_v44 = vcombine.high %v777_v41, %v777_v41  ;;  %v1025_v49 = vrot.slane %v761_v40, %v1497_v14  ;;  %v475_v40 = vld [vmem:[#allocation2 + $0xd8] sm:$0xff] }
  0x48   : > { %v1029_v50 = vrot.slane %v760_v25, %v1497_v14  ;;  %v1041_v51 = vrot.slane %v778_v42, %v1497_v14  ;;  %v1045_v52 = vrot.slane %v777_v41, %v1497_v14  ;;  %v794_v53 = vrot.slane %v780_v46, %v1516_v32  ;;  %v522_v25 = vld [vmem:[#allocation2 + $0xc8] sm:$0xff]  ;;  %v453_v46 = vld [vmem:[#allocation2 + $0xd0] sm:$0x3] }
  0x49   : > { %v795_v54 = vcombine.high %v787_v47, %v787_v47  ;;  %v1033_v55 = vrot.slane %v762_v48, %v1497_v14  ;;  %v1049_v56 = vrot.slane %v779_v44, %v1497_v14  ;;  %v1275_v57 = vsel %vm1274_vm2, %v1025_v49, %v1021_v43  ;;  %v477_v48 = vld [vmem:[#allocation2 + $0xe8] sm:$0x3] }
  0x4a   : > { %v797_v58 = vcombine.high %v717_v37, %v717_v37  ;;  %v1277_v59 = vsel %vm1276_vm3, %v1029_v50, %v1275_v57  ;;  %v796_v60 = vcombine.high %v794_v53, %v794_v53  ;;  %v804_v61 = vrot.slane %v717_v37, %v1516_v32  ;;  %v521_v37 = vld [vmem:[#allocation2 + $0xc0] sm:$0xff] }
  0x4b   : > { %v1053_v62 = vrot.slane %v787_v47, %v1497_v14  ;;  %v1279_v63 = vsel %vm1278_vm4, %v1033_v55, %v1277_v59  ;;  %v1057_v1 = vrot.slane %v795_v54, %v1497_v14  ;;  %v1061_v2 = vrot.slane %v794_v53, %v1497_v14  ;;  %v476_v47 = vld [vmem:[#allocation2 + $0xe0] sm:$0xff] }
  0x4c   : > { %v811_v0 = vrot.slane %v797_v58, %v1516_v32  ;;  %v1281_v3 = vsel %vm1280_vm5, %v1037_v45, %v1279_v63  ;;  %v812_v4 = vcombine.high %v804_v61, %v804_v61  ;;  %v1065_v5 = vrot.slane %v796_v60, %v1497_v14 }
  0x4d   : > { %v1069_v6 = vrot.slane %v804_v61, %v1497_v14  ;;  %v1283_v7 = vsel %vm1282_vm6, %v1041_v51, %v1281_v3  ;;  %v1288_v10 = vsel %vm1274_vm2, %v1057_v1, %v1053_v62  ;;  %v595_v15 = vrot.slane %v1628_v28, 1 }
  0x4e   : > { %v813_v8 = vcombine.high %v811_v0, %v811_v0  ;;  %v1077_v9 = vrot.slane %v811_v0, %v1497_v14  ;;  %v1285_v11 = vsel %vm1284_vm7, %v1045_v52, %v1283_v7  ;;  %v1073_v12 = vrot.slane %v812_v4, %v1497_v14 }
  0x4f   : > { %v1289_v13 = vsel %vm1276_vm3, %v1061_v2, %v1288_v10  ;;  %v1287_v17 = vsel %vm1286_vm8, %v1049_v56, %v1285_v11  ;;  %v596_v20 = vrot.slane %v1635_v38, 1  ;;  %v598_v24 = vrot.slane %v1637_v39, 1 }
  0x50   : > { %v1081_v18 = vrot.slane %v813_v8, %v1497_v14  ;;  %v1290_v19 = vsel %vm1278_vm4, %v1065_v5, %v1289_v13  ;;  %1345 = vst [vmem:[%s1666_s6] sm:$0xff] %v1287_v17  ;;  %v668_v26 = vrot.slane %v1628_v28, 2  ;;  %v669_v27 = vrot.slane %v1635_v38, 2 }
  0x51   : > { %v1291_v22 = vsel %vm1280_vm5, %v1069_v6, %v1290_v19  ;;  %v597_v33 = vsel %vm584_vm0, %v595_v15, %v596_v20  ;;  %v671_v35 = vrot.slane %v1637_v39, 2  ;;  %v496_v36 = vmax.f32 %v1623_v23, %v472_v16 }
  0x52   : > { %v1292_v31 = vsel %vm1282_vm6, %v1073_v12, %v1291_v22  ;;  %v599_v42 = vsel %vm584_vm0, %v596_v20, %v598_v24  ;;  %v645_v43 = vmax.f32 %v1628_v28, %v597_v33  ;;  %v670_v45 = vsel %vm657_vm1, %v668_v26, %v669_v27  ;;  %v523_v28 = vld [vmem:[#allocation2 + $0xd0] sm:$0x3] }
  0x53   : > { %v1293_v41 = vsel %vm1284_vm7, %v1077_v9, %v1292_v31  ;;  %v646_v39 = vmax.f32 %v1635_v38, %v599_v42  ;;  %v672_v23 = vsel %vm657_vm1, %v669_v27, %v671_v35  ;;  %v497_v49 = vmax.f32 %v1632_v34, %v473_v29  ;;  %v1715_v27 = vld [vmem:[#allocation2 + $0xf8] sm:$0xff]  ;;  %v526_v29 = vld [vmem:[#allocation2 + $0x100] sm:$0x3] }
  0x54   : > { %v1294_v44 = vsel %vm1286_vm8, %v1081_v18, %v1293_v41  ;;  %v718_v50 = vmax.f32 %v645_v43, %v670_v45  ;;  %v498_v51 = vmax.f32 %v450_v21, %v474_v30  ;;  %v545_v52 = vmax.f32 %v496_v36, %v521_v37  ;;  %v1711_v21 = vld [vmem:[#allocation2 + $0xf0] sm:$0xff] }
  0x55   : > { %1346 = vst [vmem:[%s1666_s6 + $0x8] sm:$0xff] %v1294_v44  ;;  %v499_v53 = vmax.f32 %v521_v37, %v475_v40  ;;  %v719_v54 = vmax.f32 %v646_v39, %v672_v23  ;;  %v546_v55 = vmax.f32 %v497_v49, %v522_v25  ;;  %v500_v56 = vmax.f32 %v522_v25, %v476_v47 }
  0x56   : > { %v501_v57 = vmax.f32 %v453_v46, %v477_v48  ;;  %v814_v58 = vcombine.high %v718_v50, %v718_v50  ;;  %v821_v59 = vrot.slane %v718_v50, %v1516_v32  ;;  %v547_v60 = vmax.f32 %v498_v51, %v523_v28 }
  0x57   : > { %v600_v61 = vrot.slane %v545_v52, 1  ;;  %v831_v38 = vcombine.high %v719_v54, %v719_v54  ;;  %v838_v62 = vrot.slane %v719_v54, %v1516_v32  ;;  %v601_v63 = vrot.slane %v546_v55, 1 }
  0x58   : > { %v673_v34 = vrot.slane %v545_v52, 2  ;;  %v828_v0 = vrot.slane %v814_v58, %v1516_v32  ;;  %v829_v1 = vcombine.high %v821_v59, %v821_v59  ;;  %v1085_v2 = vrot.slane %v821_v59, %v1497_v14  ;;  %v478_v59 = vld [vmem:[#allocation2 + $0x108] sm:$0xff] }
  0x59   : > { %v603_v3 = vrot.slane %v547_v60, 1  ;;  %v845_v4 = vrot.slane %v831_v38, %v1516_v32  ;;  %v846_v5 = vcombine.high %v838_v62, %v838_v62  ;;  %v1101_v6 = vrot.slane %v838_v62, %v1497_v14 }
  0x5a   : > { %v602_v7 = vsel %vm584_vm0, %v600_v61, %v601_v63  ;;  %v830_v8 = vcombine.high %v828_v0, %v828_v0  ;;  %v1089_v9 = vrot.slane %v829_v1, %v1497_v14  ;;  %v1093_v10 = vrot.slane %v828_v0, %v1497_v14 }
  0x5b   : > { %v604_v11 = vsel %vm584_vm0, %v601_v63, %v603_v3  ;;  %v847_v12 = vcombine.high %v845_v4, %v845_v4  ;;  %v1105_v13 = vrot.slane %v846_v5, %v1497_v14  ;;  %v1109_v15 = vrot.slane %v845_v4, %v1497_v14  ;;  %v479_v63 = vld [vmem:[#allocation2 + $0x110] sm:$0xff]  ;;  %v456_v3 = vld [vmem:[#allocation2 + $0x100] sm:$0x3]  ;;  %v480_v4 = vld [vmem:[#allocation2 + $0x118] sm:$0x3] }
  0x5c   : > { %v647_v16 = vmax.f32 %v545_v52, %v602_v7  ;;  %v1097_v17 = vrot.slane %v830_v8, %v1497_v14  ;;  %v1295_v18 = vsel %vm1274_vm2, %v1089_v9, %v1085_v2  ;;  %v648_v19 = vmax.f32 %v546_v55, %v604_v11 }
  0x5d   : > { %v674_v20 = vrot.slane %v546_v55, 2  ;;  %v1113_v22 = vrot.slane %v847_v12, %v1497_v14  ;;  %v1296_v24 = vsel %vm1276_vm3, %v1093_v10, %v1295_v18  ;;  %v676_v26 = vrot.slane %v547_v60, 2  ;;  %v527_v18 = vld [vmem:[#allocation2 + $0x120] sm:$0xff] }
  0x5e   : > { %v548_v30 = vmax.f32 %v499_v53, %v1711_v21  ;;  %v1297_v31 = vsel %vm1278_vm4, %v1097_v17, %v1296_v24  ;;  %v549_v35 = vmax.f32 %v500_v56, %v1715_v27  ;;  %v550_v36 = vmax.f32 %v501_v57, %v526_v29 }
  0x5f   : > { %v675_v33 = vsel %vm657_vm1, %v673_v34, %v674_v20  ;;  %v1298_v37 = vsel %vm1280_vm5, %v1101_v6, %v1297_v31  ;;  %v677_v25 = vsel %vm657_vm1, %v674_v20, %v676_v26  ;;  %v502_v8 = vmax.f32 %v1711_v21, %v478_v59 }
  0x60   : > { %v720_v40 = vmax.f32 %v647_v16, %v675_v33  ;;  %v605_v41 = vrot.slane %v548_v30, 1  ;;  %v1299_v42 = vsel %vm1282_vm6, %v1105_v13, %v1298_v37  ;;  %v721_v43 = vmax.f32 %v648_v19, %v677_v25  ;;  %v528_v19 = vld [vmem:[#allocation2 + $0x128] sm:$0xff] }
  0x61   : > { %v606_v45 = vrot.slane %v549_v35, 1  ;;  %v608_v46 = vrot.slane %v550_v36, 1  ;;  %v1300_v47 = vsel %vm1284_vm7, %v1109_v15, %v1299_v42  ;;  %v678_v39 = vrot.slane %v548_v30, 2 }
  0x62   : > { %v848_v48 = vcombine.high %v720_v40, %v720_v40  ;;  %v855_v44 = vrot.slane %v720_v40, %v1516_v32  ;;  %v1301_v23 = vsel %vm1286_vm8, %v1113_v22, %v1300_v47  ;;  %v865_v49 = vcombine.high %v721_v43, %v721_v43  ;;  %v529_v22 = vld [vmem:[#allocation2 + $0x130] sm:$0x3] }
  0x63   : > { %v872_v50 = vrot.slane %v721_v43, %v1516_v32  ;;  %v607_v51 = vsel %vm584_vm0, %v605_v41, %v606_v45  ;;  %1347 = vst [vmem:[%s1666_s6 + $0x10] sm:$0xff] %v1301_v23  ;;  %v609_v28 = vsel %vm584_vm0, %v606_v45, %v608_v46  ;;  %v679_v2 = vrot.slane %v549_v35, 2 }
  0x64   : > { %v862_v52 = vrot.slane %v848_v48, %v1516_v32  ;;  %v863_v53 = vcombine.high %v855_v44, %v855_v44  ;;  %v1117_v54 = vrot.slane %v855_v44, %v1497_v14  ;;  %v879_v55 = vrot.slane %v865_v49, %v1516_v32 }
  0x65   : > { %v880_v56 = vcombine.high %v872_v50, %v872_v50  ;;  %v1133_v57 = vrot.slane %v872_v50, %v1497_v14  ;;  %v649_v58 = vmax.f32 %v548_v30, %v607_v51  ;;  %v650_v62 = vmax.f32 %v549_v35, %v609_v28 }
  0x66   : > { %v864_v60 = vcombine.high %v862_v52, %v862_v52  ;;  %v1121_v61 = vrot.slane %v863_v53, %v1497_v14  ;;  %v1125_v38 = vrot.slane %v862_v52, %v1497_v14  ;;  %v881_v34 = vcombine.high %v879_v55, %v879_v55  ;;  %v481_v52 = vld [vmem:[#allocation2 + $0x138] sm:$0xff] }
  0x67   : > { %v1137_v0 = vrot.slane %v880_v56, %v1497_v14  ;;  %v1141_v1 = vrot.slane %v879_v55, %v1497_v14  ;;  %v681_v7 = vrot.slane %v550_v36, 2  ;;  %v680_v11 = vsel %vm657_vm1, %v678_v39, %v679_v2  ;;  %v459_v56 = vld [vmem:[#allocation2 + $0x130] sm:$0x3] }
  0x68   : > { %v1129_v5 = vrot.slane %v864_v60, %v1497_v14  ;;  %v1302_v6 = vsel %vm1274_vm2, %v1121_v61, %v1117_v54  ;;  %v1145_v9 = vrot.slane %v881_v34, %v1497_v14  ;;  %v503_v12 = vmax.f32 %v1715_v27, %v479_v63 }
  0x69   : > { %v1303_v10 = vsel %vm1276_vm3, %v1125_v38, %v1302_v6  ;;  %v682_v15 = vsel %vm657_vm1, %v679_v2, %v681_v7  ;;  %v722_v16 = vmax.f32 %v649_v58, %v680_v11  ;;  %v504_v17 = vmax.f32 %v456_v3, %v480_v4  ;;  %v483_v58 = vld [vmem:[#allocation2 + $0x148] sm:$0x3] }
  0x6a   : > { %v1304_v13 = vsel %vm1278_vm4, %v1129_v5, %v1303_v10  ;;  %v723_v21 = vmax.f32 %v650_v62, %v682_v15  ;;  %v551_v24 = vmax.f32 %v502_v8, %v527_v18  ;;  %v552_v26 = vmax.f32 %v503_v12, %v528_v19  ;;  %v1771_v5 = vld [vmem:[#allocation2 + $0x150] sm:$0xff]  ;;  %v484_v6 = vld [vmem:[#allocation2 + $0x168] sm:$0xff]  ;;  %v531_v10 = vld [vmem:[#allocation2 + $0x158] sm:$0xff] }
  0x6b   : > { %v1305_v20 = vsel %vm1280_vm5, %v1133_v57, %v1304_v13  ;;  %v882_v30 = vcombine.high %v722_v16, %v722_v16  ;;  %v889_v27 = vrot.slane %v722_v16, %v1516_v32  ;;  %v553_v31 = vmax.f32 %v504_v17, %v529_v22  ;;  %v482_v57 = vld [vmem:[#allocation2 + $0x140] sm:$0xff] }
  0x6c   : > { %v1306_v29 = vsel %vm1282_vm6, %v1137_v0, %v1305_v20  ;;  %v899_v35 = vcombine.high %v723_v21, %v723_v21  ;;  %v906_v36 = vrot.slane %v723_v21, %v1516_v32  ;;  %v610_v37 = vrot.slane %v551_v24, 1  ;;  %v532_v16 = vld [vmem:[#allocation2 + $0x160] sm:$0x3] }
  0x6d   : > { %v1307_v33 = vsel %vm1284_vm7, %v1141_v1, %v1306_v29  ;;  %v896_v40 = vrot.slane %v882_v30, %v1516_v32  ;;  %v897_v41 = vcombine.high %v889_v27, %v889_v27  ;;  %v1149_v45 = vrot.slane %v889_v27, %v1497_v14 }
  0x6e   : > { %v1308_v25 = vsel %vm1286_vm8, %v1145_v9, %v1307_v33  ;;  %v913_v42 = vrot.slane %v899_v35, %v1516_v32  ;;  %v914_v43 = vcombine.high %v906_v36, %v906_v36  ;;  %v611_v46 = vrot.slane %v552_v26, 1 }
  0x6f   : > { %1348 = vst [vmem:[%s1666_s6 + $0x18] sm:$0xff] %v1308_v25  ;;  %v898_v47 = vcombine.high %v896_v40, %v896_v40  ;;  %v1153_v48 = vrot.slane %v897_v41, %v1497_v14  ;;  %v1157_v44 = vrot.slane %v896_v40, %v1497_v14  ;;  %v613_v39 = vrot.slane %v553_v31, 1 }
  0x70   : > { %v915_v23 = vcombine.high %v913_v42, %v913_v42  ;;  %v1165_v49 = vrot.slane %v906_v36, %v1497_v14  ;;  %v1169_v50 = vrot.slane %v914_v43, %v1497_v14  ;;  %v612_v51 = vsel %vm584_vm0, %v610_v37, %v611_v46 }
  0x71   : > { %v1161_v53 = vrot.slane %v898_v47, %v1497_v14  ;;  %v1173_v54 = vrot.slane %v913_v42, %v1497_v14  ;;  %v1309_v28 = vsel %vm1274_vm2, %v1153_v48, %v1149_v45  ;;  %v614_v55 = vsel %vm584_vm0, %v611_v46, %v613_v39 }
  0x72   : > { %v1310_v59 = vsel %vm1276_vm3, %v1157_v44, %v1309_v28  ;;  %v651_v60 = vmax.f32 %v551_v24, %v612_v51  ;;  %v652_v61 = vmax.f32 %v552_v26, %v614_v55  ;;  %v683_v38 = vrot.slane %v551_v24, 2  ;;  %v485_v44 = vld [vmem:[#allocation2 + $0x170] sm:$0xff]  ;;  %v462_v51 = vld [vmem:[#allocation2 + $0x160] sm:$0x3] }
  0x73   : > { %v1311_v62 = vsel %vm1278_vm4, %v1161_v53, %v1310_v59  ;;  %v684_v63 = vrot.slane %v552_v26, 2  ;;  %v686_v34 = vrot.slane %v553_v31, 2  ;;  %v505_v0 = vmax.f32 %v527_v18, %v481_v52  ;;  %v486_v52 = vld [vmem:[#allocation2 + $0x178] sm:$0x3] }
  0x74   : > { %v1177_v1 = vrot.slane %v915_v23, %v1497_v14  ;;  %v1312_v2 = vsel %vm1280_vm5, %v1165_v49, %v1311_v62  ;;  %v506_v3 = vmax.f32 %v528_v19, %v482_v57  ;;  %v507_v4 = vmax.f32 %v459_v56, %v483_v58  ;;  %v533_v56 = vld [vmem:[#allocation2 + $0x180] sm:$0xff] }
  0x75   : > { %v1313_v7 = vsel %vm1282_vm6, %v1169_v50, %v1312_v2  ;;  %v685_v8 = vsel %vm657_vm1, %v683_v38, %v684_v63  ;;  %v687_v9 = vsel %vm657_vm1, %v684_v63, %v686_v34  ;;  %v554_v11 = vmax.f32 %v505_v0, %v1771_v5  ;;  %v535_v0 = vld [vmem:[#allocation2 + $0x190] sm:$0x3] }
  0x76   : > { %v1314_v12 = vsel %vm1284_vm7, %v1173_v54, %v1313_v7  ;;  %v724_v13 = vmax.f32 %v651_v60, %v685_v8  ;;  %v725_v15 = vmax.f32 %v652_v61, %v687_v9  ;;  %v555_v17 = vmax.f32 %v506_v3, %v531_v10  ;;  %v534_v61 = vld [vmem:[#allocation2 + $0x188] sm:$0xff] }
  0x77   : > { %v1315_v18 = vsel %vm1286_vm8, %v1177_v1, %v1314_v12  ;;  %v556_v19 = vmax.f32 %v507_v4, %v532_v16  ;;  %v615_v20 = vrot.slane %v554_v11, 1  ;;  %v508_v21 = vmax.f32 %v1771_v5, %v484_v6 }
  0x78   : > { %1349 = vst [vmem:[%s1666_s6 + $0x20] sm:$0xff] %v1315_v18  ;;  %v916_v22 = vcombine.high %v724_v13, %v724_v13  ;;  %v923_v24 = vrot.slane %v724_v13, %v1516_v32  ;;  %v933_v26 = vcombine.high %v725_v15, %v725_v15  ;;  %v940_v29 = vrot.slane %v725_v15, %v1516_v32 }
  0x79   : > { %v616_v30 = vrot.slane %v555_v17, 1  ;;  %v618_v27 = vrot.slane %v556_v19, 1  ;;  %v688_v31 = vrot.slane %v554_v11, 2  ;;  %v689_v33 = vrot.slane %v555_v17, 2 }
  0x7a   : > { %v930_v35 = vrot.slane %v916_v22, %v1516_v32  ;;  %v931_v36 = vcombine.high %v923_v24, %v923_v24  ;;  %v947_v37 = vrot.slane %v933_v26, %v1516_v32  ;;  %v948_v25 = vcombine.high %v940_v29, %v940_v29 }
  0x7b   : > { %v1181_v40 = vrot.slane %v923_v24, %v1497_v14  ;;  %v617_v41 = vsel %vm584_vm0, %v615_v20, %v616_v30  ;;  %v619_v42 = vsel %vm584_vm0, %v616_v30, %v618_v27  ;;  %v691_v43 = vrot.slane %v556_v19, 2 }
  0x7c   : > { %v932_v45 = vcombine.high %v930_v35, %v930_v35  ;;  %v949_v46 = vcombine.high %v947_v37, %v947_v37  ;;  %v1185_v47 = vrot.slane %v931_v36, %v1497_v14  ;;  %v1189_v48 = vrot.slane %v930_v35, %v1497_v14 }
  0x7d   : > { %v1197_v39 = vrot.slane %v940_v29, %v1497_v14  ;;  %v1201_v23 = vrot.slane %v948_v25, %v1497_v14  ;;  %v653_v49 = vmax.f32 %v554_v11, %v617_v41  ;;  %v654_v50 = vmax.f32 %v555_v17, %v619_v42 }
  0x7e   : > { %v1193_v53 = vrot.slane %v932_v45, %v1497_v14  ;;  %v1205_v54 = vrot.slane %v947_v37, %v1497_v14  ;;  %v1316_v28 = vsel %vm1274_vm2, %v1185_v47, %v1181_v40  ;;  %v690_v55 = vsel %vm657_vm1, %v688_v31, %v689_v33 }
  0x7f   : > { %v1317_v57 = vsel %vm1276_vm3, %v1189_v48, %v1316_v28  ;;  %v692_v58 = vsel %vm657_vm1, %v689_v33, %v691_v43  ;;  %v726_v59 = vmax.f32 %v653_v49, %v690_v55  ;;  %v509_v60 = vmax.f32 %v531_v10, %v485_v44 }
  0x80   : > { %v1209_v38 = vrot.slane %v949_v46, %v1497_v14  ;;  %v1318_v62 = vsel %vm1278_vm4, %v1193_v53, %v1317_v57  ;;  %v727_v63 = vmax.f32 %v654_v50, %v692_v58  ;;  %v510_v34 = vmax.f32 %v462_v51, %v486_v52 }
  0x81   : > { %v1319_v1 = vsel %vm1280_vm5, %v1197_v39, %v1318_v62  ;;  %v950_v2 = vcombine.high %v726_v59, %v726_v59  ;;  %v957_v3 = vrot.slane %v726_v59, %v1516_v32  ;;  %v557_v4 = vmax.f32 %v508_v21, %v533_v56 }
  0x82   : > { %v1320_v5 = vsel %vm1282_vm6, %v1201_v23, %v1319_v1  ;;  %v967_v6 = vcombine.high %v727_v63, %v727_v63  ;;  %v974_v7 = vrot.slane %v727_v63, %v1516_v32  ;;  %v558_v8 = vmax.f32 %v509_v60, %v534_v61 }
  0x83   : > { %v1321_v9 = vsel %vm1284_vm7, %v1205_v54, %v1320_v5  ;;  %v964_v10 = vrot.slane %v950_v2, %v1516_v32  ;;  %v965_v11 = vcombine.high %v957_v3, %v957_v3  ;;  %v559_v12 = vmax.f32 %v510_v34, %v535_v0 }
  0x84   : > { %v1322_v13 = vsel %vm1286_vm8, %v1209_v38, %v1321_v9  ;;  %v981_v15 = vrot.slane %v967_v6, %v1516_v32  ;;  %v982_v16 = vcombine.high %v974_v7, %v974_v7  ;;  %v1213_v17 = vrot.slane %v957_v3, %v1497_v14 }
  0x85   : > { %1350 = vst [vmem:[%s1666_s6 + $0x28] sm:$0xff] %v1322_v13  ;;  %v966_v18 = vcombine.high %v964_v10, %v964_v10  ;;  %v1217_v19 = vrot.slane %v965_v11, %v1497_v14  ;;  %v1221_v20 = vrot.slane %v964_v10, %v1497_v14  ;;  %v620_v21 = vrot.slane %v557_v4, 1 }
  0x86   : > { %v983_v22 = vcombine.high %v981_v15, %v981_v15  ;;  %v1229_v24 = vrot.slane %v974_v7, %v1497_v14  ;;  %v621_v26 = vrot.slane %v558_v8, 1  ;;  %v623_v27 = vrot.slane %v559_v12, 1 }
  0x87   : > { %v1225_v29 = vrot.slane %v966_v18, %v1497_v14  ;;  %v1323_v30 = vsel %vm1274_vm2, %v1217_v19, %v1213_v17  ;;  %v693_v31 = vrot.slane %v557_v4, 2  ;;  %v1233_v33 = vrot.slane %v982_v16, %v1497_v14 }
  0x88   : > { %v1324_v35 = vsel %vm1276_vm3, %v1221_v20, %v1323_v30  ;;  %v622_v36 = vsel %vm584_vm0, %v620_v21, %v621_v26  ;;  %v694_v37 = vrot.slane %v558_v8, 2  ;;  %v624_v40 = vsel %vm584_vm0, %v621_v26, %v623_v27 }
  0x89   : > { %v1325_v25 = vsel %vm1278_vm4, %v1225_v29, %v1324_v35  ;;  %v655_v41 = vmax.f32 %v557_v4, %v622_v36  ;;  %v696_v42 = vrot.slane %v559_v12, 2  ;;  %v1237_v43 = vrot.slane %v981_v15, %v1497_v14 }
  0x8a   : > { %v1326_v45 = vsel %vm1280_vm5, %v1229_v24, %v1325_v25  ;;  %v656_v46 = vmax.f32 %v558_v8, %v624_v40  ;;  %v695_v47 = vsel %vm657_vm1, %v693_v31, %v694_v37  ;;  %v1241_v48 = vrot.slane %v983_v22, %v1497_v14 }
  0x8b   : > { %v1327_v44 = vsel %vm1282_vm6, %v1233_v33, %v1326_v45  ;;  %v697_v39 = vsel %vm657_vm1, %v694_v37, %v696_v42  ;;  %v728_v23 = vmax.f32 %v655_v41, %v695_v47 }
  0x8c   : > { %v1328_v49 = vsel %vm1284_vm7, %v1237_v43, %v1327_v44  ;;  %v729_v50 = vmax.f32 %v656_v46, %v697_v39 }
  0x8d   : > { %v1329_v51 = vsel %vm1286_vm8, %v1241_v48, %v1328_v49  ;;  %v984_v52 = vcombine.high %v728_v23, %v728_v23  ;;  %v991_v53 = vrot.slane %v728_v23, %v1516_v32 }
  0x8e   : > { %1351 = vst [vmem:[%s1666_s6 + $0x30] sm:$0xff] %v1329_v51  ;;  %v1001_v54 = vcombine.high %v729_v50, %v729_v50  ;;  %v1008_v28 = vrot.slane %v729_v50, %v1516_v32 }
  0x8f   : > { %v998_v55 = vrot.slane %v984_v52, %v1516_v32  ;;  %v999_v56 = vcombine.high %v991_v53, %v991_v53  ;;  %v1245_v58 = vrot.slane %v991_v53, %v1497_v14 }
  0x90   : > { %v1015_v57 = vrot.slane %v1001_v54, %v1516_v32  ;;  %v1016_v60 = vcombine.high %v1008_v28, %v1008_v28  ;;  %v1261_v0 = vrot.slane %v1008_v28, %v1497_v14 }
  0x91   : > { %v1000_v59 = vcombine.high %v998_v55, %v998_v55  ;;  %v1249_v61 = vrot.slane %v999_v56, %v1497_v14  ;;  %v1253_v38 = vrot.slane %v998_v55, %v1497_v14 }
  0x92   : > { %v1017_v62 = vcombine.high %v1015_v57, %v1015_v57  ;;  %v1265_v32 = vrot.slane %v1016_v60, %v1497_v14  ;;  %v1269_v3 = vrot.slane %v1015_v57, %v1497_v14 }
  0x93   : > { %v1257_v63 = vrot.slane %v1000_v59, %v1497_v14  ;;  %v1330_v34 = vsel %vm1274_vm2, %v1249_v61, %v1245_v58 }
  0x94   : > { %v1331_v1 = vsel %vm1276_vm3, %v1253_v38, %v1330_v34  ;;  %v1273_v5 = vrot.slane %v1017_v62, %v1497_v14 }
  0x95   : > { %v1332_v2 = vsel %vm1278_vm4, %v1257_v63, %v1331_v1 }
  0x96   : > { %v1333_v4 = vsel %vm1280_vm5, %v1261_v0, %v1332_v2 }
  0x97   : > { %v1334_v6 = vsel %vm1282_vm6, %v1265_v32, %v1333_v4 }
  0x98   : > { %v1335_v7 = vsel %vm1284_vm7, %v1269_v3, %v1334_v6 }
  0x99   : > { %v1336_v8 = vsel %vm1286_vm8, %v1273_v5, %v1335_v7 }
  0x9a   : > { %1352 = vst [vmem:[%s1666_s6 + $0x38] sm:$0xff] %v1336_v8 }
  0x9b PF: > { %s14_s15 = sadd.s32 1, %s1439_s15  }
  0x9c   : > { %p11_p4 = scmp.ge.s32.totalorder %s14_s15, 4  }
  0x9e   :  { %13 = sbr.rel (!%p11_p4) target bundleno = 1 (0x1), region = 68 }

// kernel: basic_block.2
= control target key start
LH: loop header
LB: loop body
LE: loop exit
PB: predicated region body
PF: predicated region fallthrough
CT: control target
= control target key end

     0   :  { %s2433_s12 = smov 0   ;;  %s4123_s0 = inlined_call_operand.vmem [shape: f32[2,18,18,4], index: 0, kind: input, shape index: {}]   ;;  %s4124_s1 = inlined_call_operand.vmem [shape: f32[36,128], index: 1, kind: input, shape index: {}]   ;;  %s4125_s2 = inlined_call_operand.vmem [shape: f32[2,16,16,128], index: 2, kind: output, shape index: {0}]   ;;  %s4126_s3 = inlined_call_operand.vmem [shape: f32[2,128], index: 3, kind: output, shape index: {1}]  }
   0x1 LB: > { %s2144_s13 = sadd.s32 4294967295, %s2402_s12   ;;  %p2148_p0 = scmp.ge.s32.totalorder %s2402_s12, 1  ;;  %s2402_s12 = sphi %s2433_s12, %s14_s12  }
   0x2   : > { %p135_p1 = scmp.lt.s32.totalorder %s2402_s12, 3 }
   0x4   : > { %p136_p2 = pnand %p2148_p0, %p135_p1 }
   0x6   : > { %139 = sbr.rel (%p136_p2) target bundleno = 889 (0x379), region = 28 }
   0xd   : > { %p159_p3 = scmp.lt.s32.totalorder %s2144_s13, 1  ;;  %p2152_p4 = scmp.ne.s32.totalorder %s2144_s13, 0 }
   0xe   : > { %v2404_v0 = vmov (!%p2152_p4), 0.0  }
   0xf   : > { %s160_s14 = scalar_select %p159_p3, %s2144_s13, 1 }
  0x10   : > { %172 = sbr.rel (%p2152_p4) target bundleno = 23 (0x17), region = 32  ;;  %173 = vst [vmem:[%s4126_s3] sm:$0x3] (!%p2152_p4), %v2404_v0 }
  0x11   : > { %s2362_s15 = smul.u32 432, %s160_s14  ;;  %s2235_s16 = sshll.u32 %s160_s14, 8 }
  0x12   : > { %s2444_s19 = scalar_lea.vmem %s4125_s2, %s2235_s16 }
  0x13   : > { %s2449_s22 = scalar_lea.vmem %s4123_s0, %s2362_s15 }
  0x17 PF: > { %v2455_v1 = vld [vmem:[%s2449_s22 + $0x18] sm:$0xff]  ;;  %v2458_v2 = vld [vmem:[%s2449_s22 + $0x20] sm:$0xff]  ;;  %vm233_vm0 = vcmask 1046528   ;;  %v2466_v6 = vld [vmem:[%s2449_s22 + $0x8] sm:$0xff]  ;;  %s2405_s25 = smov 4   ;;  %vm274_vm1 = vcmask 1045504  }
  0x18   : > { %v2461_v3 = vld [vmem:[%s2449_s22] sm:$0xff]  ;;  %v239_v4 = vrot.slane %v2455_v1, 1  ;;  %v240_v5 = vrot.slane %v2458_v2, 1  ;;  %v2470_v8 = vld [vmem:[%s2449_s22 + $0x28] sm:$0x3]  ;;  %v235_v9 = vrot.slane %v2466_v6, 1 }
  0x19   : > { %v234_v7 = vrot.slane %v2461_v3, 1  ;;  %v242_v10 = vrot.slane %v2470_v8, 1  ;;  %v2475_v11 = vld [vmem:[%s2449_s22 + $0x10] sm:$0x3]  ;;  %v2478_v12 = vld [vmem:[%s2449_s22 + $0x38] sm:$0xff]  ;;  %v2508_v25 = vld [vmem:[%s2449_s22 + $0x48] sm:$0xff] }
  0x1a   : > { %v2481_v13 = vsel %vm233_vm0, %v239_v4, %v240_v5  ;;  %v237_v14 = vrot.slane %v2475_v11, 1  ;;  %v2485_v15 = vld [vmem:[%s2449_s22 + $0x40] sm:$0x3]  ;;  %v2488_v16 = vld [vmem:[%s2449_s22 + $0x30] sm:$0xff]  ;;  %v245_v19 = vrot.slane %v2478_v12, 1  ;;  %v249_v30 = vrot.slane %v2508_v25, 1 }
  0x1b   : > { %345 = vrot.lane.b32.xlu1 %v2481_v13, %s2405_s25  ;;  %v236_v17 = vsel %vm233_vm0, %v234_v7, %v235_v9  ;;  %v2495_v18 = vsel %vm233_vm0, %v240_v5, %v242_v10  ;;  %v247_v20 = vrot.slane %v2485_v15, 1  ;;  %v244_v22 = vrot.slane %v2488_v16, 1  ;;  %v2502_v23 = vld [vmem:[%s2449_s22 + $0x50] sm:$0xff]  ;;  %v2505_v24 = vld [vmem:[%s2449_s22 + $0x58] sm:$0x3]  ;;  %v2523_v31 = vld [vmem:[%s2449_s22 + $0x68] sm:$0xff] }
  0x1c   : > { %341 = vrot.lane.b32.xlu0 %v236_v17, %s2405_s25  ;;  %v238_v21 = vsel %vm233_vm0, %v235_v9, %v237_v14  ;;  %v250_v27 = vrot.slane %v2502_v23, 1  ;;  %v252_v28 = vrot.slane %v2505_v24, 1  ;;  %v2526_v32 = vld [vmem:[%s2449_s22 + $0x70] sm:$0x3]  ;;  %v2529_v33 = vld [vmem:[%s2449_s22 + $0x60] sm:$0xff]  ;;  %v255_v35 = vrot.slane %v2523_v31, 1 }
  0x1d   : > { %v2514_v26 = vsel %vm233_vm0, %v245_v19, %v247_v20  ;;  %v2519_v29 = vsel %vm233_vm0, %v244_v22, %v245_v19  ;;  %v257_v36 = vrot.slane %v2526_v32, 1  ;;  %v254_v38 = vrot.slane %v2529_v33, 1  ;;  %v2545_v39 = vld [vmem:[%s2449_s22 + $0x80] sm:$0xff]  ;;  %v2548_v40 = vld [vmem:[%s2449_s22 + $0x88] sm:$0x3]  ;;  %v2551_v41 = vld [vmem:[%s2449_s22 + $0x78] sm:$0xff] }
  0x1e   : > { %v2536_v34 = vsel %vm233_vm0, %v250_v27, %v252_v28  ;;  %v2541_v37 = vsel %vm233_vm0, %v249_v30, %v250_v27  ;;  %v260_v43 = vrot.slane %v2545_v39, 1  ;;  %v262_v44 = vrot.slane %v2548_v40, 1  ;;  %v2567_v47 = vld [vmem:[%s2449_s22 + $0x98] sm:$0xff]  ;;  %v2570_v48 = vld [vmem:[%s2449_s22 + $0xa0] sm:$0x3]  ;;  %v2573_v49 = vld [vmem:[%s2449_s22 + $0x90] sm:$0xff] }
  0x1f   : > { %347 = vrot.lane.b32.xlu1 %v2495_v18, %s2405_s25  ;;  %v2558_v42 = vsel %vm233_vm0, %v255_v35, %v257_v36  ;;  %v2563_v45 = vsel %vm233_vm0, %v254_v38, %v255_v35  ;;  %v259_v46 = vrot.slane %v2551_v41, 1  ;;  %v265_v51 = vrot.slane %v2567_v47, 1  ;;  %v2589_v55 = vld [vmem:[%s2449_s22 + $0xb0] sm:$0xff]  ;;  %v2592_v56 = vld [vmem:[%s2449_s22 + $0xb8] sm:$0x3]  ;;  %v2595_v57 = vld [vmem:[%s2449_s22 + $0xa8] sm:$0xff] }
  0x20   : > { %343 = vrot.lane.b32.xlu0 %v238_v21, %s2405_s25  ;;  %v2580_v50 = vsel %vm233_vm0, %v260_v43, %v262_v44  ;;  %v267_v52 = vrot.slane %v2570_v48, 1  ;;  %v264_v54 = vrot.slane %v2573_v49, 1  ;;  %v270_v59 = vrot.slane %v2589_v55, 1  ;;  %s2406_s26 = smov 8   ;;  %s2407_s27 = smov 12  }
  0x21   : > { %v2585_v53 = vsel %vm233_vm0, %v259_v46, %v260_v43  ;;  %v272_v60 = vrot.slane %v2592_v56, 1  ;;  %v269_v62 = vrot.slane %v2595_v57, 1  ;;  %v276_v0 = vrot.slane %v2466_v6, 2  ;;  %s2408_s28 = smov 16   ;;  %s2409_s29 = smov 20  }
  0x22   : > { %v2602_v58 = vsel %vm233_vm0, %v265_v51, %v267_v52  ;;  %v2607_v61 = vsel %vm233_vm0, %v264_v54, %v265_v51  ;;  %v278_v4 = vrot.slane %v2475_v11, 2  ;;  %v275_v7 = vrot.slane %v2461_v3, 2  ;;  %s2410_s30 = smov 24   ;;  %s2411_s4 = smov 28  }
  0x23   : > { %351 = vrot.lane.b32.xlu1 %v2514_v26, %s2405_s25  ;;  %v2615_v63 = vsel %vm233_vm0, %v270_v59, %v272_v60  ;;  %v2620_v5 = vsel %vm233_vm0, %v269_v62, %v270_v59  ;;  %v281_v10 = vrot.slane %v2458_v2, 2  ;;  %v283_v14 = vrot.slane %v2470_v8, 2  ;;  %s2412_s16 = smov 32  }
  0x24   : > { %349 = vrot.lane.b32.xlu0 %v2519_v29, %s2405_s25  ;;  %4141 = vst [vmem:[#allocation2_spill] sm:$0xff] %v2615_v63  ;;  %4142 = vst [vmem:[#allocation3_spill] sm:$0xff] %v2620_v5  ;;  %v279_v9 = vsel %vm274_vm1, %v276_v0, %v278_v4  ;;  %v277_v11 = vsel %vm274_vm1, %v275_v7, %v276_v0  ;;  %v280_v17 = vrot.slane %v2455_v1, 2  ;;  %v286_v20 = vrot.slane %v2478_v12, 2 }
  0x25   : > { %v2635_v19 = vsel %vm274_vm1, %v281_v10, %v283_v14  ;;  %v288_v21 = vrot.slane %v2485_v15, 2  ;;  %v285_v8 = vrot.slane %v2488_v16, 2  ;;  %v291_v28 = vrot.slane %v2502_v23, 2 }
  0x26   : > { %v2640_v22 = vsel %vm274_vm1, %v280_v17, %v281_v10  ;;  %v293_v30 = vrot.slane %v2505_v24, 2  ;;  %v290_v35 = vrot.slane %v2508_v25, 2  ;;  %v296_v38 = vrot.slane %v2523_v31, 2 }
  0x27   : > { %355 = vrot.lane.b32.xlu1 %v2536_v34, %s2405_s25  ;;  %v2648_v27 = vsel %vm274_vm1, %v286_v20, %v288_v21  ;;  %v2653_v15 = vsel %vm274_vm1, %v285_v8, %v286_v20  ;;  %v298_v43 = vrot.slane %v2526_v32, 2  ;;  %v295_v44 = vrot.slane %v2529_v33, 2 }
  0x28   : > { %353 = vrot.lane.b32.xlu0 %v2541_v37, %s2405_s25  ;;  %v2661_v36 = vsel %vm274_vm1, %v291_v28, %v293_v30  ;;  %v2666_v24 = vsel %vm274_vm1, %v290_v35, %v291_v28  ;;  %v301_v51 = vrot.slane %v2545_v39, 2  ;;  %v303_v52 = vrot.slane %v2548_v40, 2 }
  0x29   : > { %v2674_v46 = vsel %vm274_vm1, %v296_v38, %v298_v43  ;;  %v2679_v32 = vsel %vm274_vm1, %v295_v44, %v296_v38  ;;  %v300_v54 = vrot.slane %v2551_v41, 2  ;;  %v306_v60 = vrot.slane %v2567_v47, 2 }
  0x2a   : > { %v2687_v59 = vsel %vm274_vm1, %v301_v51, %v303_v52  ;;  %v308_v62 = vrot.slane %v2570_v48, 2  ;;  %v305_v0 = vrot.slane %v2573_v49, 2  ;;  %v311_v7 = vrot.slane %v2589_v55, 2 }
  0x2b   : > { %359 = vrot.lane.b32.xlu1 %v2558_v42, %s2405_s25  ;;  %v2692_v40 = vsel %vm274_vm1, %v300_v54, %v301_v51  ;;  %v310_v10 = vrot.slane %v2595_v57, 2  ;;  %vm910_vm2 = vcmask 1043456   ;;  %vm725_vm3 = vcmask 31744  }
  0x2c   : > { %357 = vrot.lane.b32.xlu0 %v2563_v45, %s2405_s25  ;;  %v2700_v4 = vsel %vm274_vm1, %v306_v60, %v308_v62  ;;  %v2705_v48 = vsel %vm274_vm1, %v305_v0, %v306_v60  ;;  %vm742_vm4 = vcmask 64512   ;;  %vm759_vm5 = vcmask 97280  }
  0x2d   : > { %vm776_vm6 = vcmask 130048   ;;  %vm793_vm7 = vcmask 162816   ;;  %vm810_vm8 = vcmask 195584   ;;  %vm827_vm9 = vcmask 228352  }
  0x2e   : > { %vm844_vm10 = vcmask 261120   ;;  %vm861_vm11 = vcmask 293888   ;;  %vm2079_vm12 = vcmask 1040384  }
  0x2f   : > { %363 = vrot.lane.b32.xlu1 %v2580_v50, %s2405_s25 }
  0x30   : > { %361 = vrot.lane.b32.xlu0 %v2585_v53, %s2405_s25 }
  0x33   : > { %367 = vrot.lane.b32.xlu1 %v2602_v58, %s2405_s25 }
  0x34   : > { %365 = vrot.lane.b32.xlu0 %v2607_v61, %s2405_s25 }
  0x37   : > { %371 = vrot.lane.b32.xlu1 %v2615_v63, %s2405_s25 }
  0x38   : > { %369 = vrot.lane.b32.xlu0 %v2620_v5, %s2405_s25 }
  0x3b   : > { %391 = vrot.lane.b32.xlu1 %v279_v9, %s2406_s26  ;;  %v313_v9 = vrot.slane %v2592_v56, 2 }
  0x3c   : > { %389 = vrot.lane.b32.xlu0 %v277_v11, %s2406_s26  ;;  %v2716_v11 = vsel %vm274_vm1, %v310_v10, %v311_v7 }
  0x3d   : > { %v2713_v14 = vsel %vm274_vm1, %v311_v7, %v313_v9  ;;  %4144 = vst [vmem:[#allocation5_spill] sm:$0xff] %v2716_v11 }
  0x3e   : > { %4143 = vst [vmem:[#allocation4_spill] sm:$0xff] %v2713_v14 }
  0x3f   : > { %395 = vrot.lane.b32.xlu1 %v2635_v19, %s2406_s26 }
  0x40   : > { %393 = vrot.lane.b32.xlu0 %v2640_v22, %s2406_s26 }
  0x43   : > { %399 = vrot.lane.b32.xlu1 %v2648_v27, %s2406_s26 }
  0x44   : > { %397 = vrot.lane.b32.xlu0 %v2653_v15, %s2406_s26 }
  0x47   : > { %403 = vrot.lane.b32.xlu1 %v2661_v36, %s2406_s26 }
  0x48   : > { %401 = vrot.lane.b32.xlu0 %v2666_v24, %s2406_s26 }
  0x4b   : > { %407 = vrot.lane.b32.xlu1 %v2674_v46, %s2406_s26 }
  0x4c   : > { %405 = vrot.lane.b32.xlu0 %v2679_v32, %s2406_s26 }
  0x4f   : > { %411 = vrot.lane.b32.xlu1 %v2687_v59, %s2406_s26 }
  0x50   : > { %409 = vrot.lane.b32.xlu0 %v2692_v40, %s2406_s26 }
  0x53   : > { %415 = vrot.lane.b32.xlu1 %v2700_v4, %s2406_s26 }
  0x54   : > { %413 = vrot.lane.b32.xlu0 %v2705_v48, %s2406_s26 }
  0x57   : > { %419 = vrot.lane.b32.xlu1 %v2713_v14, %s2406_s26 }
  0x58   : > { %417 = vrot.lane.b32.xlu0 %v2716_v11, %s2406_s26 }
  0x5b   : > { %439 = vrot.lane.b32.xlu1 %v2458_v2, %s2407_s27  ;;  %v2754_v2 = vld [vmem:[%s2449_s22 + $0xc0] sm:$0xff] }
  0x5c   : > { %437 = vrot.lane.b32.xlu0 %v2455_v1, %s2407_s27  ;;  %v2751_v1 = vld [vmem:[%s2449_s22 + $0xc8] sm:$0xff]  ;;  %v318_v21 = vrot.slane %v2754_v2, 1 }
  0x5d   : > { %v2790_v56 = vrot.slane %v2751_v1, 1  ;;  %v324_v10 = vrot.slane %v2751_v1, 2 }
  0x5f   : > { %443 = vrot.lane.b32.xlu1 %v2478_v12, %s2407_s27  ;;  %v2809_v35 = vsel %vm233_vm0, %v318_v21, %v2790_v56 }
  0x60   : > { %441 = vrot.lane.b32.xlu0 %v2488_v16, %s2407_s27  ;;  %4147 = vst [vmem:[#allocation8_spill] sm:$0xff] %v2809_v35 }
  0x63   : > { %447 = vrot.lane.b32.xlu1 %v2502_v23, %s2407_s27 }
  0x64   : > { %445 = vrot.lane.b32.xlu0 %v2508_v25, %s2407_s27 }
  0x67   : > { %451 = vrot.lane.b32.xlu1 %v2523_v31, %s2407_s27 }
  0x68   : > { %449 = vrot.lane.b32.xlu0 %v2529_v33, %s2407_s27 }
  0x6b   : > { %455 = vrot.lane.b32.xlu1 %v2545_v39, %s2407_s27 }
  0x6c   : > { %453 = vrot.lane.b32.xlu0 %v2551_v41, %s2407_s27 }
  0x6f   : > { %459 = vrot.lane.b32.xlu1 %v2567_v47, %s2407_s27 }
  0x70   : > { %457 = vrot.lane.b32.xlu0 %v2573_v49, %s2407_s27 }
  0x73   : > { %463 = vrot.lane.b32.xlu1 %v2589_v55, %s2407_s27 }
  0x74   : > { %461 = vrot.lane.b32.xlu0 %v2595_v57, %s2407_s27 }
  0x77   : > { %467 = vrot.lane.b32.xlu1 %v2751_v1, %s2407_s27 }
  0x78   : > { %465 = vrot.lane.b32.xlu0 %v2754_v2, %s2407_s27 }
  0x7b   : > { %487 = vrot.lane.b32.xlu1 %v2495_v18, %s2408_s28  ;;  %v205_v18 = vld [vmem:[%s2449_s22 + $0xd0] sm:$0x3] }
  0x7c   : > { %485 = vrot.lane.b32.xlu0 %v2481_v13, %s2408_s28  ;;  %v321_v17 = vrot.slane %v205_v18, 1 }
  0x7e   : > { %v2803_v28 = vsel %vm233_vm0, %v2790_v56, %v321_v17  ;;  %v326_v17 = vrot.slane %v205_v18, 2 }
  0x7f   : > { %491 = vrot.lane.b32.xlu1 %v2514_v26, %s2408_s28  ;;  %4145 = vst [vmem:[#allocation6_spill] sm:$0xff] %v2803_v28 }
  0x80   : > { %489 = vrot.lane.b32.xlu0 %v2519_v29, %s2408_s28 }
  0x83   : > { %495 = vrot.lane.b32.xlu1 %v2536_v34, %s2408_s28 }
  0x84   : > { %493 = vrot.lane.b32.xlu0 %v2541_v37, %s2408_s28 }
  0x87   : > { %499 = vrot.lane.b32.xlu1 %v2558_v42, %s2408_s28 }
  0x88   : > { %497 = vrot.lane.b32.xlu0 %v2563_v45, %s2408_s28 }
  0x8b   : > { %503 = vrot.lane.b32.xlu1 %v2580_v50, %s2408_s28 }
  0x8c   : > { %501 = vrot.lane.b32.xlu0 %v2585_v53, %s2408_s28 }
  0x8d   : > { %v2780_v13 = vpop.permute.xlu1 %345 }
  0x8e   : > { %v2783_v55 = vpop.permute.xlu0 %341 }
  0x8f   : > { %507 = vrot.lane.b32.xlu1 %v2602_v58, %s2408_s28 }
  0x90   : > { %505 = vrot.lane.b32.xlu0 %v2607_v61, %s2408_s28 }
  0x91   : > { %v2792_v20 = vpop.permute.xlu1 %347 }
  0x92   : > { %v2795_v8 = vpop.permute.xlu0 %343 }
  0x93   : > { %511 = vrot.lane.b32.xlu1 %v2615_v63, %s2408_s28 }
  0x94   : > { %509 = vrot.lane.b32.xlu0 %v2620_v5, %s2408_s28 }
  0x95   : > { %v2805_v30 = vpop.permute.xlu1 %351 }
  0x96   : > { %4146 = vst [vmem:[#allocation7_spill] sm:$0xff] %v2805_v30  ;;  %v2811_v38 = vpop.permute.xlu0 %349 }
  0x97   : > { %4148 = vst [vmem:[#allocation9_spill] sm:$0xff] %v2811_v38  ;;  %515 = vrot.lane.b32.xlu1 %v2803_v28, %s2408_s28 }
  0x98   : > { %513 = vrot.lane.b32.xlu0 %v2809_v35, %s2408_s28 }
  0x99   : > { %v2817_v43 = vpop.permute.xlu1 %355 }
  0x9a   : > { %4149 = vst [vmem:[#allocation10_spill] sm:$0xff] %v2817_v43  ;;  %v2819_v44 = vpop.permute.xlu0 %353 }
  0x9b   : > { %4150 = vst [vmem:[#allocation11_spill] sm:$0xff] %v2819_v44  ;;  %535 = vrot.lane.b32.xlu1 %v2635_v19, %s2409_s29 }
  0x9c   : > { %533 = vrot.lane.b32.xlu0 %v2640_v22, %s2409_s29 }
  0x9d   : > { %v2825_v51 = vpop.permute.xlu1 %359 }
  0x9e   : > { %4151 = vst [vmem:[#allocation12_spill] sm:$0xff] %v2825_v51  ;;  %v2827_v52 = vpop.permute.xlu0 %357 }
  0x9f   : > { %4152 = vst [vmem:[#allocation13_spill] sm:$0xff] %v2827_v52  ;;  %539 = vrot.lane.b32.xlu1 %v2648_v27, %s2409_s29 }
  0xa0   : > { %537 = vrot.lane.b32.xlu0 %v2653_v15, %s2409_s29 }
  0xa1   : > { %v2833_v54 = vpop.permute.xlu1 %363 }
  0xa2   : > { %4153 = vst [vmem:[#allocation14_spill] sm:$0xff] %v2833_v54  ;;  %v2835_v60 = vpop.permute.xlu0 %361 }
  0xa3   : > { %4154 = vst [vmem:[#allocation15_spill] sm:$0xff] %v2835_v60  ;;  %543 = vrot.lane.b32.xlu1 %v2661_v36, %s2409_s29 }
  0xa4   : > { %541 = vrot.lane.b32.xlu0 %v2666_v24, %s2409_s29 }
  0xa5   : > { %v2841_v19 = vpop.permute.xlu1 %367 }
  0xa6   : > { %4155 = vst [vmem:[#allocation16_spill] sm:$0xff] %v2841_v19  ;;  %v2843_v22 = vpop.permute.xlu0 %365  ;;  %v2876_v19 = vsel %vm274_vm1, %v324_v10, %v326_v17 }
  0xa7   : > { %4156 = vst [vmem:[#allocation17_spill] sm:$0xff] %v2843_v22  ;;  %547 = vrot.lane.b32.xlu1 %v2674_v46, %s2409_s29  ;;  %4159 = vst [vmem:[#allocation20_spill] sm:$0xff] %v2876_v19 }
  0xa8   : > { %545 = vrot.lane.b32.xlu0 %v2679_v32, %s2409_s29 }
  0xa9   : > { %v2849_v62 = vpop.permute.xlu1 %371 }
  0xaa   : > { %4157 = vst [vmem:[#allocation18_spill] sm:$0xff] %v2849_v62  ;;  %v2851_v0 = vpop.permute.xlu0 %369  ;;  %v323_v62 = vrot.slane %v2754_v2, 2 }
  0xab   : > { %4158 = vst [vmem:[#allocation19_spill] sm:$0xff] %v2851_v0  ;;  %551 = vrot.lane.b32.xlu1 %v2687_v59, %s2409_s29 }
  0xac   : > { %549 = vrot.lane.b32.xlu0 %v2692_v40, %s2409_s29  ;;  %v2881_v54 = vsel %vm274_vm1, %v323_v62, %v324_v10 }
  0xad   : > { %v2857_v7 = vpop.permute.xlu1 %391  ;;  %4161 = vst [vmem:[#allocation22_spill] sm:$0xff] %v2881_v54 }
  0xae   : > { %v2859_v9 = vpop.permute.xlu0 %389 }
  0xaf   : > { %555 = vrot.lane.b32.xlu1 %v2700_v4, %s2409_s29 }
  0xb0   : > { %553 = vrot.lane.b32.xlu0 %v2705_v48, %s2409_s29 }
  0xb1   : > { %v2866_v21 = vpop.permute.xlu1 %395 }
  0xb2   : > { %v2869_v0 = vpop.permute.xlu0 %393 }
  0xb3   : > { %559 = vrot.lane.b32.xlu1 %v2713_v14, %s2409_s29 }
  0xb4   : > { %557 = vrot.lane.b32.xlu0 %v2716_v11, %s2409_s29 }
  0xb5   : > { %v2878_v22 = vpop.permute.xlu1 %399 }
  0xb6   : > { %4160 = vst [vmem:[#allocation21_spill] sm:$0xff] %v2878_v22  ;;  %v2883_v18 = vpop.permute.xlu0 %397 }
  0xb7   : > { %4162 = vst [vmem:[#allocation23_spill] sm:$0xff] %v2883_v18  ;;  %563 = vrot.lane.b32.xlu1 %v2876_v19, %s2409_s29 }
  0xb8   : > { %561 = vrot.lane.b32.xlu0 %v2881_v54, %s2409_s29 }
  0xb9   : > { %v2889_v60 = vpop.permute.xlu1 %403 }
  0xba   : > { %4163 = vst [vmem:[#allocation24_spill] sm:$0xff] %v2889_v60  ;;  %v2891_v51 = vpop.permute.xlu0 %401 }
  0xbb   : > { %4164 = vst [vmem:[#allocation25_spill] sm:$0xff] %v2891_v51  ;;  %583 = vrot.lane.b32.xlu1 %v2478_v12, %s2410_s30 }
  0xbc   : > { %581 = vrot.lane.b32.xlu0 %v2488_v16, %s2410_s30 }
  0xbd   : > { %v2897_v62 = vpop.permute.xlu1 %407 }
  0xbe   : > { %4165 = vst [vmem:[#allocation26_spill] sm:$0xff] %v2897_v62  ;;  %v2899_v17 = vpop.permute.xlu0 %405 }
  0xbf   : > { %4166 = vst [vmem:[#allocation27_spill] sm:$0xff] %v2899_v17  ;;  %587 = vrot.lane.b32.xlu1 %v2502_v23, %s2410_s30 }
  0xc0   : > { %585 = vrot.lane.b32.xlu0 %v2508_v25, %s2410_s30 }
  0xc1   : > { %v2905_v52 = vpop.permute.xlu1 %411 }
  0xc2   : > { %4167 = vst [vmem:[#allocation28_spill] sm:$0xff] %v2905_v52  ;;  %v2907_v19 = vpop.permute.xlu0 %409 }
  0xc3   : > { %4168 = vst [vmem:[#allocation29_spill] sm:$0xff] %v2907_v19  ;;  %591 = vrot.lane.b32.xlu1 %v2523_v31, %s2410_s30  ;;  %v2172_v31 = vld [vmem:[%s2449_s22 + $0xd0] sm:$0x3] }
  0xc4   : > { %589 = vrot.lane.b32.xlu0 %v2529_v33, %s2410_s30 }
  0xc5   : > { %v2913_v12 = vpop.permute.xlu1 %415 }
  0xc6   : > { %4169 = vst [vmem:[#allocation30_spill] sm:$0xff] %v2913_v12  ;;  %v2915_v16 = vpop.permute.xlu0 %413  ;;  %v1193_v12 = vrot.slane %v2172_v31, 1 }
  0xc7   : > { %4170 = vst [vmem:[#allocation31_spill] sm:$0xff] %v2915_v16  ;;  %595 = vrot.lane.b32.xlu1 %v2545_v39, %s2410_s30 }
  0xc8   : > { %593 = vrot.lane.b32.xlu0 %v2551_v41, %s2410_s30 }
  0xc9   : > { %v2921_v23 = vpop.permute.xlu1 %419 }
  0xca   : > { %4171 = vst [vmem:[#allocation32_spill] sm:$0xff] %v2921_v23  ;;  %v2923_v25 = vpop.permute.xlu0 %417  ;;  %v2943_v23 = vld [vmem:[%s2449_s22 + $0xd8] sm:$0xff] }
  0xcb   : > { %4172 = vst [vmem:[#allocation33_spill] sm:$0xff] %v2923_v25  ;;  %599 = vrot.lane.b32.xlu1 %v2567_v47, %s2410_s30  ;;  %v1194_v47 = vsel %vm233_vm0, %v2790_v56, %v1193_v12  ;;  %v2946_v25 = vld [vmem:[%s2449_s22 + $0xe0] sm:$0xff]  ;;  %v1195_v52 = vrot.slane %v2943_v23, 1  ;;  %v2175_v12 = vld [vmem:[%s2449_s22 + $0xe8] sm:$0x3] }
  0xcc   : > { %597 = vrot.lane.b32.xlu0 %v2573_v49, %s2410_s30  ;;  %v1233_v49 = vrot.slane %v2172_v31, 2  ;;  %v1198_v17 = vrot.slane %v2175_v12, 1 }
  0xcd   : > { %v2930_v33 = vpop.permute.xlu1 %439 }
  0xce   : > { %v2932_v39 = vpop.permute.xlu0 %437  ;;  %v1234_v56 = vsel %vm274_vm1, %v324_v10, %v1233_v49  ;;  %v1235_v49 = vrot.slane %v2943_v23, 2 }
  0xcf   : > { %1296 = vrot.lane.b32.xlu1 %v2809_v35, %s2405_s25 }
  0xd0   : > { %601 = vrot.lane.b32.xlu0 %v2595_v57, %s2410_s30  ;;  %v1196_v57 = vrot.slane %v2946_v25, 1 }
  0xd1   : > { %v2938_v41 = vpop.permute.xlu1 %443 }
  0xd2   : > { %v2948_v16 = vpop.permute.xlu0 %441  ;;  %v1197_v31 = vsel %vm233_vm0, %v1195_v52, %v1196_v57  ;;  %v1199_v10 = vsel %vm233_vm0, %v1196_v57, %v1198_v17 }
  0xd3   : > { %1344 = vrot.lane.b32.xlu1 %v2881_v54, %s2406_s26 }
  0xd4   : > { %1298 = vrot.lane.b32.xlu0 %v1194_v47, %s2405_s25 }
  0xd5   : > { %v2955_v19 = vpop.permute.xlu1 %447 }
  0xd6   : > { %4173 = vst [vmem:[#allocation34_spill] sm:$0xff] %v2955_v19  ;;  %v2959_v62 = vpop.permute.xlu0 %445 }
  0xd7   : > { %4174 = vst [vmem:[#allocation35_spill] sm:$0xff] %v2959_v62  ;;  %1392 = vrot.lane.b32.xlu1 %v2943_v23, %s2407_s27 }
  0xd8   : > { %1346 = vrot.lane.b32.xlu0 %v1234_v56, %s2406_s26  ;;  %v1236_v56 = vrot.slane %v2946_v25, 2 }
  0xd9   : > { %v2965_v47 = vpop.permute.xlu1 %451 }
  0xda   : > { %4175 = vst [vmem:[#allocation36_spill] sm:$0xff] %v2965_v47  ;;  %v2967_v54 = vpop.permute.xlu0 %449  ;;  %v1238_v47 = vrot.slane %v2175_v12, 2  ;;  %v1237_v43 = vsel %vm274_vm1, %v1235_v49, %v1236_v56  ;;  %v3001_v49 = vld [vmem:[%s2449_s22 + $0xf8] sm:$0xff] }
  0xdb   : > { %4176 = vst [vmem:[#allocation37_spill] sm:$0xff] %v2967_v54  ;;  %1440 = vrot.lane.b32.xlu1 %v1197_v31, %s2408_s28  ;;  %4185 = vst [vmem:[#allocation46_spill] sm:$0xff] %v3001_v49 }
  0xdc   : > { %1394 = vrot.lane.b32.xlu0 %v2946_v25, %s2407_s27  ;;  %v1239_v57 = vsel %vm274_vm1, %v1236_v56, %v1238_v47  ;;  %v174_v47 = vld [vmem:[%s4124_s1] sm:$0xff]  ;;  %v1201_v56 = vrot.slane %v3001_v49, 1 }
  0xdd   : > { %v2974_v28 = vpop.permute.xlu1 %455 }
  0xde   : > { %4177 = vst [vmem:[#allocation38_spill] sm:$0xff] %v2974_v28  ;;  %v2977_v52 = vpop.permute.xlu0 %453 }
  0xdf   : > { %4178 = vst [vmem:[#allocation39_spill] sm:$0xff] %v2977_v52  ;;  %1442 = vrot.lane.b32.xlu1 %v1199_v10, %s2408_s28 }
  0xe0   : > { %1300 = vrot.lane.b32.xlu0 %v1197_v31, %s2405_s25  ;;  %v2998_v31 = vld [vmem:[%s2449_s22 + $0xf0] sm:$0xff] }
  0xe1   : > { %v2981_v60 = vpop.permute.xlu1 %459  ;;  %4184 = vst [vmem:[#allocation45_spill] sm:$0xff] %v2998_v31 }
  0xe2   : > { %4179 = vst [vmem:[#allocation40_spill] sm:$0xff] %v2981_v60  ;;  %v2984_v17 = vpop.permute.xlu0 %457 }
  0xe3   : > { %4180 = vst [vmem:[#allocation41_spill] sm:$0xff] %v2984_v17  ;;  %1302 = vrot.lane.b32.xlu1 %v1199_v10, %s2405_s25  ;;  %v1200_v10 = vrot.slane %v2998_v31, 1 }
  0xe4   : > { %1488 = vrot.lane.b32.xlu0 %v1237_v43, %s2409_s29 }
  0xe5   : > { %v2989_v28 = vpop.permute.xlu1 %463 }
  0xe6   : > { %4181 = vst [vmem:[#allocation42_spill] sm:$0xff] %v2989_v28  ;;  %v2991_v52 = vpop.permute.xlu0 %461 }
  0xe7   : > { %4182 = vst [vmem:[#allocation43_spill] sm:$0xff] %v2991_v52  ;;  %1490 = vrot.lane.b32.xlu1 %v1239_v57, %s2409_s29  ;;  %v177_v52 = vld [vmem:[%s4124_s1 + $0x18] sm:$0xff] }
  0xe8   : > { %1348 = vrot.lane.b32.xlu0 %v1237_v43, %s2406_s26  ;;  %v175_v43 = vld [vmem:[%s4124_s1 + $0x8] sm:$0xff] }
  0xe9   : > { %v2995_v12 = vpop.permute.xlu1 %467 }
  0xea   : > { %4183 = vst [vmem:[#allocation44_spill] sm:$0xff] %v2995_v12  ;;  %v3003_v60 = vpop.permute.xlu0 %465  ;;  %v2346_v12 = vpack.c.bf16 %v175_v43, %v174_v47  ;;  %v1202_v47 = vsel %vm233_vm0, %v1200_v10, %v1201_v56  ;;  %v1240_v10 = vrot.slane %v2998_v31, 2 }
  0xeb   : > { %4186 = vst [vmem:[#allocation47_spill] sm:$0xff] %v3003_v60  ;;  %629 = vrot.lane.b32.xlu1 %v2519_v29, %s2411_s4  ;;  %v176_v29 = vld [vmem:[%s4124_s1 + $0x10] sm:$0xff] }
  0xec   : > { %1536 = vrot.lane.b32.xlu0 %v2998_v31, %s2410_s30  ;;  %2347 = vmatprep.subr.bf16.mxu0 %v2346_v12  ;;  %v2350_v43 = vpack.c.bf16 %v177_v52, %v176_v29  ;;  %v178_v52 = vld [vmem:[%s4124_s1 + $0x20] sm:$0xf]  ;;  %v1241_v29 = vrot.slane %v3001_v49, 2 }
  0xed   : > { %v3017_v60 = vpop.permute.xlu1 %487  ;;  %2355 = vmatprep.subr.bf16.mxu1 %v2346_v12  ;;  %2349 = vmatpush3.bf16.msra.mxu0 %v2346_v12 }
  0xee   : > { %v3019_v28 = vpop.permute.xlu0 %485  ;;  %2357 = vmatpush3.bf16.msra.mxu1 %v2346_v12  ;;  %2351 = vmatprep.subr.bf16.mxu0 %v2350_v43  ;;  %v2178_v12 = vld [vmem:[%s2449_s22 + $0x100] sm:$0x3] }
  0xef   : > { %1396 = vrot.lane.b32.xlu1 %v2998_v31, %s2407_s27  ;;  %2359 = vmatprep.subr.bf16.mxu1 %v2350_v43  ;;  %v1203_v51 = vrot.slane %v2178_v12, 1 }
  0xf0   : > { %1350 = vrot.lane.b32.xlu0 %v1239_v57, %s2406_s26 }
  0xf1   : > { %v3031_v17 = vpop.permute.xlu1 %491  ;;  %2353 = vmatpush3.bf16.msra.mxu0 %v2350_v43 }
  0xf2   : > { %v3033_v35 = vpop.permute.xlu0 %489  ;;  %2361 = vmatpush3.bf16.msra.mxu1 %v2350_v43  ;;  %2286 = vmatprep.subr.msk.mxu0 %vm910_vm2, %v178_v52 }
  0xf3   : > { %1584 = vrot.lane.b32.xlu1 %v1202_v47, %s2411_s4  ;;  %2320 = vmatprep.subr.msk.mxu1 %vm910_vm2, %v178_v52 }
  0xf4   : > { %1538 = vrot.lane.b32.xlu0 %v3001_v49, %s2410_s30 }
  0xf5   : > { %v3038_v54 = vpop.permute.xlu1 %495  ;;  %2287 = vmatpush3.msk.msra.mxu0 %vm910_vm2, %v178_v52 }
  0xf6   : > { %4187 = vst [vmem:[#allocation48_spill] sm:$0xff] %v3038_v54  ;;  %v3043_v57 = vpop.permute.xlu0 %493  ;;  %2321 = vmatpush3.msk.msra.mxu1 %vm910_vm2, %v178_v52 }
  0xf7   : > { %4188 = vst [vmem:[#allocation49_spill] sm:$0xff] %v3043_v57  ;;  %677 = vrot.lane.b32.xlu1 %v2653_v15, %s2412_s16  ;;  %v1242_v15 = vsel %vm274_vm1, %v1240_v10, %v1241_v29  ;;  %v3259_v57 = vld [vmem:[%s2449_s22 + $0x140] sm:$0xff] }
  0xf8   : > { %631 = vrot.lane.b32.xlu0 %v2514_v26, %s2411_s4  ;;  %v1204_v26 = vsel %vm233_vm0, %v1201_v56, %v1203_v51  ;;  %v1243_v51 = vrot.slane %v2178_v12, 2  ;;  %v1216_v62 = vrot.slane %v3259_v57, 1 }
  0xf9   : > { %v3052_v43 = vpop.permute.xlu1 %499 }
  0xfa   : > { %4189 = vst [vmem:[#allocation50_spill] sm:$0xff] %v3052_v43  ;;  %v3054_v44 = vpop.permute.xlu0 %497 }
  0xfb   : > { %4190 = vst [vmem:[#allocation51_spill] sm:$0xff] %v3054_v44  ;;  %1444 = vrot.lane.b32.xlu1 %v1202_v47, %s2408_s28 }
  0xfc   : > { %1398 = vrot.lane.b32.xlu0 %v3001_v49, %s2407_s27 }
  0xfd   : > { %v3060_v14 = vpop.permute.xlu1 %503 }
  0xfe   : > { %4191 = vst [vmem:[#allocation52_spill] sm:$0xff] %v3060_v14  ;;  %v3063_v11 = vpop.permute.xlu0 %501 }
  0xff   : > { %4192 = vst [vmem:[#allocation53_spill] sm:$0xff] %v3063_v11  ;;  %1632 = vrot.lane.b32.xlu1 %v1242_v15, %s2412_s16 }
 0x100   : > { %1586 = vrot.lane.b32.xlu0 %v1204_v26, %s2411_s4 }
 0x101   : > { %v3067_v52 = vpop.permute.xlu1 %507 }
 0x102   : > { %4193 = vst [vmem:[#allocation54_spill] sm:$0xff] %v3067_v52  ;;  %v3069_v43 = vpop.permute.xlu0 %505  ;;  %v1244_v52 = vsel %vm274_vm1, %v1241_v29, %v1243_v51 }
 0x103   : > { %4194 = vst [vmem:[#allocation55_spill] sm:$0xff] %v3069_v43  ;;  %1304 = vrot.lane.b32.xlu1 %v1202_v47, %s2405_s25 }
 0x104   : > { %679 = vrot.lane.b32.xlu0 %v2648_v27, %s2412_s16 }
 0x105   : > { %v3074_v10 = vpop.permute.xlu1 %511 }
 0x106   : > { %4195 = vst [vmem:[#allocation56_spill] sm:$0xff] %v3074_v10  ;;  %v3076_v56 = vpop.permute.xlu0 %509  ;;  %v3096_v10 = vld [vmem:[%s2449_s22 + $0x108] sm:$0xff] }
 0x107   : > { %4196 = vst [vmem:[#allocation57_spill] sm:$0xff] %v3076_v56  ;;  %1492 = vrot.lane.b32.xlu1 %v1242_v15, %s2409_s29  ;;  %4199 = vst [vmem:[#allocation60_spill] sm:$0xff] %v3096_v10 }
 0x108   : > { %1446 = vrot.lane.b32.xlu0 %v1204_v26, %s2408_s28 }
 0x109   : > { %v3080_v14 = vpop.permute.xlu1 %515 }
 0x10a   : > { %4197 = vst [vmem:[#allocation58_spill] sm:$0xff] %v3080_v14  ;;  %v3083_v43 = vpop.permute.xlu0 %513  ;;  %v3099_v14 = vld [vmem:[%s2449_s22 + $0x110] sm:$0xff] }
 0x10b   : > { %4198 = vst [vmem:[#allocation59_spill] sm:$0xff] %v3083_v43  ;;  %1306 = vrot.lane.b32.xlu1 %v1204_v26, %s2405_s25  ;;  %4200 = vst [vmem:[#allocation61_spill] sm:$0xff] %v3099_v14  ;;  %v1205_v26 = vrot.slane %v3096_v10, 1  ;;  %v1206_v51 = vrot.slane %v3099_v14, 1 }
 0x10c   : > { %1634 = vrot.lane.b32.xlu0 %v1244_v52, %s2412_s16 }
 0x10d   : > { %v3087_v27 = vpop.permute.xlu1 %535  ;;  %v1207_v56 = vsel %vm233_vm0, %v1205_v26, %v1206_v51  ;;  %v1246_v26 = vrot.slane %v3099_v14, 2 }
 0x10e   : > { %v3089_v47 = vpop.permute.xlu0 %533 }
 0x10f   : > { %1494 = vrot.lane.b32.xlu1 %v1244_v52, %s2409_s29 }
 0x110   : > { %1352 = vrot.lane.b32.xlu0 %v1242_v15, %s2406_s26 }
 0x111   : > { %v3093_v12 = vpop.permute.xlu1 %539 }
 0x112   : > { %v3101_v29 = vpop.permute.xlu0 %537 }
 0x113   : > { %633 = vrot.lane.b32.xlu1 %v2541_v37, %s2411_s4 }
 0x114   : > { %1540 = vrot.lane.b32.xlu0 %v3096_v10, %s2410_s30 }
 0x115   : > { %v3109_v15 = vpop.permute.xlu1 %543 }
 0x116   : > { %4201 = vst [vmem:[#allocation62_spill] sm:$0xff] %v3109_v15  ;;  %v3111_v43 = vpop.permute.xlu0 %541  ;;  %v2181_v15 = vld [vmem:[%s2449_s22 + $0x118] sm:$0x3] }
 0x117   : > { %4202 = vst [vmem:[#allocation63_spill] sm:$0xff] %v3111_v43  ;;  %1400 = vrot.lane.b32.xlu1 %v3096_v10, %s2407_s27  ;;  %v3256_v43 = vld [vmem:[%s2449_s22 + $0x138] sm:$0xff] }
 0x118   : > { %1354 = vrot.lane.b32.xlu0 %v1244_v52, %s2406_s26  ;;  %v1245_v52 = vrot.slane %v3096_v10, 2 }
 0x119   : > { %v3117_v11 = vpop.permute.xlu1 %547 }
 0x11a   : > { %4203 = vst [vmem:[#allocation64_spill] sm:$0xff] %v3117_v11  ;;  %v3119_v37 = vpop.permute.xlu0 %545 }
 0x11b   : > { %4204 = vst [vmem:[#allocation65_spill] sm:$0xff] %v3119_v37  ;;  %1588 = vrot.lane.b32.xlu1 %v1207_v56, %s2411_s4  ;;  %v1208_v37 = vrot.slane %v2181_v15, 1 }
 0x11c   : > { %1542 = vrot.lane.b32.xlu0 %v3099_v14, %s2410_s30 }
 0x11d   : > { %v3124_v44 = vpop.permute.xlu1 %551 }
 0x11e   : > { %4205 = vst [vmem:[#allocation66_spill] sm:$0xff] %v3124_v44  ;;  %v3126_v49 = vpop.permute.xlu0 %549  ;;  %v1247_v44 = vsel %vm274_vm1, %v1245_v52, %v1246_v26 }
 0x11f   : > { %4206 = vst [vmem:[#allocation67_spill] sm:$0xff] %v3126_v49  ;;  %681 = vrot.lane.b32.xlu1 %v2666_v24, %s2412_s16 }
 0x120   : > { %635 = vrot.lane.b32.xlu0 %v2536_v34, %s2411_s4  ;;  %v1209_v34 = vsel %vm233_vm0, %v1206_v51, %v1208_v37  ;;  %v1248_v51 = vrot.slane %v2181_v15, 2 }
 0x121   : > { %v3135_v11 = vpop.permute.xlu1 %555 }
 0x122   : > { %4207 = vst [vmem:[#allocation68_spill] sm:$0xff] %v3135_v11  ;;  %v3137_v54 = vpop.permute.xlu0 %553 }
 0x123   : > { %4208 = vst [vmem:[#allocation69_spill] sm:$0xff] %v3137_v54  ;;  %1448 = vrot.lane.b32.xlu1 %v1207_v56, %s2408_s28 }
 0x124   : > { %1402 = vrot.lane.b32.xlu0 %v3099_v14, %s2407_s27  ;;  %v3182_v14 = vld [vmem:[%s2449_s22 + $0x128] sm:$0xff] }
 0x125   : > { %v3143_v24 = vpop.permute.xlu1 %559  ;;  %4217 = vst [vmem:[#allocation78_spill] sm:$0xff] %v3182_v14 }
 0x126   : > { %4209 = vst [vmem:[#allocation70_spill] sm:$0xff] %v3143_v24  ;;  %v3146_v49 = vpop.permute.xlu0 %557 }
 0x127   : > { %4210 = vst [vmem:[#allocation71_spill] sm:$0xff] %v3146_v49  ;;  %1636 = vrot.lane.b32.xlu1 %v1247_v44, %s2412_s16  ;;  %v3179_v49 = vld [vmem:[%s2449_s22 + $0x120] sm:$0xff] }
 0x128   : > { %1590 = vrot.lane.b32.xlu0 %v1209_v34, %s2411_s4  ;;  %4216 = vst [vmem:[#allocation77_spill] sm:$0xff] %v3179_v49 }
 0x129   : > { %v3150_v11 = vpop.permute.xlu1 %563 }
 0x12a   : > { %4211 = vst [vmem:[#allocation72_spill] sm:$0xff] %v3150_v11  ;;  %v3152_v54 = vpop.permute.xlu0 %561  ;;  %v1249_v11 = vsel %vm274_vm1, %v1246_v26, %v1248_v51  ;;  %v1211_v51 = vrot.slane %v3182_v14, 1 }
 0x12b   : > { %4212 = vst [vmem:[#allocation73_spill] sm:$0xff] %v3152_v54  ;;  %1308 = vrot.lane.b32.xlu1 %v1207_v56, %s2405_s25 }
 0x12c   : > { %683 = vrot.lane.b32.xlu0 %v2661_v36, %s2412_s16 }
 0x12d   : > { %v3157_v52 = vpop.permute.xlu1 %583 }
 0x12e   : > { %v3159_v37 = vpop.permute.xlu0 %581 }
 0x12f   : > { %1496 = vrot.lane.b32.xlu1 %v1247_v44, %s2409_s29 }
 0x130   : > { %1450 = vrot.lane.b32.xlu0 %v1209_v34, %s2408_s28 }
 0x131   : > { %v3163_v24 = vpop.permute.xlu1 %587 }
 0x132   : > { %v3166_v54 = vpop.permute.xlu0 %585 }
 0x133   : > { %1310 = vrot.lane.b32.xlu1 %v1209_v34, %s2405_s25  ;;  %v1210_v34 = vrot.slane %v3179_v49, 1 }
 0x134   : > { %1638 = vrot.lane.b32.xlu0 %v1249_v11, %s2412_s16 }
 0x135   : > { %v3170_v36 = vpop.permute.xlu1 %591  ;;  %v1212_v10 = vsel %vm233_vm0, %v1210_v34, %v1211_v51  ;;  %v1251_v34 = vrot.slane %v3182_v14, 2 }
 0x136   : > { %4213 = vst [vmem:[#allocation74_spill] sm:$0xff] %v3170_v36  ;;  %v3172_v56 = vpop.permute.xlu0 %589 }
 0x137   : > { %4214 = vst [vmem:[#allocation75_spill] sm:$0xff] %v3172_v56  ;;  %1498 = vrot.lane.b32.xlu1 %v1249_v11, %s2409_s29 }
 0x138   : > { %1356 = vrot.lane.b32.xlu0 %v1247_v44, %s2406_s26 }
 0x139   : > { %v3176_v15 = vpop.permute.xlu1 %595 }
 0x13a   : > { %4215 = vst [vmem:[#allocation76_spill] sm:$0xff] %v3176_v15  ;;  %v3184_v26 = vpop.permute.xlu0 %593 }
 0x13b   : > { %4218 = vst [vmem:[#allocation79_spill] sm:$0xff] %v3184_v26  ;;  %637 = vrot.lane.b32.xlu1 %v2563_v45, %s2411_s4 }
 0x13c   : > { %1544 = vrot.lane.b32.xlu0 %v3179_v49, %s2410_s30 }
 0x13d   : > { %v3192_v44 = vpop.permute.xlu1 %599 }
 0x13e   : > { %4219 = vst [vmem:[#allocation80_spill] sm:$0xff] %v3192_v44  ;;  %v3194_v15 = vpop.permute.xlu0 %597 }
 0x13f   : > { %4220 = vst [vmem:[#allocation81_spill] sm:$0xff] %v3194_v15  ;;  %1404 = vrot.lane.b32.xlu1 %v3179_v49, %s2407_s27  ;;  %v2184_v15 = vld [vmem:[%s2449_s22 + $0x130] sm:$0x3] }
 0x140   : > { %1358 = vrot.lane.b32.xlu0 %v1249_v11, %s2406_s26  ;;  %v1250_v11 = vrot.slane %v3179_v49, 2  ;;  %v1213_v19 = vrot.slane %v2184_v15, 1 }
 0x141   : > { %v3200_v26 = vpop.permute.xlu1 %1296 }
 0x142   : > { %v3202_v45 = vpop.permute.xlu0 %601  ;;  %v1252_v30 = vsel %vm274_vm1, %v1250_v11, %v1251_v34 }
 0x143   : > { %4221 = vst [vmem:[#allocation82_spill] sm:$0xff] %v3202_v45  ;;  %1592 = vrot.lane.b32.xlu1 %v1212_v10, %s2411_s4 }
 0x144   : > { %1546 = vrot.lane.b32.xlu0 %v3182_v14, %s2410_s30 }
 0x145   : > { %v3207_v36 = vpop.permute.xlu1 %1344 }
 0x146   : > { %v3209_v44 = vpop.permute.xlu0 %1298 }
 0x147   : > { %685 = vrot.lane.b32.xlu1 %v2679_v32, %s2412_s16 }
 0x148   : > { %639 = vrot.lane.b32.xlu0 %v2558_v42, %s2411_s4  ;;  %v1214_v42 = vsel %vm233_vm0, %v1211_v51, %v1213_v19 }
 0x149   : > { %v3218_v45 = vpop.permute.xlu1 %1392 }
 0x14a   : > { %v3220_v22 = vpop.permute.xlu0 %1346 }
 0x14b   : > { %1452 = vrot.lane.b32.xlu1 %v1212_v10, %s2408_s28 }
 0x14c   : > { %1406 = vrot.lane.b32.xlu0 %v3182_v14, %s2407_s27  ;;  %v1253_v14 = vrot.slane %v2184_v15, 2 }
 0x14d   : > { %v3226_v32 = vpop.permute.xlu1 %1440 }
 0x14e   : > { %v3229_v63 = vpop.permute.xlu0 %1394  ;;  %v1254_v5 = vsel %vm274_vm1, %v1251_v34, %v1253_v14  ;;  %v726_v34 = vsel %vm725_vm3, %v2461_v3, %v2783_v55 }
 0x14f   : > { %1640 = vrot.lane.b32.xlu1 %v1252_v30, %s2412_s16 }
 0x150   : > { %1594 = vrot.lane.b32.xlu0 %v1214_v42, %s2411_s4 }
 0x151   : > { %v3233_v49 = vpop.permute.xlu1 %1442 }
 0x152   : > { %v3235_v31 = vpop.permute.xlu0 %1300 }
 0x153   : > { %1312 = vrot.lane.b32.xlu1 %v1212_v10, %s2405_s25 }
 0x154   : > { %687 = vrot.lane.b32.xlu0 %v2674_v46, %s2412_s16 }
 0x155   : > { %v3240_v11 = vpop.permute.xlu1 %1302 }
 0x156   : > { %v1489_v19 = vpop.permute.xlu0 %1488 }
 0x157   : > { %1500 = vrot.lane.b32.xlu1 %v1252_v30, %s2409_s29 }
 0x158   : > { %1454 = vrot.lane.b32.xlu0 %v1214_v42, %s2408_s28 }
 0x159   : > { %v3244_v51 = vpop.permute.xlu1 %1490 }
 0x15a   : > { %v3247_v56 = vpop.permute.xlu0 %1348 }
 0x15b   : > { %1314 = vrot.lane.b32.xlu1 %v1214_v42, %s2405_s25  ;;  %v1215_v42 = vrot.slane %v3256_v43, 1 }
 0x15c   : > { %1642 = vrot.lane.b32.xlu0 %v1254_v5, %s2412_s16 }
 0x15d   : > { %v630_v46 = vpop.permute.xlu1 %629 }
 0x15e   : > { %v1537_v10 = vpop.permute.xlu0 %1536 }
 0x15f   : > { %1502 = vrot.lane.b32.xlu1 %v1254_v5, %s2409_s29 }
 0x160   : > { %1360 = vrot.lane.b32.xlu0 %v1252_v30, %s2406_s26  ;;  %v743_v30 = vsel %vm742_vm4, %v726_v34, %v2859_v9 }
 0x161   : > { %v3253_v15 = vpop.permute.xlu1 %1396  ;;  %v760_v18 = vsel %vm759_vm5, %v743_v30, %v2932_v39  ;;  %v1217_v39 = vsel %vm233_vm0, %v1215_v42, %v1216_v62 }
 0x162   : > { %v3261_v14 = vpop.permute.xlu0 %1350  ;;  %v777_v55 = vsel %vm776_vm6, %v760_v18, %v3019_v28 }
 0x163   : > { %641 = vrot.lane.b32.xlu1 %v2585_v53, %s2411_s4  ;;  %v794_v9 = vsel %vm793_vm7, %v777_v55, %v3089_v47  ;;  %v1680_v47 = vsel %vm725_vm3, %v2754_v2, %v3200_v26  ;;  %v2187_v2 = vld [vmem:[%s2449_s22 + $0x148] sm:$0x3] }
 0x164   : > { %1548 = vrot.lane.b32.xlu0 %v3256_v43, %s2410_s30  ;;  %v811_v34 = vsel %vm810_vm8, %v794_v9, %v3159_v37 }
 0x165   : > { %v1585_v3 = vpop.permute.xlu1 %1584  ;;  %v828_v28 = vsel %vm827_vm9, %v811_v34, %v630_v46 }
 0x166   : > { %v1539_v53 = vpop.permute.xlu0 %1538 }
 0x167   : > { %1408 = vrot.lane.b32.xlu1 %v3256_v43, %s2407_s27 }
 0x168   : > { %1362 = vrot.lane.b32.xlu0 %v1254_v5, %s2406_s26  ;;  %v1696_v5 = vsel %vm742_vm4, %v1680_v47, %v3207_v36 }
 0x169   : > { %v678_v18 = vpop.permute.xlu1 %677  ;;  %v1712_v37 = vsel %vm759_vm5, %v1696_v5, %v3218_v45  ;;  %v1255_v45 = vrot.slane %v3256_v43, 2 }
 0x16a   : > { %v632_v30 = vpop.permute.xlu0 %631  ;;  %v845_v38 = vsel %vm844_vm10, %v828_v28, %v678_v18  ;;  %v1728_v42 = vsel %vm776_vm6, %v1712_v37, %v3226_v32  ;;  %v1256_v32 = vrot.slane %v3259_v57, 2 }
 0x16b   : > { %1596 = vrot.lane.b32.xlu1 %v1217_v39, %s2411_s4  ;;  %2288 = vmatprep.mubr.msk.f32.mxu0 %vm861_vm11, %v845_v38  ;;  %v1744_v26 = vsel %vm793_vm7, %v1728_v42, %v1489_v19  ;;  %v727_v38 = vsel %vm725_vm3, %v2466_v6, %v2795_v8 }
 0x16c   : > { %1550 = vrot.lane.b32.xlu0 %v3259_v57, %s2410_s30  ;;  %v1760_v36 = vsel %vm810_vm8, %v1744_v26, %v1537_v10  ;;  %v744_v9 = vsel %vm742_vm4, %v727_v38, %v2857_v7  ;;  %v1257_v10 = vsel %vm274_vm1, %v1255_v45, %v1256_v32  ;;  %v1258_v26 = vrot.slane %v2187_v2, 2  ;;  %v3378_v45 = vld [vmem:[%s2449_s22 + $0x150] sm:$0xff] }
 0x16d   : > { %v3299_v46 = vpop.permute.xlu1 %1444  ;;  %v1776_v19 = vsel %vm827_vm9, %v1760_v36, %v1585_v3  ;;  %v761_v28 = vsel %vm759_vm5, %v744_v9, %v2930_v33  ;;  %v3381_v9 = vld [vmem:[%s2449_s22 + $0x158] sm:$0xff] }
 0x16e   : > { %v3303_v55 = vpop.permute.xlu0 %1398 }
 0x16f   : > { %689 = vrot.lane.b32.xlu1 %v2692_v40, %s2412_s16  ;;  %v1218_v40 = vrot.slane %v2187_v2, 1 }
 0x170   : > { %643 = vrot.lane.b32.xlu0 %v2580_v50, %s2411_s4  ;;  %v778_v50 = vsel %vm776_vm6, %v761_v28, %v3017_v60  ;;  %v1220_v28 = vrot.slane %v3378_v45, 1 }
 0x171   : > { %v1633_v34 = vpop.permute.xlu1 %1632  ;;  %v795_v7 = vsel %vm793_vm7, %v778_v50, %v3087_v27  ;;  %v1219_v18 = vsel %vm233_vm0, %v1216_v62, %v1218_v40  ;;  %v1681_v27 = vsel %vm725_vm3, %v2751_v1, %v3209_v44 }
 0x172   : > { %v1587_v6 = vpop.permute.xlu0 %1586  ;;  %v1792_v8 = vsel %vm844_vm10, %v1776_v19, %v1633_v34  ;;  %v812_v33 = vsel %vm810_vm8, %v795_v7, %v3157_v52  ;;  %v1697_v52 = vsel %vm742_vm4, %v1681_v27, %v3220_v22 }
 0x173   : > { %1456 = vrot.lane.b32.xlu1 %v1217_v39, %s2408_s28  ;;  %2322 = vmatprep.mubr.msk.f32.mxu1 %vm861_vm11, %v1792_v8  ;;  %v829_v60 = vsel %vm827_vm9, %v812_v33, %v632_v30  ;;  %v1713_v62 = vsel %vm759_vm5, %v1697_v52, %v3229_v63 }
 0x174   : > { %1410 = vrot.lane.b32.xlu0 %v3259_v57, %s2407_s27  ;;  %v1729_v42 = vsel %vm776_vm6, %v1713_v62, %v3233_v49 }
 0x175   : > { %v3334_v3 = vpop.permute.xlu1 %1304  ;;  %v1745_v1 = vsel %vm793_vm7, %v1729_v42, %v3244_v51  ;;  %v1259_v51 = vsel %vm274_vm1, %v1256_v32, %v1258_v26  ;;  %v2380_v32 = vld [vmem:[%s2449_s22 + $0x18] sm:$0xff] }
 0x176   : > { %v680_v47 = vpop.permute.xlu0 %679  ;;  %v1761_v44 = vsel %vm810_vm8, %v1745_v1, %v1539_v53  ;;  %v728_v34 = vsel %vm725_vm3, %v2380_v32, %v2780_v13 }
 0x177   : > { %v846_v5 = vsel %vm844_vm10, %v829_v60, %v680_v47  ;;  %1644 = vrot.lane.b32.xlu1 %v1257_v10, %s2412_s16  ;;  %v1777_v63 = vsel %vm827_vm9, %v1761_v44, %v1587_v6  ;;  %v745_v40 = vsel %vm742_vm4, %v728_v34, %v2869_v0  ;;  %v1221_v6 = vrot.slane %v3381_v9, 1 }
 0x178   : > { %1598 = vrot.lane.b32.xlu0 %v1219_v18, %s2411_s4  ;;  %2289 = vmatmul.mubr.msk.f32.vlgmr.msra.gmra.mrb[0].mxu0 %vm861_vm11, %v846_v5  ;;  %v762_v8 = vsel %vm759_vm5, %v745_v40, %v2948_v16 }
 0x179   : > { %v1493_v37 = vpop.permute.xlu1 %1492  ;;  %v779_v13 = vsel %vm776_vm6, %v762_v8, %v3033_v35 }
 0x17a   : > { %v3349_v30 = vpop.permute.xlu0 %1446 }
 0x17b   : > { %1316 = vrot.lane.b32.xlu1 %v1217_v39, %s2405_s25 }
 0x17c   : > { %691 = vrot.lane.b32.xlu0 %v2687_v59, %s2412_s16 }
 0x17d   : > { %v3359_v22 = vpop.permute.xlu1 %1306 }
 0x17e   : > { %v1635_v38 = vpop.permute.xlu0 %1634 }
 0x17f   : > { %v1793_v49 = vsel %vm844_vm10, %v1777_v63, %v1635_v38  ;;  %1504 = vrot.lane.b32.xlu1 %v1257_v10, %s2409_s29 }
 0x180   : > { %1458 = vrot.lane.b32.xlu0 %v1219_v18, %s2408_s28  ;;  %2323 = vmatmul.mubr.msk.f32.vlgmr.msra.gmra.mrb[0].mxu1 %vm861_vm11, %v1793_v49 }
 0x181   : > { %v3366_v59 = vpop.permute.xlu1 %1494 }
 0x182   : > { %v3369_v53 = vpop.permute.xlu0 %1352 }
 0x183   : > { %1318 = vrot.lane.b32.xlu1 %v1219_v18, %s2405_s25 }
 0x184   : > { %1646 = vrot.lane.b32.xlu0 %v1259_v51, %s2412_s16 }
 0x185   : > { %v634_v39 = vpop.permute.xlu1 %633 }
 0x186   : > { %v1541_v2 = vpop.permute.xlu0 %1540 }
 0x187   : > { %1506 = vrot.lane.b32.xlu1 %v1259_v51, %s2409_s29 }
 0x188   : > { %1364 = vrot.lane.b32.xlu0 %v1257_v10, %s2406_s26  ;;  %v1222_v10 = vsel %vm233_vm0, %v1220_v28, %v1221_v6 }
 0x189   : > { %v3375_v36 = vpop.permute.xlu1 %1400 }
 0x18a   : > { %v3383_v19 = vpop.permute.xlu0 %1354 }
 0x18b   : > { %645 = vrot.lane.b32.xlu1 %v2607_v61, %s2411_s4  ;;  %v796_v61 = vsel %vm793_vm7, %v779_v13, %v3101_v29  ;;  %v1682_v29 = vsel %vm725_vm3, %v2943_v23, %v3235_v31  ;;  %v2190_v23 = vld [vmem:[%s2449_s22 + $0x160] sm:$0x3] }
 0x18c   : > { %1552 = vrot.lane.b32.xlu0 %v3378_v45, %s2410_s30  ;;  %v813_v0 = vsel %vm810_vm8, %v796_v61, %v3166_v54  ;;  %v1698_v54 = vsel %vm742_vm4, %v1682_v29, %v3247_v56  ;;  %v2381_v56 = vld [vmem:[%s2449_s22 + $0x20] sm:$0xff]  ;;  %v1263_v28 = vrot.slane %v2190_v23, 2  ;;  %v3500_v61 = vld [vmem:[%s2449_s22 + $0x168] sm:$0xff] }
 0x18d   : > { %v1589_v50 = vpop.permute.xlu1 %1588  ;;  %v830_v16 = vsel %vm827_vm9, %v813_v0, %v634_v39  ;;  %v1714_v60 = vsel %vm759_vm5, %v1698_v54, %v3253_v15  ;;  %v729_v52 = vsel %vm725_vm3, %v2381_v56, %v2792_v20  ;;  %v1260_v15 = vrot.slane %v3378_v45, 2  ;;  %v4224_v54 = vld [vmem:[#allocation35_spill] sm:$0xff] }
 0x18e   : > { %v1543_v7 = vpop.permute.xlu0 %1542  ;;  %v1730_v5 = vsel %vm776_vm6, %v1714_v60, %v3299_v46  ;;  %v1261_v46 = vrot.slane %v3381_v9, 2  ;;  %v746_v42 = vsel %vm742_vm4, %v729_v52, %v2866_v21  ;;  %v3523_v52 = vld [vmem:[%s2449_s22 + $0x170] sm:$0xff] }
 0x18f   : > { %1412 = vrot.lane.b32.xlu1 %v3378_v45, %s2407_s27  ;;  %v1746_v31 = vsel %vm793_vm7, %v1730_v5, %v1493_v37  ;;  %v763_v44 = vsel %vm759_vm5, %v746_v42, %v2938_v41 }
 0x190   : > { %1366 = vrot.lane.b32.xlu0 %v1259_v51, %s2406_s26  ;;  %v1762_v62 = vsel %vm810_vm8, %v1746_v31, %v1541_v2  ;;  %v1262_v63 = vsel %vm274_vm1, %v1260_v15, %v1261_v46 }
 0x191   : > { %v682_v33 = vpop.permute.xlu1 %681  ;;  %v1778_v37 = vsel %vm827_vm9, %v1762_v62, %v1589_v50  ;;  %v4226_v62 = vld [vmem:[#allocation63_spill] sm:$0xff] }
 0x192   : > { %v847_v35 = vsel %vm844_vm10, %v830_v16, %v682_v33  ;;  %v636_v18 = vpop.permute.xlu0 %635  ;;  %v4222_v16 = vld [vmem:[#allocation9_spill] sm:$0xff] }
 0x193   : > { %1600 = vrot.lane.b32.xlu1 %v1222_v10, %s2411_s4  ;;  %2291 = vmatprep.mubr.msk.f32.mxu0 %vm861_vm11, %v847_v35  ;;  %v3508_v35 = vld [vmem:[%s2449_s22 + $0xb0] sm:$0xff] }
 0x194   : > { %1554 = vrot.lane.b32.xlu0 %v3381_v9, %s2410_s30 }
 0x195   : > { %v3421_v47 = vpop.permute.xlu1 %1448 }
 0x196   : > { %v3425_v27 = vpop.permute.xlu0 %1402 }
 0x197   : > { %693 = vrot.lane.b32.xlu1 %v2705_v48, %s2412_s16  ;;  %v1223_v48 = vrot.slane %v2190_v23, 1  ;;  %v4225_v23 = vld [vmem:[#allocation49_spill] sm:$0xff] }
 0x198   : > { %647 = vrot.lane.b32.xlu0 %v2602_v58, %s2411_s4  ;;  %v780_v58 = vsel %vm776_vm6, %v763_v44, %v3031_v17  ;;  %v1225_v44 = vrot.slane %v3500_v61, 1 }
 0x199   : > { %v1637_v1 = vpop.permute.xlu1 %1636  ;;  %v797_v21 = vsel %vm793_vm7, %v780_v58, %v3093_v12  ;;  %v1224_v49 = vsel %vm233_vm0, %v1221_v6, %v1223_v48  ;;  %v1683_v12 = vsel %vm725_vm3, %v2946_v25, %v3240_v11 }
 0x19a   : > { %v1794_v20 = vsel %vm844_vm10, %v1778_v37, %v1637_v1  ;;  %v1591_v26 = vpop.permute.xlu0 %1590  ;;  %v814_v41 = vsel %vm810_vm8, %v797_v21, %v3163_v24  ;;  %v1699_v24 = vsel %vm742_vm4, %v1683_v12, %v3261_v14  ;;  %v4228_v37 = vld [vmem:[#allocation3_spill] sm:$0xff]  ;;  %v4229_v21 = vld [vmem:[#allocation45_spill] sm:$0xff] }
 0x19b   : > { %1460 = vrot.lane.b32.xlu1 %v1222_v10, %s2408_s28  ;;  %2325 = vmatprep.mubr.msk.f32.mxu1 %vm861_vm11, %v1794_v20  ;;  %v831_v17 = vsel %vm827_vm9, %v814_v41, %v636_v18  ;;  %v1715_v32 = vsel %vm759_vm5, %v1699_v24, %v3303_v55  ;;  %v4223_v18 = vld [vmem:[#allocation23_spill] sm:$0xff]  ;;  %v1226_v20 = vrot.slane %v3523_v52, 1 }
 0x19c   : > { %1414 = vrot.lane.b32.xlu0 %v3381_v9, %s2407_s27  ;;  %v1731_v40 = vsel %vm776_vm6, %v1715_v32, %v3349_v30  ;;  %v1264_v30 = vsel %vm274_vm1, %v1261_v46, %v1263_v28  ;;  %v4227_v46 = vld [vmem:[#allocation75_spill] sm:$0xff]  ;;  %v2384_v32 = vld [vmem:[%s2449_s22 + $0x38] sm:$0xff] }
 0x19d   : > { %v3456_v38 = vpop.permute.xlu1 %1308  ;;  %v1747_v25 = vsel %vm793_vm7, %v1731_v40, %v3366_v59  ;;  %v4231_v40 = vld [vmem:[#allocation7_spill] sm:$0xff]  ;;  %v4232_v28 = vld [vmem:[#allocation21_spill] sm:$0xff] }
 0x19e   : > { %v684_v51 = vpop.permute.xlu0 %683  ;;  %v1763_v11 = vsel %vm810_vm8, %v1747_v25, %v1543_v7  ;;  %v731_v25 = vsel %vm725_vm3, %v2384_v32, %v4231_v40  ;;  %v2386_v40 = vld [vmem:[%s2449_s22 + $0x48] sm:$0xff] }
 0x19f   : > { %v848_v39 = vsel %vm844_vm10, %v831_v17, %v684_v51  ;;  %1648 = vrot.lane.b32.xlu1 %v1262_v63, %s2412_s16  ;;  %v1779_v55 = vsel %vm827_vm9, %v1763_v11, %v1591_v26  ;;  %v1227_v51 = vsel %vm233_vm0, %v1225_v44, %v1226_v20 }
 0x1a0   : > { %1602 = vrot.lane.b32.xlu0 %v1224_v49, %s2411_s4  ;;  %2292 = vmatmul.mubr.msk.f32.gmra.mrb[2].mxu0 %vm861_vm11, %v848_v39  ;;  %v2193_v39 = vld [vmem:[%s2449_s22 + $0x178] sm:$0x3] }
 0x1a1   : > { %v1497_v2 = vpop.permute.xlu1 %1496  ;;  %v1228_v11 = vrot.slane %v2193_v39, 1 }
 0x1a2   : > { %v3471_v34 = vpop.permute.xlu0 %1450 }
 0x1a3   : > { %1320 = vrot.lane.b32.xlu1 %v1222_v10, %s2405_s25  ;;  %v2382_v10 = vld [vmem:[%s2449_s22 + $0x30] sm:$0xff] }
 0x1a4   : > { %695 = vrot.lane.b32.xlu0 %v2700_v4, %s2412_s16  ;;  %v730_v33 = vsel %vm725_vm3, %v2382_v10, %v4222_v16  ;;  %v4234_v10 = vld [vmem:[#allocation48_spill] sm:$0xff] }
 0x1a5   : > { %v3481_v14 = vpop.permute.xlu1 %1310  ;;  %v747_v29 = vsel %vm742_vm4, %v730_v33, %v4223_v18  ;;  %v4236_v18 = vld [vmem:[#allocation5_spill] sm:$0xff] }
 0x1a6   : > { %v1639_v6 = vpop.permute.xlu0 %1638  ;;  %v764_v60 = vsel %vm759_vm5, %v747_v29, %v4224_v54  ;;  %v1229_v29 = vsel %vm233_vm0, %v1226_v20, %v1228_v11  ;;  %v4237_v54 = vld [vmem:[#allocation74_spill] sm:$0xff]  ;;  %v4241_v11 = vld [vmem:[#allocation25_spill] sm:$0xff] }
 0x1a7   : > { %v1795_v8 = vsel %vm844_vm10, %v1779_v55, %v1639_v6  ;;  %1508 = vrot.lane.b32.xlu1 %v1262_v63, %s2409_s29  ;;  %v781_v31 = vsel %vm776_vm6, %v764_v60, %v4225_v23  ;;  %v748_v55 = vsel %vm742_vm4, %v731_v25, %v4232_v28  ;;  %v1265_v23 = vrot.slane %v3500_v61, 2  ;;  %v4240_v25 = vld [vmem:[#allocation11_spill] sm:$0xff] }
 0x1a8   : > { %1462 = vrot.lane.b32.xlu0 %v1224_v49, %s2408_s28  ;;  %2326 = vmatmul.mubr.msk.f32.gmra.mrb[2].mxu1 %vm861_vm11, %v1795_v8  ;;  %v798_v15 = vsel %vm793_vm7, %v781_v31, %v4226_v62  ;;  %v4233_v8 = vld [vmem:[#allocation34_spill] sm:$0xff]  ;;  %v1266_v31 = vrot.slane %v3523_v52, 2 }
 0x1a9   : > { %v3488_v4 = vpop.permute.xlu1 %1498  ;;  %v815_v42 = vsel %vm810_vm8, %v798_v15, %v4227_v46 }
 0x1aa   : > { %v3491_v59 = vpop.permute.xlu0 %1356  ;;  %v1267_v44 = vsel %vm274_vm1, %v1265_v23, %v1266_v31 }
 0x1ab   : > { %1322 = vrot.lane.b32.xlu1 %v1224_v49, %s2405_s25 }
 0x1ac   : > { %1650 = vrot.lane.b32.xlu0 %v1264_v30, %s2412_s16 }
 0x1ad   : > { %v638_v50 = vpop.permute.xlu1 %637 }
 0x1ae   : > { %v1545_v13 = vpop.permute.xlu0 %1544  ;;  %v832_v1 = vsel %vm827_vm9, %v815_v42, %v638_v50  ;;  %v4238_v42 = vld [vmem:[#allocation46_spill] sm:$0xff] }
 0x1af   : > { %1510 = vrot.lane.b32.xlu1 %v1264_v30, %s2409_s29 }
 0x1b0   : > { %1368 = vrot.lane.b32.xlu0 %v1262_v63, %s2406_s26  ;;  %v1684_v63 = vsel %vm725_vm3, %v4229_v21, %v3334_v3 }
 0x1b1   : > { %v3497_v7 = vpop.permute.xlu1 %1404  ;;  %v1700_v41 = vsel %vm742_vm4, %v1684_v63, %v3369_v53  ;;  %v4230_v53 = vld [vmem:[#allocation2_spill] sm:$0xff] }
 0x1b2   : > { %v3502_v0 = vpop.permute.xlu0 %1358  ;;  %v1716_v49 = vsel %vm759_vm5, %v1700_v41, %v3375_v36 }
 0x1b3   : > { %603 = vrot.lane.b32.xlu1 %v3508_v35, %s2410_s30  ;;  %v1732_v3 = vsel %vm776_vm6, %v1716_v49, %v3421_v47 }
 0x1b4   : > { %1556 = vrot.lane.b32.xlu0 %v3500_v61, %s2410_s30  ;;  %v1748_v24 = vsel %vm793_vm7, %v1732_v3, %v1497_v2  ;;  %v765_v2 = vsel %vm759_vm5, %v748_v55, %v4233_v8  ;;  %v4242_v55 = vld [vmem:[#allocation37_spill] sm:$0xff]  ;;  %v3641_v8 = vld [vmem:[%s2449_s22 + $0x180] sm:$0xff] }
 0x1b5   : > { %v1593_v5 = vpop.permute.xlu1 %1592  ;;  %v1764_v36 = vsel %vm810_vm8, %v1748_v24, %v1545_v13  ;;  %v782_v16 = vsel %vm776_vm6, %v765_v2, %v4234_v10  ;;  %v4235_v13 = vld [vmem:[#allocation62_spill] sm:$0xff]  ;;  %v4243_v2 = vld [vmem:[#allocation51_spill] sm:$0xff]  ;;  %v4244_v10 = vld [vmem:[#allocation65_spill] sm:$0xff] }
 0x1b6   : > { %v3520_v56 = vpop.permute.xlu0 %1546  ;;  %v1780_v47 = vsel %vm827_vm9, %v1764_v36, %v1593_v5  ;;  %v799_v33 = vsel %vm793_vm7, %v782_v16, %v4235_v13  ;;  %v732_v36 = vsel %vm725_vm3, %v2386_v40, %v4240_v25  ;;  %v2387_v13 = vld [vmem:[%s2449_s22 + $0xc8] sm:$0xff]  ;;  %v4251_v25 = vld [vmem:[#allocation50_spill] sm:$0xff] }
 0x1b7   : > { %1370 = vrot.lane.b32.xlu1 %v1264_v30, %s2406_s26  ;;  %v816_v60 = vsel %vm810_vm8, %v799_v33, %v4237_v54  ;;  %v749_v28 = vsel %vm742_vm4, %v732_v36, %v4241_v11  ;;  %v4245_v33 = vld [vmem:[#allocation79_spill] sm:$0xff]  ;;  %v4252_v36 = vld [vmem:[#allocation6_spill] sm:$0xff]  ;;  %v4253_v11 = vld [vmem:[#allocation64_spill] sm:$0xff] }
 0x1b8   : > { %649 = vrot.lane.b32.xlu0 %v4228_v37, %s2411_s4  ;;  %v1685_v37 = vsel %vm725_vm3, %v4238_v42, %v3359_v22  ;;  %v4239_v22 = vld [vmem:[#allocation4_spill] sm:$0xff] }
 0x1b9   : > { %v686_v48 = vpop.permute.xlu1 %685  ;;  %v4247_v42 = vld [vmem:[#allocation8_spill] sm:$0xff] }
 0x1ba   : > { %v849_v26 = vsel %vm844_vm10, %v832_v1, %v686_v48  ;;  %v640_v58 = vpop.permute.xlu0 %639  ;;  %v1701_v1 = vsel %vm742_vm4, %v1685_v37, %v3383_v19  ;;  %v1268_v19 = vrot.slane %v2193_v39, 2 }
 0x1bb   : > { %1558 = vrot.lane.b32.xlu1 %v3523_v52, %s2410_s30  ;;  %2294 = vmatprep.mubr.msk.f32.mxu0 %vm861_vm11, %v849_v26  ;;  %v833_v62 = vsel %vm827_vm9, %v816_v60, %v640_v58  ;;  %v1717_v20 = vsel %vm759_vm5, %v1701_v1, %v3425_v27  ;;  %v1273_v1 = vrot.slane %v3641_v8, 1 }
 0x1bc   : > { %1416 = vrot.lane.b32.xlu0 %v3500_v61, %s2407_s27  ;;  %v1733_v58 = vsel %vm776_vm6, %v1717_v20, %v3471_v34 }
 0x1bd   : > { %v3548_v17 = vpop.permute.xlu1 %1452  ;;  %v1749_v21 = vsel %vm793_vm7, %v1733_v58, %v3488_v4  ;;  %v1269_v4 = vsel %vm274_vm1, %v1266_v31, %v1268_v19  ;;  %v3658_v31 = vld [vmem:[%s2449_s22 + $0x188] sm:$0xff] }
 0x1be   : > { %v3554_v12 = vpop.permute.xlu0 %1406  ;;  %v1765_v63 = vsel %vm810_vm8, %v1749_v21, %v3520_v56  ;;  %v4248_v21 = vld [vmem:[#allocation10_spill] sm:$0xff] }
 0x1bf   : > { %651 = vrot.lane.b32.xlu1 %v4230_v53, %s2411_s4  ;;  %v2385_v53 = vld [vmem:[%s2449_s22 + $0xc0] sm:$0xff] }
 0x1c0   : > { %1604 = vrot.lane.b32.xlu0 %v1227_v51, %s2411_s4 }
 0x1c1   : > { %v1641_v6 = vpop.permute.xlu1 %1640 }
 0x1c2   : > { %v1796_v30 = vsel %vm844_vm10, %v1780_v47, %v1641_v6  ;;  %v1595_v50 = vpop.permute.xlu0 %1594  ;;  %v766_v47 = vsel %vm759_vm5, %v749_v28, %v4242_v55 }
 0x1c3   : > { %1418 = vrot.lane.b32.xlu1 %v3523_v52, %s2407_s27  ;;  %2328 = vmatprep.mubr.msk.f32.mxu1 %vm861_vm11, %v1796_v30  ;;  %v1781_v27 = vsel %vm827_vm9, %v1765_v63, %v1595_v50  ;;  %v783_v30 = vsel %vm776_vm6, %v766_v47, %v4243_v2  ;;  %v4249_v63 = vld [vmem:[#allocation24_spill] sm:$0xff] }
 0x1c4   : > { %697 = vrot.lane.b32.xlu0 %v4236_v18, %s2412_s16  ;;  %v800_v16 = vsel %vm793_vm7, %v783_v30, %v4244_v10  ;;  %v4254_v47 = vld [vmem:[#allocation76_spill] sm:$0xff] }
 0x1c5   : > { %v3582_v5 = vpop.permute.xlu1 %1312  ;;  %v817_v18 = vsel %vm810_vm8, %v800_v16, %v4245_v33 }
 0x1c6   : > { %v688_v15 = vpop.permute.xlu0 %687 }
 0x1c7   : > { %v850_v46 = vsel %vm844_vm10, %v833_v62, %v688_v15  ;;  %1606 = vrot.lane.b32.xlu1 %v1229_v29, %s2411_s4  ;;  %v4246_v62 = vld [vmem:[#allocation60_spill] sm:$0xff] }
 0x1c8   : > { %1464 = vrot.lane.b32.xlu0 %v1227_v51, %s2408_s28  ;;  %2295 = vmatmul.mubr.msk.f32.gmra.mrb[4].mxu0 %vm861_vm11, %v850_v46  ;;  %v1686_v15 = vsel %vm725_vm3, %v4246_v62, %v3456_v38  ;;  %v1274_v38 = vrot.slane %v3658_v31, 1 }
 0x1c9   : > { %v1501_v48 = vpop.permute.xlu1 %1500  ;;  %v1702_v46 = vsel %vm742_vm4, %v1686_v15, %v3491_v59 }
 0x1ca   : > { %v3599_v26 = vpop.permute.xlu0 %1454  ;;  %v1718_v37 = vsel %vm759_vm5, %v1702_v46, %v3497_v7 }
 0x1cb   : > { %699 = vrot.lane.b32.xlu1 %v4239_v22, %s2412_s16  ;;  %v1734_v20 = vsel %vm776_vm6, %v1718_v37, %v3548_v17  ;;  %v2388_v22 = vld [vmem:[%s2449_s22 + $0x50] sm:$0xff] }
 0x1cc   : > { %1652 = vrot.lane.b32.xlu0 %v1267_v44, %s2412_s16  ;;  %v1750_v59 = vsel %vm793_vm7, %v1734_v20, %v1501_v48  ;;  %v733_v7 = vsel %vm725_vm3, %v2388_v22, %v4248_v21  ;;  %v1275_v48 = vsel %vm233_vm0, %v1273_v1, %v1274_v38  ;;  %v4257_v1 = vld [vmem:[#allocation20_spill] sm:$0xff]  ;;  %v206_v20 = vld [vmem:[%s2449_s22 + $0xd8] sm:$0xff]  ;;  %v3755_v21 = vld [vmem:[%s2449_s22 + $0xe0] sm:$0xff] }
 0x1cd   : > { %v3610_v41 = vpop.permute.xlu1 %1314 }
 0x1ce   : > { %v1643_v49 = vpop.permute.xlu0 %1642 }
 0x1cf   : > { %v1797_v34 = vsel %vm844_vm10, %v1781_v27, %v1643_v49  ;;  %1466 = vrot.lane.b32.xlu1 %v1229_v29, %s2408_s28  ;;  %v750_v27 = vsel %vm742_vm4, %v733_v7, %v4249_v63  ;;  %v2197_v63 = vld [vmem:[%s2449_s22 + $0x198] sm:$0xff] }
 0x1d0   : > { %1324 = vrot.lane.b32.xlu0 %v1227_v51, %s2405_s25  ;;  %2329 = vmatmul.mubr.msk.f32.gmra.mrb[4].mxu1 %vm861_vm11, %v1797_v34  ;;  %v2196_v34 = vld [vmem:[%s2449_s22 + $0x190] sm:$0x3] }
 0x1d1   : > { %v3618_v39 = vpop.permute.xlu1 %1502  ;;  %v1276_v55 = vrot.slane %v2196_v34, 1 }
 0x1d2   : > { %v3620_v56 = vpop.permute.xlu0 %1360 }
 0x1d3   : > { %1654 = vrot.lane.b32.xlu1 %v1269_v4, %s2412_s16 }
 0x1d4   : > { %1512 = vrot.lane.b32.xlu0 %v1267_v44, %s2409_s29 }
 0x1d5   : > { %v642_v3 = vpop.permute.xlu1 %641 }
 0x1d6   : > { %v1549_v24 = vpop.permute.xlu0 %1548 }
 0x1d7   : > { %1326 = vrot.lane.b32.xlu1 %v1229_v29, %s2405_s25  ;;  %v834_v29 = vsel %vm827_vm9, %v817_v18, %v642_v3  ;;  %v1766_v19 = vsel %vm810_vm8, %v1750_v59, %v1549_v24  ;;  %v4256_v18 = vld [vmem:[#allocation22_spill] sm:$0xff] }
 0x1d8   : > { %605 = vrot.lane.b32.xlu0 %v2385_v53, %s2410_s30 }
 0x1d9   : > { %v3627_v51 = vpop.permute.xlu1 %1408 }
 0x1da   : > { %v3629_v32 = vpop.permute.xlu0 %1362 }
 0x1db   : > { %1514 = vrot.lane.b32.xlu1 %v1269_v4, %s2409_s29 }
 0x1dc   : > { %1372 = vrot.lane.b32.xlu0 %v1267_v44, %s2406_s26 }
 0x1dd   : > { %v1597_v6 = vpop.permute.xlu1 %1596 }
 0x1de   : > { %v3645_v50 = vpop.permute.xlu0 %1550  ;;  %v1782_v17 = vsel %vm827_vm9, %v1766_v19, %v1597_v6  ;;  %v331_v19 = vrot.slane %v206_v20, 1 }
 0x1df   : > { %607 = vrot.lane.b32.xlu1 %v2387_v13, %s2410_s30  ;;  %v4255_v13 = vld [vmem:[#allocation61_spill] sm:$0xff] }
 0x1e0   : > { %1560 = vrot.lane.b32.xlu0 %v3641_v8, %s2410_s30  ;;  %v1687_v33 = vsel %vm725_vm3, %v4255_v13, %v3481_v14 }
 0x1e1   : > { %v690_v54 = vpop.permute.xlu1 %689 }
 0x1e2   : > { %v851_v60 = vsel %vm844_vm10, %v834_v29, %v690_v54  ;;  %v644_v23 = vpop.permute.xlu0 %643  ;;  %v1277_v29 = vsel %vm233_vm0, %v1274_v38, %v1276_v55  ;;  %v1703_v54 = vsel %vm742_vm4, %v1687_v33, %v3502_v0  ;;  %v4263_v33 = vld [vmem:[#allocation81_spill] sm:$0xff] }
 0x1e3   : > { %1374 = vrot.lane.b32.xlu1 %v1269_v4, %s2406_s26  ;;  %2297 = vmatprep.mubr.msk.f32.mxu0 %vm861_vm11, %v851_v60  ;;  %v4250_v4 = vld [vmem:[#allocation36_spill] sm:$0xff]  ;;  %v1278_v60 = vrot.slane %v3641_v8, 2  ;;  %v1719_v15 = vsel %vm759_vm5, %v1703_v54, %v3554_v12 }
 0x1e4   : > { %653 = vrot.lane.b32.xlu0 %v4247_v42, %s2411_s4  ;;  %v767_v3 = vsel %vm759_vm5, %v750_v27, %v4250_v4  ;;  %v1735_v46 = vsel %vm776_vm6, %v1719_v15, %v3599_v26  ;;  %v332_v27 = vrot.slane %v3755_v21, 1  ;;  %v4258_v4 = vld [vmem:[#allocation13_spill] sm:$0xff] }
 0x1e5   : > { %v3672_v44 = vpop.permute.xlu1 %1456  ;;  %v784_v24 = vsel %vm776_vm6, %v767_v3, %v4251_v25  ;;  %v1751_v42 = vsel %vm793_vm7, %v1735_v46, %v3618_v39  ;;  %v1286_v25 = vrot.slane %v2197_v63, 1 }
 0x1e6   : > { %v3677_v58 = vpop.permute.xlu0 %1410  ;;  %v801_v28 = vsel %vm793_vm7, %v784_v24, %v4253_v11  ;;  %v1767_v0 = vsel %vm810_vm8, %v1751_v42, %v3645_v50  ;;  %v1281_v50 = vrot.slane %v2196_v34, 2  ;;  %v2389_v34 = vld [vmem:[%s2449_s22 + $0x60] sm:$0xff]  ;;  %v333_v24 = vsel %vm233_vm0, %v331_v19, %v332_v27  ;;  %v4260_v11 = vld [vmem:[#allocation39_spill] sm:$0xff] }
 0x1e7   : > { %1562 = vrot.lane.b32.xlu1 %v3658_v31, %s2410_s30  ;;  %v818_v6 = vsel %vm810_vm8, %v801_v28, %v4254_v47  ;;  %v734_v3 = vsel %vm725_vm3, %v2389_v34, %v4258_v4  ;;  %v4261_v47 = vld [vmem:[#allocation53_spill] sm:$0xff]  ;;  %v2390_v34 = vld [vmem:[%s2449_s22 + $0x68] sm:$0xff] }
 0x1e8   : > { %1420 = vrot.lane.b32.xlu0 %v3641_v8, %s2407_s27  ;;  %v835_v30 = vsel %vm827_vm9, %v818_v6, %v644_v23  ;;  %v1279_v23 = vrot.slane %v3658_v31, 2 }
 0x1e9   : > { %v1645_v49 = vpop.permute.xlu1 %1644 }
 0x1ea   : > { %v1798_v53 = vsel %vm844_vm10, %v1782_v17, %v1645_v49  ;;  %v1599_v40 = vpop.permute.xlu0 %1598  ;;  %v1280_v12 = vsel %vm274_vm1, %v1278_v60, %v1279_v23  ;;  %v1282_v22 = vsel %vm274_vm1, %v1279_v23, %v1281_v50  ;;  %v3764_v49 = vld [vmem:[%s2449_s22 + $0x1a0] sm:$0xff]  ;;  %v337_v60 = vrot.slane %v3755_v21, 2 }
 0x1eb   : > { %655 = vrot.lane.b32.xlu1 %v4252_v36, %s2411_s4  ;;  %2331 = vmatprep.mubr.msk.f32.mxu1 %vm861_vm11, %v1798_v53  ;;  %v4259_v53 = vld [vmem:[#allocation27_spill] sm:$0xff]  ;;  %v1287_v36 = vrot.slane %v3764_v49, 1 }
 0x1ec   : > { %1608 = vrot.lane.b32.xlu0 %v1275_v48, %s2411_s4 }
 0x1ed   : > { %v3706_v2 = vpop.permute.xlu1 %1316  ;;  %v1288_v54 = vsel %vm233_vm0, %v1286_v25, %v1287_v36 }
 0x1ee   : > { %v692_v10 = vpop.permute.xlu0 %691 }
 0x1ef   : > { %v852_v16 = vsel %vm844_vm10, %v835_v30, %v692_v10  ;;  %1422 = vrot.lane.b32.xlu1 %v3658_v31, %s2407_s27  ;;  %v1783_v31 = vsel %vm827_vm9, %v1767_v0, %v1599_v40  ;;  %v751_v40 = vsel %vm742_vm4, %v734_v3, %v4259_v53  ;;  %v208_v10 = vld [vmem:[%s2449_s22 + $0xe8] sm:$0x3]  ;;  %v4266_v53 = vld [vmem:[#allocation26_spill] sm:$0xff] }
 0x1f0   : > { %701 = vrot.lane.b32.xlu0 %v4256_v18, %s2412_s16  ;;  %2298 = vmatmul.mubr.msk.f32.gmra.mrb[6].mxu0 %vm861_vm11, %v852_v16  ;;  %v768_v28 = vsel %vm759_vm5, %v751_v40, %v4260_v11  ;;  %v4262_v16 = vld [vmem:[#allocation67_spill] sm:$0xff]  ;;  %v334_v46 = vrot.slane %v208_v10, 1  ;;  %v4267_v11 = vld [vmem:[#allocation38_spill] sm:$0xff] }
 0x1f1   : > { %v3723_v62 = vpop.permute.xlu1 %1504  ;;  %v785_v6 = vsel %vm776_vm6, %v768_v28, %v4261_v47 }
 0x1f2   : > { %v3727_v14 = vpop.permute.xlu0 %1458  ;;  %v802_v13 = vsel %vm793_vm7, %v785_v6, %v4262_v16  ;;  %v4268_v6 = vld [vmem:[#allocation52_spill] sm:$0xff] }
 0x1f3   : > { %1610 = vrot.lane.b32.xlu1 %v1277_v29, %s2411_s4  ;;  %v819_v18 = vsel %vm810_vm8, %v802_v13, %v4263_v33  ;;  %v4269_v13 = vld [vmem:[#allocation66_spill] sm:$0xff] }
 0x1f4   : > { %1468 = vrot.lane.b32.xlu0 %v1275_v48, %s2408_s28 }
 0x1f5   : > { %v3737_v8 = vpop.permute.xlu1 %1318 }
 0x1f6   : > { %v1647_v37 = vpop.permute.xlu0 %1646 }
 0x1f7   : > { %v1799_v26 = vsel %vm844_vm10, %v1783_v31, %v1647_v37  ;;  %703 = vrot.lane.b32.xlu1 %v4257_v1, %s2412_s16  ;;  %v4264_v31 = vld [vmem:[#allocation77_spill] sm:$0xff]  ;;  %v1291_v1 = vrot.slane %v2197_v63, 2 }
 0x1f8   : > { %1656 = vrot.lane.b32.xlu0 %v1280_v12, %s2412_s16  ;;  %2332 = vmatmul.mubr.msk.f32.gmra.mrb[6].mxu1 %vm861_vm11, %v1799_v26  ;;  %v1688_v37 = vsel %vm725_vm3, %v4264_v31, %v3582_v5 }
 0x1f9   : > { %v3746_v39 = vpop.permute.xlu1 %1506  ;;  %v1704_v26 = vsel %vm742_vm4, %v1688_v37, %v3620_v56 }
 0x1fa   : > { %v3748_v38 = vpop.permute.xlu0 %1364 }
 0x1fb   : > { %1516 = vrot.lane.b32.xlu1 %v1280_v12, %s2409_s29  ;;  %v2199_v12 = vld [vmem:[%s2449_s22 + $0x1a8] sm:$0x3] }
 0x1fc   : > { %1470 = vrot.lane.b32.xlu0 %v1277_v29, %s2408_s28  ;;  %v336_v29 = vrot.slane %v206_v20, 2  ;;  %v1294_v3 = vrot.slane %v2199_v12, 2 }
 0x1fd   : > { %v646_v59 = vpop.permute.xlu1 %645 }
 0x1fe   : > { %v1553_v7 = vpop.permute.xlu0 %1552  ;;  %v836_v23 = vsel %vm827_vm9, %v819_v18, %v646_v59  ;;  %v338_v50 = vsel %vm274_vm1, %v336_v29, %v337_v60  ;;  %v1720_v59 = vsel %vm759_vm5, %v1704_v26, %v3627_v51 }
 0x1ff   : > { %609 = vrot.lane.b32.xlu1 %v206_v20, %s2410_s30  ;;  %v1292_v20 = vrot.slane %v3764_v49, 2  ;;  %v1736_v19 = vsel %vm776_vm6, %v1720_v59, %v3672_v44 }
 0x200   : > { %1658 = vrot.lane.b32.xlu0 %v1282_v22, %s2412_s16 }
 0x201   : > { %v3761_v17 = vpop.permute.xlu1 %1412 }
 0x202   : > { %v3766_v48 = vpop.permute.xlu0 %1366 }
 0x203   : > { %1564 = vrot.lane.b32.xlu1 %v2197_v63, %s2410_s30  ;;  %v1752_v63 = vsel %vm793_vm7, %v1736_v19, %v3723_v62 }
 0x204   : > { %1518 = vrot.lane.b32.xlu0 %v1282_v22, %s2409_s29  ;;  %v335_v22 = vsel %vm233_vm0, %v332_v27, %v334_v46  ;;  %v1768_v51 = vsel %vm810_vm8, %v1752_v63, %v1553_v7  ;;  %v1293_v27 = vsel %vm274_vm1, %v1291_v1, %v1292_v20  ;;  %v4271_v46 = vld [vmem:[#allocation78_spill] sm:$0xff] }
 0x205   : > { %v1601_v55 = vpop.permute.xlu1 %1600 }
 0x206   : > { %v3781_v30 = vpop.permute.xlu0 %1554  ;;  %v1784_v40 = vsel %vm827_vm9, %v1768_v51, %v1601_v55  ;;  %v2391_v51 = vld [vmem:[%s2449_s22 + $0x78] sm:$0xff] }
 0x207   : > { %657 = vrot.lane.b32.xlu1 %v333_v24, %s2411_s4  ;;  %v339_v24 = vrot.slane %v208_v10, 2  ;;  %v4270_v10 = vld [vmem:[#allocation80_spill] sm:$0xff] }
 0x208   : > { %611 = vrot.lane.b32.xlu0 %v3755_v21, %s2410_s30  ;;  %v1289_v21 = vrot.slane %v2199_v12, 1 }
 0x209   : > { %v694_v15 = vpop.permute.xlu1 %693  ;;  %v340_v29 = vsel %vm274_vm1, %v337_v60, %v339_v24 }
 0x20a   : > { %v853_v42 = vsel %vm844_vm10, %v836_v23, %v694_v15  ;;  %v648_v0 = vpop.permute.xlu0 %647  ;;  %v1290_v62 = vsel %vm233_vm0, %v1287_v36, %v1289_v21  ;;  %v1295_v36 = vsel %vm274_vm1, %v1292_v20, %v1294_v3  ;;  %v4273_v3 = vld [vmem:[#allocation29_spill] sm:$0xff] }
 0x20b   : > { %1612 = vrot.lane.b32.xlu1 %v1288_v54, %s2411_s4  ;;  %2300 = vmatprep.mubr.msk.f32.mxu0 %vm861_vm11, %v853_v42  ;;  %v1689_v42 = vsel %vm725_vm3, %v4271_v46, %v3610_v41 }
 0x20c   : > { %1566 = vrot.lane.b32.xlu0 %v3764_v49, %s2410_s30  ;;  %v4265_v49 = vld [vmem:[#allocation12_spill] sm:$0xff]  ;;  %v1705_v12 = vsel %vm742_vm4, %v1689_v42, %v3629_v32 }
 0x20d   : > { %v3809_v5 = vpop.permute.xlu1 %1460  ;;  %v735_v4 = vsel %vm725_vm3, %v2390_v34, %v4265_v49  ;;  %v1721_v60 = vsel %vm759_vm5, %v1705_v12, %v3677_v58  ;;  %v4281_v12 = vld [vmem:[#allocation54_spill] sm:$0xff] }
 0x20e   : > { %v3814_v56 = vpop.permute.xlu0 %1414  ;;  %v752_v44 = vsel %vm742_vm4, %v735_v4, %v4266_v53  ;;  %v1737_v37 = vsel %vm776_vm6, %v1721_v60, %v3727_v14 }
 0x20f   : > { %705 = vrot.lane.b32.xlu1 %v338_v50, %s2412_s16  ;;  %v769_v28 = vsel %vm759_vm5, %v752_v44, %v4267_v11  ;;  %v1753_v26 = vsel %vm793_vm7, %v1737_v37, %v3746_v39  ;;  %v4276_v11 = vld [vmem:[#allocation69_spill] sm:$0xff] }
 0x210   : > { %659 = vrot.lane.b32.xlu0 %v335_v22, %s2411_s4  ;;  %v786_v16 = vsel %vm776_vm6, %v769_v28, %v4268_v6  ;;  %v1769_v41 = vsel %vm810_vm8, %v1753_v26, %v3781_v30 }
 0x211   : > { %v1649_v25 = vpop.permute.xlu1 %1648  ;;  %v803_v55 = vsel %vm793_vm7, %v786_v16, %v4269_v13 }
 0x212   : > { %v1800_v47 = vsel %vm844_vm10, %v1784_v40, %v1649_v25  ;;  %v1603_v7 = vpop.permute.xlu0 %1602  ;;  %v820_v33 = vsel %vm810_vm8, %v803_v55, %v4270_v10  ;;  %v4274_v40 = vld [vmem:[#allocation41_spill] sm:$0xff]  ;;  %v2392_v55 = vld [vmem:[%s2449_s22 + $0x80] sm:$0xff] }
 0x213   : > { %1660 = vrot.lane.b32.xlu1 %v1293_v27, %s2412_s16  ;;  %2334 = vmatprep.mubr.msk.f32.mxu1 %vm861_vm11, %v1800_v47  ;;  %v837_v54 = vsel %vm827_vm9, %v820_v33, %v648_v0  ;;  %v1785_v50 = vsel %vm827_vm9, %v1769_v41, %v1603_v7  ;;  %v4277_v47 = vld [vmem:[#allocation82_spill] sm:$0xff]  ;;  %v4282_v41 = vld [vmem:[#allocation68_spill] sm:$0xff] }
 0x214   : > { %1614 = vrot.lane.b32.xlu0 %v1290_v62, %s2411_s4  ;;  %v4275_v62 = vld [vmem:[#allocation55_spill] sm:$0xff] }
 0x215   : > { %v1321_v18 = vpop.permute.xlu1 %1320 }
 0x216   : > { %v696_v23 = vpop.permute.xlu0 %695  ;;  %v1692_v59 = vsel %vm725_vm3, %v3378_v45, %v1321_v18  ;;  %v4272_v45 = vld [vmem:[#allocation15_spill] sm:$0xff]  ;;  %v4279_v18 = vld [vmem:[#allocation28_spill] sm:$0xff] }
 0x217   : > { %v854_v15 = vsel %vm844_vm10, %v837_v54, %v696_v23  ;;  %1662 = vrot.lane.b32.xlu1 %v1295_v36, %s2412_s16  ;;  %v736_v27 = vsel %vm725_vm3, %v2391_v51, %v4272_v45  ;;  %v4278_v36 = vld [vmem:[#allocation14_spill] sm:$0xff]  ;;  %v1690_v54 = vsel %vm725_vm3, %v3256_v43, %v3706_v2  ;;  %v4280_v23 = vld [vmem:[#allocation40_spill] sm:$0xff] }
 0x218   : > { %707 = vrot.lane.b32.xlu0 %v340_v29, %s2412_s16  ;;  %2301 = vmatmul.mubr.msk.f32.gmra.mrb[8].mxu0 %vm861_vm11, %v854_v15  ;;  %v753_v53 = vsel %vm742_vm4, %v736_v27, %v4273_v3  ;;  %v737_v10 = vsel %vm725_vm3, %v2392_v55, %v4278_v36  ;;  %v1706_v46 = vsel %vm742_vm4, %v1690_v54, %v3748_v38 }
 0x219   : > { %v1509_v31 = vpop.permute.xlu1 %1508  ;;  %v754_v29 = vsel %vm742_vm4, %v737_v10, %v4279_v18  ;;  %v1722_v37 = vsel %vm759_vm5, %v1706_v46, %v3761_v17  ;;  %v2393_v18 = vld [vmem:[%s2449_s22 + $0x90] sm:$0xff] }
 0x21a   : > { %v3855_v0 = vpop.permute.xlu0 %1462  ;;  %v771_v15 = vsel %vm759_vm5, %v754_v29, %v4280_v23  ;;  %v1738_v2 = vsel %vm776_vm6, %v1722_v37, %v3809_v5  ;;  %v4283_v29 = vld [vmem:[#allocation17_spill] sm:$0xff]  ;;  %v4284_v23 = vld [vmem:[#allocation31_spill] sm:$0xff] }
 0x21b   : > { %v788_v60 = vsel %vm776_vm6, %v771_v15, %v4281_v12  ;;  %v738_v54 = vsel %vm725_vm3, %v2393_v18, %v4283_v29  ;;  %v4286_v37 = vld [vmem:[#allocation57_spill] sm:$0xff] }
 0x21c   : > { %v805_v43 = vsel %vm793_vm7, %v788_v60, %v4282_v41  ;;  %v755_v15 = vsel %vm742_vm4, %v738_v54, %v4284_v23 }
 0x21d   : > { %v1323_v1 = vpop.permute.xlu1 %1322 }
 0x21e   : > { %v1651_v32 = vpop.permute.xlu0 %1650  ;;  %v1693_v30 = vsel %vm725_vm3, %v3381_v9, %v1323_v1  ;;  %v770_v9 = vsel %vm759_vm5, %v753_v53, %v4274_v40  ;;  %v1754_v1 = vsel %vm793_vm7, %v1738_v2, %v1509_v31 }
 0x21f   : > { %v1801_v20 = vsel %vm844_vm10, %v1785_v50, %v1651_v32  ;;  %v787_v24 = vsel %vm776_vm6, %v770_v9, %v4275_v62 }
 0x220   : > { %2335 = vmatmul.mubr.msk.f32.gmra.mrb[8].mxu1 %vm861_vm11, %v1801_v20  ;;  %v804_v28 = vsel %vm793_vm7, %v787_v24, %v4276_v11 }
 0x221   : > { %v1511_v58 = vpop.permute.xlu1 %1510  ;;  %v821_v7 = vsel %vm810_vm8, %v804_v28, %v4277_v47 }
 0x222   : > { %v1369_v14 = vpop.permute.xlu0 %1368 }
 0x223   : > { %v3869_v22 = vsel %vm742_vm4, %v1692_v59, %v1369_v14 }
 0x225   : > { %v604_v39 = vpop.permute.xlu1 %603 }
 0x226   : > { %v1557_v21 = vpop.permute.xlu0 %1556  ;;  %v822_v50 = vsel %vm810_vm8, %v805_v43, %v604_v39  ;;  %v4287_v43 = vld [vmem:[#allocation71_spill] sm:$0xff] }
 0x227   : > { %v1770_v38 = vsel %vm810_vm8, %v1754_v1, %v1557_v21 }
 0x229   : > { %v1371_v19 = vpop.permute.xlu1 %1370 }
 0x22a   : > { %v3874_v63 = vsel %vm742_vm4, %v1693_v30, %v1371_v19  ;;  %v650_v34 = vpop.permute.xlu0 %649  ;;  %v1691_v30 = vsel %vm725_vm3, %v3259_v57, %v3737_v8 }
 0x22b   : > { %v838_v16 = vsel %vm827_vm9, %v821_v7, %v650_v34  ;;  %v1707_v31 = vsel %vm742_vm4, %v1691_v30, %v3766_v48  ;;  %v4289_v30 = vld [vmem:[#allocation30_spill] sm:$0xff] }
 0x22c   : > { %v1723_v39 = vsel %vm759_vm5, %v1707_v31, %v3814_v56  ;;  %v4290_v31 = vld [vmem:[#allocation42_spill] sm:$0xff] }
 0x22d   : > { %v1559_v49 = vpop.permute.xlu1 %1558  ;;  %v1739_v19 = vsel %vm776_vm6, %v1723_v39, %v3855_v0 }
 0x22e   : > { %v3876_v4 = vpop.permute.xlu0 %1416  ;;  %v1755_v8 = vsel %vm793_vm7, %v1739_v19, %v1511_v58 }
 0x22f   : > { %v1771_v34 = vsel %vm810_vm8, %v1755_v8, %v1559_v49  ;;  %v4291_v8 = vld [vmem:[#allocation56_spill] sm:$0xff] }
 0x231   : > { %v652_v44 = vpop.permute.xlu1 %651 }
 0x232   : > { %v1605_v25 = vpop.permute.xlu0 %1604  ;;  %v839_v32 = vsel %vm827_vm9, %v822_v50, %v652_v44 }
 0x233   : > { %v1786_v59 = vsel %vm827_vm9, %v1770_v38, %v1605_v25 }
 0x235   : > { %v3891_v6 = vpop.permute.xlu1 %1418 }
 0x236   : > { %v698_v13 = vpop.permute.xlu0 %697 }
 0x237   : > { %v855_v33 = vsel %vm844_vm10, %v838_v16, %v698_v13 }
 0x238   : > { %2303 = vmatprep.mubr.msk.f32.mxu0 %vm861_vm11, %v855_v33 }
 0x239   : > { %v1607_v42 = vpop.permute.xlu1 %1606 }
 0x23a   : > { %v3912_v26 = vpop.permute.xlu0 %1464  ;;  %v1787_v48 = vsel %vm827_vm9, %v1771_v34, %v1607_v42  ;;  %v4285_v42 = vld [vmem:[#allocation43_spill] sm:$0xff] }
 0x23b   : > { %v772_v12 = vsel %vm759_vm5, %v755_v15, %v4285_v42 }
 0x23c   : > { %v789_v41 = vsel %vm776_vm6, %v772_v12, %v4286_v37 }
 0x23d   : > { %v700_v20 = vpop.permute.xlu1 %699  ;;  %v806_v2 = vsel %vm793_vm7, %v789_v41, %v4287_v43  ;;  %v2395_v43 = vld [vmem:[%s2449_s22 + $0xa8] sm:$0xff] }
 0x23e   : > { %v856_v17 = vsel %vm844_vm10, %v839_v32, %v700_v20  ;;  %v1653_v14 = vpop.permute.xlu0 %1652  ;;  %v2394_v20 = vld [vmem:[%s2449_s22 + $0x98] sm:$0xff] }
 0x23f   : > { %v1802_v5 = vsel %vm844_vm10, %v1786_v59, %v1653_v14  ;;  %2304 = vmatmul.mubr.msk.f32.gmra.mrb[10].mxu0 %vm861_vm11, %v856_v17  ;;  %v4288_v59 = vld [vmem:[#allocation16_spill] sm:$0xff] }
 0x240   : > { %2337 = vmatprep.mubr.msk.f32.mxu1 %vm861_vm11, %v1802_v5  ;;  %v739_v17 = vsel %vm725_vm3, %v2394_v20, %v4288_v59  ;;  %v4295_v59 = vld [vmem:[#allocation47_spill] sm:$0xff] }
 0x241   : > { %v3934_v21 = vpop.permute.xlu1 %1466  ;;  %v756_v5 = vsel %vm742_vm4, %v739_v17, %v4289_v30 }
 0x242   : > { %v3938_v57 = vpop.permute.xlu0 %1324  ;;  %v773_v39 = vsel %vm759_vm5, %v756_v5, %v4290_v31 }
 0x243   : > { %v790_v34 = vsel %vm776_vm6, %v773_v39, %v4291_v8 }
 0x245   : > { %v1655_v51 = vpop.permute.xlu1 %1654 }
 0x246   : > { %v1803_v45 = vsel %vm844_vm10, %v1787_v48, %v1655_v51  ;;  %v1513_v27 = vpop.permute.xlu0 %1512  ;;  %v1724_v48 = vsel %vm759_vm5, %v3869_v22, %v3876_v4 }
 0x247   : > { %2338 = vmatmul.mubr.msk.f32.gmra.mrb[10].mxu1 %vm861_vm11, %v1803_v45  ;;  %v4292_v45 = vld [vmem:[#allocation70_spill] sm:$0xff] }
 0x249   : > { %v3945_v56 = vpop.permute.xlu1 %1326 }
 0x24a   : > { %v606_v3 = vpop.permute.xlu0 %605 }
 0x24b   : > { %v2290_v53 = vpop.f32.mrb[0].mxu0  ;;  %v823_v1 = vsel %vm810_vm8, %v806_v2, %v606_v3  ;;  %v807_v3 = vsel %vm793_vm7, %v790_v34, %v4292_v45  ;;  %v4293_v2 = vld [vmem:[#allocation19_spill] sm:$0xff] }
 0x24c   : > { %1060 = vst [vmem:[%s2444_s19 + $0x8] sm:$0xff] %v2290_v53  ;;  %v1098_v0 = vmul.f32 %v2290_v53, %v2290_v53  ;;  %v980_v44 = vpop.f32.mrb[1].mxu0 }
 0x24d   : > { %1059 = vst [vmem:[%s2444_s19] sm:$0xff] %v980_v44  ;;  %v3949_v58 = vadd.f32 %v2290_v53, %v980_v44  ;;  %v1097_v49 = vmul.f32 %v980_v44, %v980_v44  ;;  %v1515_v40 = vpop.permute.xlu1 %1514  ;;  %v1740_v53 = vsel %vm776_vm6, %v1724_v48, %v3912_v26  ;;  %v1694_v48 = vsel %vm725_vm3, %v3500_v61, %v3938_v57 }
 0x24e   : > { %v3951_v9 = vpop.permute.xlu0 %1372 }
 0x24f   : > { %v3953_v25 = vadd.f32 %v1098_v0, %v1097_v49  ;;  %v1756_v0 = vsel %vm793_vm7, %v1740_v53, %v1513_v27  ;;  %v1725_v27 = vsel %vm759_vm5, %v3874_v63, %v3891_v6 }
 0x251   : > { %v608_v62 = vpop.permute.xlu1 %607 }
 0x252   : > { %v1561_v24 = vpop.permute.xlu0 %1560  ;;  %v824_v44 = vsel %vm810_vm8, %v807_v3, %v608_v62 }
 0x253   : > { %v2324_v11 = vpop.f32.mrb[0].mxu1  ;;  %v1772_v49 = vsel %vm810_vm8, %v1756_v0, %v1561_v24  ;;  %v1741_v24 = vsel %vm776_vm6, %v1725_v27, %v3934_v21  ;;  %v1710_v0 = vsel %vm742_vm4, %v1694_v48, %v3951_v9 }
 0x254   : > { %2218 = vst [vmem:[%s2444_s19 + $0x88] sm:$0xff] %v2324_v11  ;;  %v2041_v28 = vmul.f32 %v2324_v11, %v2324_v11  ;;  %v1922_v47 = vpop.f32.mrb[1].mxu1 }
 0x255   : > { %2217 = vst [vmem:[%s2444_s19 + $0x80] sm:$0xff] %v1922_v47  ;;  %v3957_v7 = vadd.f32 %v2324_v11, %v1922_v47  ;;  %v2040_v16 = vmul.f32 %v1922_v47, %v1922_v47  ;;  %v3959_v13 = vpop.permute.xlu1 %1374 }
 0x256   : > { %v654_v55 = vpop.permute.xlu0 %653 }
 0x257   : > { %v3961_v36 = vadd.f32 %v2041_v28, %v2040_v16  ;;  %v840_v38 = vsel %vm827_vm9, %v823_v1, %v654_v55  ;;  %v1757_v55 = vsel %vm793_vm7, %v1741_v24, %v1515_v40  ;;  %v740_v1 = vsel %vm725_vm3, %v2395_v43, %v4293_v2 }
 0x259   : > { %v1563_v10 = vpop.permute.xlu1 %1562 }
 0x25a   : > { %v3963_v33 = vpop.permute.xlu0 %1420  ;;  %v1773_v18 = vsel %vm810_vm8, %v1757_v55, %v1563_v10 }
 0x25d   : > { %v656_v46 = vpop.permute.xlu1 %655 }
 0x25e   : > { %v1609_v60 = vpop.permute.xlu0 %1608  ;;  %v841_v11 = vsel %vm827_vm9, %v824_v44, %v656_v46 }
 0x25f   : > { %v1788_v47 = vsel %vm827_vm9, %v1772_v49, %v1609_v60 }
 0x261   : > { %v3977_v50 = vpop.permute.xlu1 %1422 }
 0x262   : > { %v702_v32 = vpop.permute.xlu0 %701 }
 0x263   : > { %v857_v14 = vsel %vm844_vm10, %v840_v38, %v702_v32  ;;  %v4294_v32 = vld [vmem:[#allocation33_spill] sm:$0xff] }
 0x264   : > { %2306 = vmatprep.mubr.msk.f32.mxu0 %vm861_vm11, %v857_v14 }
 0x265   : > { %v1611_v19 = vpop.permute.xlu1 %1610 }
 0x266   : > { %v3994_v51 = vpop.permute.xlu0 %1468  ;;  %v1789_v54 = vsel %vm827_vm9, %v1773_v18, %v1611_v19  ;;  %v4297_v19 = vld [vmem:[#allocation73_spill] sm:$0xff] }
 0x269   : > { %v704_v28 = vpop.permute.xlu1 %703 }
 0x26a   : > { %v858_v22 = vsel %vm844_vm10, %v841_v11, %v704_v28  ;;  %v1657_v4 = vpop.permute.xlu0 %1656 }
 0x26b   : > { %v1804_v16 = vsel %vm844_vm10, %v1788_v47, %v1657_v4  ;;  %2307 = vmatmul.mubr.msk.f32.gmra.mrb[12].mxu0 %vm861_vm11, %v858_v22  ;;  %v4298_v22 = vld [vmem:[#allocation18_spill] sm:$0xff] }
 0x26c   : > { %2340 = vmatprep.mubr.msk.f32.mxu1 %vm861_vm11, %v1804_v16  ;;  %v4299_v16 = vld [vmem:[#allocation32_spill] sm:$0xff] }
 0x26d   : > { %v1517_v26 = vpop.permute.xlu1 %1516 }
 0x26e   : > { %v1471_v62 = vpop.permute.xlu0 %1470 }
 0x271   : > { %v610_v29 = vpop.permute.xlu1 %609 }
 0x272   : > { %v1659_v23 = vpop.permute.xlu0 %1658 }
 0x273   : > { %v1805_v15 = vsel %vm844_vm10, %v1789_v54, %v1659_v23  ;;  %v2293_v46 = vpop.f32.mrb[2].mxu0 }
 0x274   : > { %1062 = vst [vmem:[%s2444_s19 + $0x18] sm:$0xff] %v2293_v46  ;;  %v990_v42 = vpop.f32.mrb[3].mxu0  ;;  %2341 = vmatmul.mubr.msk.f32.gmra.mrb[12].mxu1 %vm861_vm11, %v1805_v15  ;;  %v1100_v10 = vmul.f32 %v2293_v46, %v2293_v46 }
 0x275   : > { %1061 = vst [vmem:[%s2444_s19 + $0x10] sm:$0xff] %v990_v42  ;;  %v1076_v63 = vadd.f32 %v3949_v58, %v990_v42  ;;  %v1099_v6 = vmul.f32 %v990_v42, %v990_v42  ;;  %v1565_v21 = vpop.permute.xlu1 %1564  ;;  %v757_v58 = vsel %vm742_vm4, %v740_v1, %v4294_v32 }
 0x276   : > { %v1519_v40 = vpop.permute.xlu0 %1518  ;;  %v774_v17 = vsel %vm759_vm5, %v757_v58, %v4295_v59 }
 0x277   : > { %v1114_v12 = vadd.f32 %v3953_v25, %v1099_v6  ;;  %v4023_v60 = vadd.f32 %v2293_v46, %v1076_v63  ;;  %v4296_v25 = vld [vmem:[#allocation59_spill] sm:$0xff] }
 0x278   : > { %v791_v30 = vsel %vm776_vm6, %v774_v17, %v4296_v25 }
 0x279   : > { %v658_v37 = vpop.permute.xlu1 %657  ;;  %v4025_v41 = vadd.f32 %v1114_v12, %v1100_v10  ;;  %v808_v8 = vsel %vm793_vm7, %v791_v30, %v4297_v19 }
 0x27a   : > { %v612_v38 = vpop.permute.xlu0 %611  ;;  %v825_v44 = vsel %vm810_vm8, %v808_v8, %v610_v29 }
 0x27b   : > { %v2327_v20 = vpop.f32.mrb[2].mxu1  ;;  %v842_v49 = vsel %vm827_vm9, %v825_v44, %v658_v37 }
 0x27c   : > { %2220 = vst [vmem:[%s2444_s19 + $0x98] sm:$0xff] %v2327_v20  ;;  %v1932_v14 = vpop.f32.mrb[3].mxu1  ;;  %v2043_v45 = vmul.f32 %v2327_v20, %v2327_v20 }
 0x27d   : > { %2219 = vst [vmem:[%s2444_s19 + $0x90] sm:$0xff] %v1932_v14  ;;  %v2019_v5 = vadd.f32 %v3957_v7, %v1932_v14  ;;  %v2042_v31 = vmul.f32 %v1932_v14, %v1932_v14  ;;  %v1613_v39 = vpop.permute.xlu1 %1612  ;;  %v1726_v7 = vsel %vm759_vm5, %v1710_v0, %v3963_v33  ;;  %v741_v33 = vsel %vm725_vm3, %v3508_v35, %v4298_v22 }
 0x27e   : > { %v1567_v34 = vpop.permute.xlu0 %1566  ;;  %v1742_v47 = vsel %vm776_vm6, %v1726_v7, %v3994_v51  ;;  %v758_v27 = vsel %vm742_vm4, %v741_v33, %v4299_v16 }
 0x27f   : > { %v2057_v3 = vadd.f32 %v3961_v36, %v2042_v31  ;;  %v2020_v53 = vadd.f32 %v2327_v20, %v2019_v5  ;;  %v1695_v36 = vsel %vm725_vm3, %v3523_v52, %v3945_v56  ;;  %v1758_v9 = vsel %vm793_vm7, %v1742_v47, %v1517_v26  ;;  %v4300_v26 = vld [vmem:[#allocation44_spill] sm:$0xff] }
 0x280   : > { %v1711_v4 = vsel %vm742_vm4, %v1695_v36, %v3959_v13  ;;  %v1774_v51 = vsel %vm810_vm8, %v1758_v9, %v1565_v21  ;;  %v775_v55 = vsel %vm759_vm5, %v758_v27, %v4300_v26  ;;  %v4301_v13 = vld [vmem:[#allocation58_spill] sm:$0xff] }
 0x281   : > { %v706_v11 = vpop.permute.xlu1 %705  ;;  %v2058_v28 = vadd.f32 %v2057_v3, %v2043_v45  ;;  %v1727_v24 = vsel %vm759_vm5, %v1711_v4, %v3977_v50  ;;  %v1790_v52 = vsel %vm827_vm9, %v1774_v51, %v1613_v39  ;;  %v792_v54 = vsel %vm776_vm6, %v775_v55, %v4301_v13  ;;  %v4302_v50 = vld [vmem:[#allocation72_spill] sm:$0xff] }
 0x282   : > { %v859_v61 = vsel %vm844_vm10, %v842_v49, %v706_v11  ;;  %v660_v57 = vpop.permute.xlu0 %659  ;;  %v1743_v18 = vsel %vm776_vm6, %v1727_v24, %v1471_v62  ;;  %v809_v15 = vsel %vm793_vm7, %v792_v54, %v4302_v50 }
 0x283   : > { %2309 = vmatprep.mubr.msk.f32.mxu0 %vm861_vm11, %v859_v61  ;;  %v1759_v23 = vsel %vm793_vm7, %v1743_v18, %v1519_v40  ;;  %v826_v42 = vsel %vm810_vm8, %v809_v15, %v612_v38 }
 0x284   : > { %v1775_v46 = vsel %vm810_vm8, %v1759_v23, %v1567_v34  ;;  %v843_v6 = vsel %vm827_vm9, %v826_v42, %v660_v57 }
 0x285   : > { %v1661_v56 = vpop.permute.xlu1 %1660 }
 0x286   : > { %v1806_v35 = vsel %vm844_vm10, %v1790_v52, %v1661_v56  ;;  %v1615_v29 = vpop.permute.xlu0 %1614 }
 0x287   : > { %2343 = vmatprep.mubr.msk.f32.mxu1 %vm861_vm11, %v1806_v35  ;;  %v1791_v62 = vsel %vm827_vm9, %v1775_v46, %v1615_v29 }
 0x289   : > { %v1663_v63 = vpop.permute.xlu1 %1662 }
 0x28a   : > { %v1807_v21 = vsel %vm844_vm10, %v1791_v62, %v1663_v63  ;;  %v708_v10 = vpop.permute.xlu0 %707 }
 0x28b   : > { %v860_v40 = vsel %vm844_vm10, %v843_v6, %v708_v10  ;;  %2344 = vmatmul.mubr.msk.f32.gmra.mrb[14].mxu1 %vm861_vm11, %v1807_v21 }
 0x28c   : > { %2310 = vmatmul.mubr.msk.f32.gmra.mrb[14].mxu0 %vm861_vm11, %v860_v40 }
 0x29b   : > { %v2296_v12 = vpop.f32.mrb[4].mxu0 }
 0x29c   : > { %1064 = vst [vmem:[%s2444_s19 + $0x28] sm:$0xff] %v2296_v12  ;;  %v1000_v37 = vpop.f32.mrb[5].mxu0  ;;  %v1102_v1 = vmul.f32 %v2296_v12, %v2296_v12 }
 0x29d   : > { %1063 = vst [vmem:[%s2444_s19 + $0x20] sm:$0xff] %v1000_v37  ;;  %v1078_v43 = vadd.f32 %v4023_v60, %v1000_v37  ;;  %v1101_v2 = vmul.f32 %v1000_v37, %v1000_v37 }
 0x29f   : > { %v1116_v38 = vadd.f32 %v4025_v41, %v1101_v2  ;;  %v1079_v32 = vadd.f32 %v2296_v12, %v1078_v43 }
 0x2a1   : > { %v1117_v58 = vadd.f32 %v1116_v38, %v1102_v1 }
 0x2a3   : > { %v2330_v20 = vpop.f32.mrb[4].mxu1 }
 0x2a4   : > { %2222 = vst [vmem:[%s2444_s19 + $0xa8] sm:$0xff] %v2330_v20  ;;  %v1942_v59 = vpop.f32.mrb[5].mxu1  ;;  %v2045_v25 = vmul.f32 %v2330_v20, %v2330_v20 }
 0x2a5   : > { %2221 = vst [vmem:[%s2444_s19 + $0xa0] sm:$0xff] %v1942_v59  ;;  %v2021_v17 = vadd.f32 %v2020_v53, %v1942_v59  ;;  %v2044_v14 = vmul.f32 %v1942_v59, %v1942_v59 }
 0x2a7   : > { %v2059_v30 = vadd.f32 %v2058_v28, %v2044_v14  ;;  %v2022_v5 = vadd.f32 %v2330_v20, %v2021_v17 }
 0x2a9   : > { %v2060_v60 = vadd.f32 %v2059_v30, %v2045_v25 }
 0x2c3   : > { %v2299_v31 = vpop.f32.mrb[6].mxu0 }
 0x2c4   : > { %1066 = vst [vmem:[%s2444_s19 + $0x38] sm:$0xff] %v2299_v31  ;;  %v1010_v39 = vpop.f32.mrb[7].mxu0  ;;  %v1104_v8 = vmul.f32 %v2299_v31, %v2299_v31 }
 0x2c5   : > { %1065 = vst [vmem:[%s2444_s19 + $0x30] sm:$0xff] %v1010_v39  ;;  %v1080_v41 = vadd.f32 %v1079_v32, %v1010_v39  ;;  %v1103_v19 = vmul.f32 %v1010_v39, %v1010_v39 }
 0x2c7   : > { %v1118_v34 = vadd.f32 %v1117_v58, %v1103_v19  ;;  %v1081_v48 = vadd.f32 %v2299_v31, %v1080_v41 }
 0x2c9   : > { %v1119_v45 = vadd.f32 %v1118_v34, %v1104_v8 }
 0x2cb   : > { %v2333_v3 = vpop.f32.mrb[6].mxu1 }
 0x2cc   : > { %2224 = vst [vmem:[%s2444_s19 + $0xb8] sm:$0xff] %v2333_v3  ;;  %v1952_v53 = vpop.f32.mrb[7].mxu1  ;;  %v2047_v7 = vmul.f32 %v2333_v3, %v2333_v3 }
 0x2cd   : > { %2223 = vst [vmem:[%s2444_s19 + $0xb0] sm:$0xff] %v1952_v53  ;;  %v2023_v0 = vadd.f32 %v2022_v5, %v1952_v53  ;;  %v2046_v44 = vmul.f32 %v1952_v53, %v1952_v53 }
 0x2cf   : > { %v2061_v49 = vadd.f32 %v2060_v60, %v2046_v44  ;;  %v2024_v11 = vadd.f32 %v2333_v3, %v2023_v0 }
 0x2d1   : > { %v2062_v28 = vadd.f32 %v2061_v49, %v2047_v7 }
 0x2eb   : > { %v2302_v47 = vpop.f32.mrb[8].mxu0 }
 0x2ec   : > { %1068 = vst [vmem:[%s2444_s19 + $0x48] sm:$0xff] %v2302_v47  ;;  %v1020_v61 = vpop.f32.mrb[9].mxu0  ;;  %v1106_v9 = vmul.f32 %v2302_v47, %v2302_v47 }
 0x2ed   : > { %1067 = vst [vmem:[%s2444_s19 + $0x40] sm:$0xff] %v1020_v61  ;;  %v1082_v57 = vadd.f32 %v1081_v48, %v1020_v61  ;;  %v1105_v36 = vmul.f32 %v1020_v61, %v1020_v61 }
 0x2ef   : > { %v1120_v22 = vadd.f32 %v1119_v45, %v1105_v36  ;;  %v1083_v33 = vadd.f32 %v2302_v47, %v1082_v57 }
 0x2f1   : > { %v1121_v4 = vadd.f32 %v1120_v22, %v1106_v9 }
 0x2f3   : > { %v2336_v51 = vpop.f32.mrb[8].mxu1 }
 0x2f4   : > { %2226 = vst [vmem:[%s2444_s19 + $0xc8] sm:$0xff] %v2336_v51  ;;  %v1962_v16 = vpop.f32.mrb[9].mxu1  ;;  %v2049_v52 = vmul.f32 %v2336_v51, %v2336_v51 }
 0x2f5   : > { %2225 = vst [vmem:[%s2444_s19 + $0xc0] sm:$0xff] %v1962_v16  ;;  %v2025_v27 = vadd.f32 %v2024_v11, %v1962_v16  ;;  %v2048_v24 = vmul.f32 %v1962_v16, %v1962_v16 }
 0x2f7   : > { %v2063_v56 = vadd.f32 %v2062_v28, %v2048_v24  ;;  %v2026_v26 = vadd.f32 %v2336_v51, %v2025_v27 }
 0x2f9   : > { %v2064_v55 = vadd.f32 %v2063_v56, %v2049_v52 }
 0x312   : > { %v2305_v18 = vpop.f32.mrb[10].mxu0 }
 0x313   : > { %1070 = vst [vmem:[%s2444_s19 + $0x58] sm:$0xff] %v2305_v18  ;;  %v1030_v35 = vpop.f32.mrb[11].mxu0  ;;  %v1108_v54 = vmul.f32 %v2305_v18, %v2305_v18 }
 0x314   : > { %1069 = vst [vmem:[%s2444_s19 + $0x50] sm:$0xff] %v1030_v35  ;;  %v1084_v29 = vadd.f32 %v1083_v33, %v1030_v35  ;;  %v1107_v13 = vmul.f32 %v1030_v35, %v1030_v35 }
 0x316   : > { %v1122_v23 = vadd.f32 %v1121_v4, %v1107_v13  ;;  %v1085_v50 = vadd.f32 %v2305_v18, %v1084_v29 }
 0x318   : > { %v1123_v15 = vadd.f32 %v1122_v23, %v1108_v54 }
 0x31a   : > { %v2339_v46 = vpop.f32.mrb[10].mxu1 }
 0x31b   : > { %2228 = vst [vmem:[%s2444_s19 + $0xd8] sm:$0xff] %v2339_v46  ;;  %v1972_v42 = vpop.f32.mrb[11].mxu1  ;;  %v2051_v6 = vmul.f32 %v2339_v46, %v2339_v46 }
 0x31c   : > { %2227 = vst [vmem:[%s2444_s19 + $0xd0] sm:$0xff] %v1972_v42  ;;  %v2027_v62 = vadd.f32 %v2026_v26, %v1972_v42  ;;  %v2050_v63 = vmul.f32 %v1972_v42, %v1972_v42 }
 0x31e   : > { %v2065_v21 = vadd.f32 %v2064_v55, %v2050_v63  ;;  %v2028_v10 = vadd.f32 %v2339_v46, %v2027_v62  ;;  %v2078_v62 = vld [vmem:[%s4126_s3] sm:$0x3] }
 0x320   : > { %v2066_v40 = vadd.f32 %v2065_v21, %v2051_v6 }
 0x33e   : > { %v2308_v12 = vpop.f32.mrb[12].mxu0 }
 0x33f   : > { %1072 = vst [vmem:[%s2444_s19 + $0x68] sm:$0xff] %v2308_v12  ;;  %v1040_v37 = vpop.f32.mrb[13].mxu0  ;;  %v1110_v1 = vmul.f32 %v2308_v12, %v2308_v12 }
 0x340   : > { %1071 = vst [vmem:[%s2444_s19 + $0x60] sm:$0xff] %v1040_v37  ;;  %v1086_v43 = vadd.f32 %v1085_v50, %v1040_v37  ;;  %v1109_v2 = vmul.f32 %v1040_v37, %v1040_v37 }
 0x342   : > { %v1124_v38 = vadd.f32 %v1123_v15, %v1109_v2  ;;  %v1087_v32 = vadd.f32 %v2308_v12, %v1086_v43 }
 0x344   : > { %v1125_v58 = vadd.f32 %v1124_v38, %v1110_v1 }
 0x347   : > { %v2342_v20 = vpop.f32.mrb[12].mxu1 }
 0x348   : > { %2230 = vst [vmem:[%s2444_s19 + $0xe8] sm:$0xff] %v2342_v20  ;;  %v1982_v59 = vpop.f32.mrb[13].mxu1  ;;  %v2053_v25 = vmul.f32 %v2342_v20, %v2342_v20 }
 0x349   : > { %2229 = vst [vmem:[%s2444_s19 + $0xe0] sm:$0xff] %v1982_v59  ;;  %v2029_v17 = vadd.f32 %v2028_v10, %v1982_v59  ;;  %v2052_v14 = vmul.f32 %v1982_v59, %v1982_v59 }
 0x34b   : > { %v2067_v30 = vadd.f32 %v2066_v40, %v2052_v14  ;;  %v2030_v5 = vadd.f32 %v2342_v20, %v2029_v17 }
 0x34d   : > { %v2068_v60 = vadd.f32 %v2067_v30, %v2053_v25 }
 0x35e   : > { %v2345_v31 = vpop.f32.mrb[14].mxu1 }
 0x35f   : > { %v2311_v39 = vpop.f32.mrb[14].mxu0  ;;  %2232 = vst [vmem:[%s2444_s19 + $0xf8] sm:$0xff] %v2345_v31  ;;  %v1992_v41 = vpop.f32.mrb[15].mxu1  ;;  %v2055_v3 = vmul.f32 %v2345_v31, %v2345_v31 }
 0x360   : > { %1074 = vst [vmem:[%s2444_s19 + $0x78] sm:$0xff] %v2311_v39  ;;  %v1050_v19 = vpop.f32.mrb[15].mxu0  ;;  %2231 = vst [vmem:[%s2444_s19 + $0xf0] sm:$0xff] %v1992_v41  ;;  %v2031_v8 = vadd.f32 %v2030_v5, %v1992_v41  ;;  %v2054_v34 = vmul.f32 %v1992_v41, %v1992_v41  ;;  %v1112_v44 = vmul.f32 %v2311_v39, %v2311_v39 }
 0x361   : > { %1073 = vst [vmem:[%s2444_s19 + $0x70] sm:$0xff] %v1050_v19  ;;  %v1088_v48 = vadd.f32 %v1087_v32, %v1050_v19  ;;  %v1111_v45 = vmul.f32 %v1050_v19, %v1050_v19 }
 0x362   : > { %v2032_v53 = vadd.f32 %v2345_v31, %v2031_v8  ;;  %v2069_v0 = vadd.f32 %v2068_v60, %v2054_v34 }
 0x363   : > { %v1089_v7 = vadd.f32 %v2311_v39, %v1088_v48  ;;  %v1126_v49 = vadd.f32 %v1125_v58, %v1111_v45 }
 0x364   : > { %v2033_v11 = vrot.slane %v2032_v53, 4  ;;  %v2070_v28 = vadd.f32 %v2069_v0, %v2055_v3 }
 0x365   : > { %v1090_v47 = vrot.slane %v1089_v7, 4  ;;  %v1127_v61 = vadd.f32 %v1126_v49, %v1112_v44 }
 0x366   : > { %v2034_v57 = vadd.f32 %v2033_v11, %v2032_v53  ;;  %v2071_v36 = vrot.slane %v2070_v28, 4 }
 0x367   : > { %v1091_v9 = vadd.f32 %v1090_v47, %v1089_v7  ;;  %v1128_v22 = vrot.slane %v1127_v61, 4 }
 0x368   : > { %v2035_v33 = vrot.slane %v2034_v57, 2  ;;  %v2072_v4 = vadd.f32 %v2071_v36, %v2070_v28 }
 0x369   : > { %v1092_v51 = vrot.slane %v1091_v9, 2  ;;  %v1129_v16 = vadd.f32 %v1128_v22, %v1127_v61 }
 0x36a   : > { %v2036_v27 = vadd.f32 %v2035_v33, %v2034_v57  ;;  %v2073_v24 = vrot.slane %v2072_v4, 2 }
 0x36b   : > { %v1093_v52 = vadd.f32 %v1092_v51, %v1091_v9  ;;  %v1130_v56 = vrot.slane %v1129_v16, 2 }
 0x36c   : > { %v2037_v26 = vrot.slane %v2036_v27, 1  ;;  %v2074_v55 = vadd.f32 %v2073_v24, %v2072_v4 }
 0x36d   : > { %v1094_v18 = vrot.slane %v1093_v52, 1  ;;  %v1131_v35 = vadd.f32 %v1130_v56, %v1129_v16 }
 0x36e   : > { %v2038_v29 = vadd.f32 %v2037_v26, %v2036_v27  ;;  %v2075_v13 = vrot.slane %v2074_v55, 1 }
 0x36f   : > { %v1095_v54 = vadd.f32 %v1094_v18, %v1093_v52  ;;  %v1132_v23 = vrot.slane %v1131_v35, 1 }
 0x370   : > { %v2076_v50 = vadd.f32 %v2075_v13, %v2074_v55 }
 0x371   : > { %v1133_v15 = vadd.f32 %v1132_v23, %v1131_v35  ;;  %v2039_v46 = vadd.f32 %v2038_v29, %v1095_v54 }
 0x373   : > { %v2077_v42 = vadd.f32 %v2076_v50, %v1133_v15 }
 0x375   : > { %v2080_v63 = vsel %vm2079_vm12, %v2039_v46, %v2077_v42 }
 0x376   : > { %v2081_v6 = vadd.f32 %v2080_v63, %v2078_v62 }
 0x378   : > { %2082 = vst [vmem:[%s4126_s3] sm:$0x3] %v2081_v6 }
 0x379 PF: > { %s14_s12 = sadd.s32 1, %s2402_s12  }
 0x37a   : > { %p11_p5 = scmp.ge.s32.totalorder %s14_s12, 4  }
 0x37c   :  { %13 = sbr.rel (!%p11_p5) target bundleno = 1 (0x1), region = 72 }

</bundles_post_ra>
